<compile_context>
chip_gen: v7x
topology: tpu7x:2x2x1
jax: 0.10.0
libtpu: 0.0.40
codegen_flags: <defaults>
</compile_context>

<pallas_src>
import functools

import numpy as np

import jax
import jax.numpy as jnp
from jax.experimental import pallas as pl
from jax.experimental.pallas import tpu as pltpu

KSIZE = 7
PAD = 3
NTAPS = KSIZE * KSIZE


def _spatial_attn_kernel(w_ref, b_ref, mask_ref, x_ref, o_ref, maps_ref, *,
                         bt, C, H, W, mul_in_input_dtype):
    """Process `bt` batch elements per grid step.

    w_ref:    SMEM f32[2*49]           BN-folded taps (avg-channel, then max)
    b_ref:    SMEM f32[1]              BN-folded conv bias
    mask_ref: VMEM f32[49, H*W]        per-tap {0,1} boundary masks (flat layout)
    x_ref:    VMEM dtype[bt, C, H*W]   lane-dense input block
    o_ref:    VMEM dtype[bt, C, H*W]   lane-dense output block
    maps_ref: VMEM f32[2, bt, H*W]     stacked avg/max maps (reused for attn)
    """
    HW = H * W
    inv_c = jnp.float32(1.0 / C)

    # Hoist the 98 folded tap weights + bias out of the tap loop (SMEM scalars).
    wv = [w_ref[i] for i in range(2 * NTAPS)]
    bias = b_ref[0]

    # ---- Pass 1: fused channel mean & max as block reductions over C (one
    # sublane reduce per map instead of a C-long serial chain).  Rows are
    # stacked into a tiny scratch slab so the conv below is vectorized over bt.
    for b in range(bt):                                    # static, bt is small
        xf = x_ref[b].astype(jnp.float32)                  # (C, HW) lane-dense
        maps_ref[0, b:b + 1, :] = jnp.sum(xf, axis=0, keepdims=True) * inv_c
        maps_ref[1, b:b + 1, :] = jnp.max(xf, axis=0, keepdims=True)

    avg = maps_ref[0]                                      # (bt, HW) f32
    mx = maps_ref[1]                                       # (bt, HW) f32

    # ---- 7x7 'same' conv in the flattened lane-dense layout: each tap is a
    # static roll (XLU) of the whole (bt, HW) slab, masked by a precomputed
    # boundary mask, weighted by the BN-folded scalar taps.  Two independent
    # accumulators shorten the VALU chain without blowing the vreg budget.
    acc0 = jnp.zeros((bt, HW), jnp.float32)
    acc1 = jnp.zeros((bt, HW), jnp.float32)
    for ky in range(KSIZE):
        dy = ky - PAD
        for kx in range(KSIZE):
            dx = kx - PAD
            k = ky * KSIZE + kx
            # want shifted[p] = map[p + off]  (off = dy*W + dx, no wrap where
            # the mask is 1);  jnp/pltpu roll semantics: out[i] = in[(i-s) % n]
            off = dy * W + dx
            shift = (-off) % HW
            if shift:
                a_sh = pltpu.roll(avg, shift, axis=1)
                m_sh = pltpu.roll(mx, shift, axis=1)
            else:
                a_sh, m_sh = avg, mx
            mask = mask_ref[k:k + 1, :]                    # (1, HW) {0,1} f32
            tap = (wv[k] * a_sh + wv[NTAPS + k] * m_sh) * mask
            if k & 1:
                acc1 = acc1 + tap
            else:
                acc0 = acc0 + tap
    attn = jax.nn.sigmoid(acc0 + acc1 + bias)              # (bt, HW) f32
    maps_ref[0] = attn                                     # reuse scratch rows

    # ---- Pass 2: apply attention — one lane-dense multiply + store per batch
    # element over the (C, HW) slab.
    for b in range(bt):
        attn_b = maps_ref[0, b:b + 1, :]                   # (1, HW) f32
        xb = x_ref[b]                                      # (C, HW) input dtype
        if mul_in_input_dtype:
            # bf16 on v6e/v7x: multiply natively in bf16 (halves VALU work on
            # the dominant sweep; output is bf16 anyway).
            o_ref[b] = xb * attn_b.astype(xb.dtype)
        else:
            o_ref[b] = (xb.astype(jnp.float32) * attn_b).astype(o_ref.dtype)
        # TODO(synk): on v5e (no bf16 VPU) keep the f32 path even for bf16 in.


def _vmem_capacity_bytes():
    try:
        return int(pltpu.get_tpu_info().vmem_capacity_bytes)
    except Exception:
        return 64 << 20   # conservative: v7x physical VMEM per TensorCore


def _pick_batch_tile(n, per_elem_bytes, hw, vmem_cap_bytes):
    """Batch elements per grid step.

    HBM-bound kernel (one read + one write of x), so we want blocks of ~1-2 MiB
    to amortize the ~0.35 us per-grid-step overhead, bounded by (a) the conv
    slab vreg budget (the tap loop keeps several (bt, HW) f32 slabs live) and
    (b) double-buffered in+out blocks fitting comfortably in VMEM (v7x: 64 MiB),
    while keeping >= 2 grid steps for pipelining / v7x 2-TC sharding.
    """
    target_bytes = 2 << 20
    bt = max(1, target_bytes // max(per_elem_bytes, 1))
    bt = min(bt, max(1, 4096 // max(hw, 1)))          # conv vreg-pressure bound
    bt = min(bt, max(1, (vmem_cap_bytes // 3) // max(4 * per_elem_bytes, 1)))
    bt = min(bt, n)
    if n >= 2:
        bt = min(bt, n // 2)                          # keep >= 2 grid steps
    bt = max(bt, 1)
    while n % bt:                                     # need an even batch split
        bt -= 1   # TODO(synk): pad N in the wrapper for prime batch sizes
    return bt


@jax.jit
def spatial_attention(x, conv_w, conv_b, bn_gamma, bn_beta, bn_mean, bn_var):
    """x: (N, C, H, W). conv_w: (1, 2, 7, 7). conv_b: (1,). BN params: (1,)."""
    N, C, H, W = x.shape
    HW = H * W
    eps = 1e-5

    # Fold eval-mode BatchNorm2d(1) into the conv weights / bias.
    scale = bn_gamma / jnp.sqrt(bn_var + eps)                        # (1,)
    w_folded = (conv_w * scale[:, None, None, None]).reshape(-1)     # (2*49,)
    b_folded = (conv_b - bn_mean) * scale + bn_beta                  # (1,)
    w_folded = w_folded.astype(jnp.float32)
    b_folded = b_folded.astype(jnp.float32)

    # Precomputed {0,1} boundary masks for the 49 taps of the 'same' 7x7 conv in
    # the flattened layout.  Built with numpy (shapes are static under jit) so
    # they fold to a constant and no int div/mod is needed inside the kernel.
    rr, cc = np.meshgrid(np.arange(H), np.arange(W), indexing="ij")
    rr = rr.reshape(-1)
    cc = cc.reshape(-1)
    m = np.zeros((NTAPS, HW), np.float32)
    for ky in range(KSIZE):
        for kx in range(KSIZE):
            dy, dx = ky - PAD, kx - PAD
            m[ky * KSIZE + kx] = ((rr + dy >= 0) & (rr + dy < H) &
                                  (cc + dx >= 0) & (cc + dx < W))
    masks = jnp.asarray(m)                                           # (49, HW)

    # Lane-dense layout for the big tensors (wrapper reshape is free).  Note:
    # for W in {7,14,28,56} HW is not a multiple of 128, so the tail of the
    # final store is still partially masked — acceptable residual cost.
    x_flat = x.reshape(N, C, HW)

    vmem_cap = _vmem_capacity_bytes()
    itemsize = x.dtype.itemsize
    bt = _pick_batch_tile(N, C * HW * itemsize, HW, vmem_cap)
    grid = (N // bt,)

    # VMEM budget: double-buffered input + output blocks + masks + scratch.
    block_bytes = bt * C * HW * itemsize
    vmem_limit = (4 * block_bytes + 2 * NTAPS * HW * 4
                  + 2 * max(bt, 8) * HW * 4 + (4 << 20))
    vmem_limit = int(min(max(vmem_limit, 16 << 20), vmem_cap * 3 // 4))
    # TODO(synk): if a single image's C*HW block alone approaches ~vmem_cap/8,
    # add tiling over C (reduction axis + accumulator) or H (3-row halo), and a
    # second 'parallel' grid axis so N==1 still feeds both v7x TensorCores.

    mul_in_input_dtype = bool(x.dtype == jnp.bfloat16)

    kernel = functools.partial(_spatial_attn_kernel, bt=bt, C=C, H=H, W=W,
                               mul_in_input_dtype=mul_in_input_dtype)
    out_flat = pl.pallas_call(
        kernel,
        out_shape=jax.ShapeDtypeStruct((N, C, HW), x.dtype),
        grid_spec=pltpu.PrefetchScalarGridSpec(
            num_scalar_prefetch=0,
            grid=grid,
            in_specs=[
                pl.BlockSpec(memory_space=pltpu.MemorySpace.SMEM),   # taps
                pl.BlockSpec(memory_space=pltpu.MemorySpace.SMEM),   # bias
                pl.BlockSpec((NTAPS, HW), lambda n: (0, 0)),         # tap masks
                # If xprof ever shows exposed DMA on v6e, add
                # pipeline_mode=pl.Buffered(3) to this x BlockSpec.
                pl.BlockSpec((bt, C, HW), lambda n: (n, 0, 0)),      # x block
            ],
            out_specs=pl.BlockSpec((bt, C, HW), lambda n: (n, 0, 0)),
            scratch_shapes=[pltpu.VMEM((2, bt, HW), jnp.float32)],
        ),
        compiler_params=pltpu.CompilerParams(
            dimension_semantics=("parallel",),
            vmem_limit_bytes=vmem_limit,
        ),
    )(w_folded, b_folded, masks, x_flat)
    return out_flat.reshape(N, C, H, W)


def _reference(x, conv_w, conv_b, bn_gamma, bn_beta, bn_mean, bn_var):
    """Pure-JAX reference for validation."""
    eps = 1e-5
    avg = jnp.mean(x, axis=1, keepdims=True)
    mx = jnp.max(x, axis=1, keepdims=True)
    xc = jnp.concatenate([avg, mx], axis=1)          # (N, 2, H, W)
    y = jax.lax.conv_general_dilated(
        xc, conv_w, window_strides=(1, 1), padding=((PAD, PAD), (PAD, PAD)),
        dimension_numbers=("NCHW", "OIHW", "NCHW"))
    y = y + conv_b[None, :, None, None]
    y = (y - bn_mean[None, :, None, None]) / jnp.sqrt(bn_var + eps)[None, :, None, None]
    y = y * bn_gamma[None, :, None, None] + bn_beta[None, :, None, None]
    attn = jax.nn.sigmoid(y)
    return x * attn


if __name__ == "__main__":
    key = jax.random.PRNGKey(0)
    kx, kw, kb = jax.random.split(key, 3)

    N, C, H, W = 2, 4, 16, 16
    x = jax.random.normal(kx, (N, C, H, W), dtype=jnp.float32)

    # Deterministic synthetic parameters (shapes per nn.Conv2d(2, 1, 7, padding=3)
    # and nn.BatchNorm2d(1) defaults).
    conv_w = jax.random.normal(kw, (1, 2, KSIZE, KSIZE), dtype=jnp.float32) * 0.1
    conv_b = jax.random.normal(kb, (1,), dtype=jnp.float32) * 0.1
    bn_gamma = jnp.ones((1,), jnp.float32)
    bn_beta = jnp.zeros((1,), jnp.float32)
    bn_mean = jnp.zeros((1,), jnp.float32)
    bn_var = jnp.ones((1,), jnp.float32)

    out = spatial_attention(x, conv_w, conv_b, bn_gamma, bn_beta, bn_mean, bn_var)
    out = jax.block_until_ready(out)

    ref = _reference(x, conv_w, conv_b, bn_gamma, bn_beta, bn_mean, bn_var)
    assert out.shape == (N, C, H, W)
    assert jnp.allclose(out, ref, atol=1e-4, rtol=1e-4), \
        f"max abs err {jnp.max(jnp.abs(out - ref))}"

    print("KERNEL_OK")
</pallas_src>

<mosaic_0001>
module attributes {stable_mosaic.version = 11 : i64} {
  func.func @_spatial_attn_kernel(%arg0: i32, %arg1: memref<98xf32, #tpu.memory_space<smem>>, %arg2: memref<1xf32, #tpu.memory_space<smem>>, %arg3: memref<49x256xf32, #tpu.memory_space<vmem>>, %arg4: memref<1x4x256xf32, #tpu.memory_space<vmem>>, %arg5: memref<1x4x256xf32, #tpu.memory_space<vmem>>, %arg6: memref<2x1x256xf32, #tpu.memory_space<vmem>>) attributes {dimension_semantics = [#tpu.dimension_semantics<parallel>], iteration_bounds = array<i64: 2>, scalar_prefetch = 0 : i64, scratch_operands = 1 : i64, tpu.core_type = #tpu.core_type<tc>, window_params = [{transform_indices = @transform_0, window_bounds = array<i64: 98>}, {transform_indices = @transform_1, window_bounds = array<i64: 1>}, {pipeline_mode = #tpu.pipeline_mode<synchronous>, transform_indices = @transform_2, window_bounds = array<i64: 49, 256>}, {transform_indices = @transform_3, window_bounds = array<i64: 1, 4, 256>}, {transform_indices = @transform_4, window_bounds = array<i64: 1, 4, 256>}]} {
    %c0 = arith.constant 0 : index
    %0 = memref.load %arg1[%c0] : memref<98xf32, #tpu.memory_space<smem>>
    %c1 = arith.constant 1 : index
    %1 = memref.load %arg1[%c1] : memref<98xf32, #tpu.memory_space<smem>>
    %c2 = arith.constant 2 : index
    %2 = memref.load %arg1[%c2] : memref<98xf32, #tpu.memory_space<smem>>
    %c3 = arith.constant 3 : index
    %3 = memref.load %arg1[%c3] : memref<98xf32, #tpu.memory_space<smem>>
    %c4 = arith.constant 4 : index
    %4 = memref.load %arg1[%c4] : memref<98xf32, #tpu.memory_space<smem>>
    %c5 = arith.constant 5 : index
    %5 = memref.load %arg1[%c5] : memref<98xf32, #tpu.memory_space<smem>>
    %c6 = arith.constant 6 : index
    %6 = memref.load %arg1[%c6] : memref<98xf32, #tpu.memory_space<smem>>
    %c7 = arith.constant 7 : index
    %7 = memref.load %arg1[%c7] : memref<98xf32, #tpu.memory_space<smem>>
    %c8 = arith.constant 8 : index
    %8 = memref.load %arg1[%c8] : memref<98xf32, #tpu.memory_space<smem>>
    %c9 = arith.constant 9 : index
    %9 = memref.load %arg1[%c9] : memref<98xf32, #tpu.memory_space<smem>>
    %c10 = arith.constant 10 : index
    %10 = memref.load %arg1[%c10] : memref<98xf32, #tpu.memory_space<smem>>
    %c11 = arith.constant 11 : index
    %11 = memref.load %arg1[%c11] : memref<98xf32, #tpu.memory_space<smem>>
    %c12 = arith.constant 12 : index
    %12 = memref.load %arg1[%c12] : memref<98xf32, #tpu.memory_space<smem>>
    %c13 = arith.constant 13 : index
    %13 = memref.load %arg1[%c13] : memref<98xf32, #tpu.memory_space<smem>>
    %c14 = arith.constant 14 : index
    %14 = memref.load %arg1[%c14] : memref<98xf32, #tpu.memory_space<smem>>
    %c15 = arith.constant 15 : index
    %15 = memref.load %arg1[%c15] : memref<98xf32, #tpu.memory_space<smem>>
    %c16 = arith.constant 16 : index
    %16 = memref.load %arg1[%c16] : memref<98xf32, #tpu.memory_space<smem>>
    %c17 = arith.constant 17 : index
    %17 = memref.load %arg1[%c17] : memref<98xf32, #tpu.memory_space<smem>>
    %c18 = arith.constant 18 : index
    %18 = memref.load %arg1[%c18] : memref<98xf32, #tpu.memory_space<smem>>
    %c19 = arith.constant 19 : index
    %19 = memref.load %arg1[%c19] : memref<98xf32, #tpu.memory_space<smem>>
    %c20 = arith.constant 20 : index
    %20 = memref.load %arg1[%c20] : memref<98xf32, #tpu.memory_space<smem>>
    %c21 = arith.constant 21 : index
    %21 = memref.load %arg1[%c21] : memref<98xf32, #tpu.memory_space<smem>>
    %c22 = arith.constant 22 : index
    %22 = memref.load %arg1[%c22] : memref<98xf32, #tpu.memory_space<smem>>
    %c23 = arith.constant 23 : index
    %23 = memref.load %arg1[%c23] : memref<98xf32, #tpu.memory_space<smem>>
    %c24 = arith.constant 24 : index
    %24 = memref.load %arg1[%c24] : memref<98xf32, #tpu.memory_space<smem>>
    %c25 = arith.constant 25 : index
    %25 = memref.load %arg1[%c25] : memref<98xf32, #tpu.memory_space<smem>>
    %c26 = arith.constant 26 : index
    %26 = memref.load %arg1[%c26] : memref<98xf32, #tpu.memory_space<smem>>
    %c27 = arith.constant 27 : index
    %27 = memref.load %arg1[%c27] : memref<98xf32, #tpu.memory_space<smem>>
    %c28 = arith.constant 28 : index
    %28 = memref.load %arg1[%c28] : memref<98xf32, #tpu.memory_space<smem>>
    %c29 = arith.constant 29 : index
    %29 = memref.load %arg1[%c29] : memref<98xf32, #tpu.memory_space<smem>>
    %c30 = arith.constant 30 : index
    %30 = memref.load %arg1[%c30] : memref<98xf32, #tpu.memory_space<smem>>
    %c31 = arith.constant 31 : index
    %31 = memref.load %arg1[%c31] : memref<98xf32, #tpu.memory_space<smem>>
    %c32 = arith.constant 32 : index
    %32 = memref.load %arg1[%c32] : memref<98xf32, #tpu.memory_space<smem>>
    %c33 = arith.constant 33 : index
    %33 = memref.load %arg1[%c33] : memref<98xf32, #tpu.memory_space<smem>>
    %c34 = arith.constant 34 : index
    %34 = memref.load %arg1[%c34] : memref<98xf32, #tpu.memory_space<smem>>
    %c35 = arith.constant 35 : index
    %35 = memref.load %arg1[%c35] : memref<98xf32, #tpu.memory_space<smem>>
    %c36 = arith.constant 36 : index
    %36 = memref.load %arg1[%c36] : memref<98xf32, #tpu.memory_space<smem>>
    %c37 = arith.constant 37 : index
    %37 = memref.load %arg1[%c37] : memref<98xf32, #tpu.memory_space<smem>>
    %c38 = arith.constant 38 : index
    %38 = memref.load %arg1[%c38] : memref<98xf32, #tpu.memory_space<smem>>
    %c39 = arith.constant 39 : index
    %39 = memref.load %arg1[%c39] : memref<98xf32, #tpu.memory_space<smem>>
    %c40 = arith.constant 40 : index
    %40 = memref.load %arg1[%c40] : memref<98xf32, #tpu.memory_space<smem>>
    %c41 = arith.constant 41 : index
    %41 = memref.load %arg1[%c41] : memref<98xf32, #tpu.memory_space<smem>>
    %c42 = arith.constant 42 : index
    %42 = memref.load %arg1[%c42] : memref<98xf32, #tpu.memory_space<smem>>
    %c43 = arith.constant 43 : index
    %43 = memref.load %arg1[%c43] : memref<98xf32, #tpu.memory_space<smem>>
    %c44 = arith.constant 44 : index
    %44 = memref.load %arg1[%c44] : memref<98xf32, #tpu.memory_space<smem>>
    %c45 = arith.constant 45 : index
    %45 = memref.load %arg1[%c45] : memref<98xf32, #tpu.memory_space<smem>>
    %c46 = arith.constant 46 : index
    %46 = memref.load %arg1[%c46] : memref<98xf32, #tpu.memory_space<smem>>
    %c47 = arith.constant 47 : index
    %47 = memref.load %arg1[%c47] : memref<98xf32, #tpu.memory_space<smem>>
    %c48 = arith.constant 48 : index
    %48 = memref.load %arg1[%c48] : memref<98xf32, #tpu.memory_space<smem>>
    %c49 = arith.constant 49 : index
    %49 = memref.load %arg1[%c49] : memref<98xf32, #tpu.memory_space<smem>>
    %c50 = arith.constant 50 : index
    %50 = memref.load %arg1[%c50] : memref<98xf32, #tpu.memory_space<smem>>
    %c51 = arith.constant 51 : index
    %51 = memref.load %arg1[%c51] : memref<98xf32, #tpu.memory_space<smem>>
    %c52 = arith.constant 52 : index
    %52 = memref.load %arg1[%c52] : memref<98xf32, #tpu.memory_space<smem>>
    %c53 = arith.constant 53 : index
    %53 = memref.load %arg1[%c53] : memref<98xf32, #tpu.memory_space<smem>>
    %c54 = arith.constant 54 : index
    %54 = memref.load %arg1[%c54] : memref<98xf32, #tpu.memory_space<smem>>
    %c55 = arith.constant 55 : index
    %55 = memref.load %arg1[%c55] : memref<98xf32, #tpu.memory_space<smem>>
    %c56 = arith.constant 56 : index
    %56 = memref.load %arg1[%c56] : memref<98xf32, #tpu.memory_space<smem>>
    %c57 = arith.constant 57 : index
    %57 = memref.load %arg1[%c57] : memref<98xf32, #tpu.memory_space<smem>>
    %c58 = arith.constant 58 : index
    %58 = memref.load %arg1[%c58] : memref<98xf32, #tpu.memory_space<smem>>
    %c59 = arith.constant 59 : index
    %59 = memref.load %arg1[%c59] : memref<98xf32, #tpu.memory_space<smem>>
    %c60 = arith.constant 60 : index
    %60 = memref.load %arg1[%c60] : memref<98xf32, #tpu.memory_space<smem>>
    %c61 = arith.constant 61 : index
    %61 = memref.load %arg1[%c61] : memref<98xf32, #tpu.memory_space<smem>>
    %c62 = arith.constant 62 : index
    %62 = memref.load %arg1[%c62] : memref<98xf32, #tpu.memory_space<smem>>
    %c63 = arith.constant 63 : index
    %63 = memref.load %arg1[%c63] : memref<98xf32, #tpu.memory_space<smem>>
    %c64 = arith.constant 64 : index
    %64 = memref.load %arg1[%c64] : memref<98xf32, #tpu.memory_space<smem>>
    %c65 = arith.constant 65 : index
    %65 = memref.load %arg1[%c65] : memref<98xf32, #tpu.memory_space<smem>>
    %c66 = arith.constant 66 : index
    %66 = memref.load %arg1[%c66] : memref<98xf32, #tpu.memory_space<smem>>
    %c67 = arith.constant 67 : index
    %67 = memref.load %arg1[%c67] : memref<98xf32, #tpu.memory_space<smem>>
    %c68 = arith.constant 68 : index
    %68 = memref.load %arg1[%c68] : memref<98xf32, #tpu.memory_space<smem>>
    %c69 = arith.constant 69 : index
    %69 = memref.load %arg1[%c69] : memref<98xf32, #tpu.memory_space<smem>>
    %c70 = arith.constant 70 : index
    %70 = memref.load %arg1[%c70] : memref<98xf32, #tpu.memory_space<smem>>
    %c71 = arith.constant 71 : index
    %71 = memref.load %arg1[%c71] : memref<98xf32, #tpu.memory_space<smem>>
    %c72 = arith.constant 72 : index
    %72 = memref.load %arg1[%c72] : memref<98xf32, #tpu.memory_space<smem>>
    %c73 = arith.constant 73 : index
    %73 = memref.load %arg1[%c73] : memref<98xf32, #tpu.memory_space<smem>>
    %c74 = arith.constant 74 : index
    %74 = memref.load %arg1[%c74] : memref<98xf32, #tpu.memory_space<smem>>
    %c75 = arith.constant 75 : index
    %75 = memref.load %arg1[%c75] : memref<98xf32, #tpu.memory_space<smem>>
    %c76 = arith.constant 76 : index
    %76 = memref.load %arg1[%c76] : memref<98xf32, #tpu.memory_space<smem>>
    %c77 = arith.constant 77 : index
    %77 = memref.load %arg1[%c77] : memref<98xf32, #tpu.memory_space<smem>>
    %c78 = arith.constant 78 : index
    %78 = memref.load %arg1[%c78] : memref<98xf32, #tpu.memory_space<smem>>
    %c79 = arith.constant 79 : index
    %79 = memref.load %arg1[%c79] : memref<98xf32, #tpu.memory_space<smem>>
    %c80 = arith.constant 80 : index
    %80 = memref.load %arg1[%c80] : memref<98xf32, #tpu.memory_space<smem>>
    %c81 = arith.constant 81 : index
    %81 = memref.load %arg1[%c81] : memref<98xf32, #tpu.memory_space<smem>>
    %c82 = arith.constant 82 : index
    %82 = memref.load %arg1[%c82] : memref<98xf32, #tpu.memory_space<smem>>
    %c83 = arith.constant 83 : index
    %83 = memref.load %arg1[%c83] : memref<98xf32, #tpu.memory_space<smem>>
    %c84 = arith.constant 84 : index
    %84 = memref.load %arg1[%c84] : memref<98xf32, #tpu.memory_space<smem>>
    %c85 = arith.constant 85 : index
    %85 = memref.load %arg1[%c85] : memref<98xf32, #tpu.memory_space<smem>>
    %c86 = arith.constant 86 : index
    %86 = memref.load %arg1[%c86] : memref<98xf32, #tpu.memory_space<smem>>
    %c87 = arith.constant 87 : index
    %87 = memref.load %arg1[%c87] : memref<98xf32, #tpu.memory_space<smem>>
    %c88 = arith.constant 88 : index
    %88 = memref.load %arg1[%c88] : memref<98xf32, #tpu.memory_space<smem>>
    %c89 = arith.constant 89 : index
    %89 = memref.load %arg1[%c89] : memref<98xf32, #tpu.memory_space<smem>>
    %c90 = arith.constant 90 : index
    %90 = memref.load %arg1[%c90] : memref<98xf32, #tpu.memory_space<smem>>
    %c91 = arith.constant 91 : index
    %91 = memref.load %arg1[%c91] : memref<98xf32, #tpu.memory_space<smem>>
    %c92 = arith.constant 92 : index
    %92 = memref.load %arg1[%c92] : memref<98xf32, #tpu.memory_space<smem>>
    %c93 = arith.constant 93 : index
    %93 = memref.load %arg1[%c93] : memref<98xf32, #tpu.memory_space<smem>>
    %c94 = arith.constant 94 : index
    %94 = memref.load %arg1[%c94] : memref<98xf32, #tpu.memory_space<smem>>
    %c95 = arith.constant 95 : index
    %95 = memref.load %arg1[%c95] : memref<98xf32, #tpu.memory_space<smem>>
    %c96 = arith.constant 96 : index
    %96 = memref.load %arg1[%c96] : memref<98xf32, #tpu.memory_space<smem>>
    %c97 = arith.constant 97 : index
    %97 = memref.load %arg1[%c97] : memref<98xf32, #tpu.memory_space<smem>>
    %c0_0 = arith.constant 0 : index
    %98 = memref.load %arg2[%c0_0] : memref<1xf32, #tpu.memory_space<smem>>
    %c0_1 = arith.constant 0 : index
    %c0_2 = arith.constant 0 : index
    %c0_3 = arith.constant 0 : index
    %99 = vector.load %arg4[%c0_1, %c0_2, %c0_3] : memref<1x4x256xf32, #tpu.memory_space<vmem>>, vector<1x4x256xf32>
    %100 = vector.shape_cast %99 : vector<1x4x256xf32> to vector<4x256xf32>
    %cst = arith.constant dense<0.000000e+00> : vector<256xf32>
    %101 = vector.multi_reduction <add>, %100, %cst [0] : vector<4x256xf32> to vector<256xf32>
    %102 = vector.shape_cast %101 : vector<256xf32> to vector<1x256xf32>
    %cst_4 = arith.constant 2.500000e-01 : f32
    %103 = vector.broadcast %cst_4 : f32 to vector<1x256xf32>
    %104 = arith.mulf %102, %103 : vector<1x256xf32>
    %c0_5 = arith.constant 0 : index
    %c0_6 = arith.constant 0 : index
    %c0_7 = arith.constant 0 : index
    %105 = vector.load %arg6[%c0_5, %c0_6, %c0_7] : memref<2x1x256xf32, #tpu.memory_space<vmem>>, vector<1x1x256xf32>
    %106 = vector.shape_cast %105 : vector<1x1x256xf32> to vector<1x256xf32>
    %107 = vector.shape_cast %104 : vector<1x256xf32> to vector<1x1x256xf32>
    tpu.vector_store %arg6[%c0_5, %c0_6, %c0_7], %107 {strides = array<i32>} : memref<2x1x256xf32, #tpu.memory_space<vmem>>, vector<1x1x256xf32>,
    %cst_8 = arith.constant dense<0xFF800000> : vector<256xf32>
    %108 = vector.multi_reduction <maximumf>, %100, %cst_8 [0] : vector<4x256xf32> to vector<256xf32>
    %109 = vector.shape_cast %108 : vector<256xf32> to vector<1x256xf32>
    %c1_9 = arith.constant 1 : index
    %c0_10 = arith.constant 0 : index
    %c0_11 = arith.constant 0 : index
    %110 = vector.load %arg6[%c1_9, %c0_10, %c0_11] : memref<2x1x256xf32, #tpu.memory_space<vmem>>, vector<1x1x256xf32>
    %111 = vector.shape_cast %110 : vector<1x1x256xf32> to vector<1x256xf32>
    %112 = vector.shape_cast %109 : vector<1x256xf32> to vector<1x1x256xf32>
    tpu.vector_store %arg6[%c1_9, %c0_10, %c0_11], %112 {strides = array<i32>} : memref<2x1x256xf32, #tpu.memory_space<vmem>>, vector<1x1x256xf32>,
    %c0_12 = arith.constant 0 : index
    %c0_13 = arith.constant 0 : index
    %c0_14 = arith.constant 0 : index
    %113 = vector.load %arg6[%c0_12, %c0_13, %c0_14] : memref<2x1x256xf32, #tpu.memory_space<vmem>>, vector<1x1x256xf32>
    %114 = vector.shape_cast %113 : vector<1x1x256xf32> to vector<1x256xf32>
    %c1_15 = arith.constant 1 : index
    %c0_16 = arith.constant 0 : index
    %c0_17 = arith.constant 0 : index
    %115 = vector.load %arg6[%c1_15, %c0_16, %c0_17] : memref<2x1x256xf32, #tpu.memory_space<vmem>>, vector<1x1x256xf32>
    %116 = vector.shape_cast %115 : vector<1x1x256xf32> to vector<1x256xf32>
    %cst_18 = arith.constant 0.000000e+00 : f32
    %117 = vector.broadcast %cst_18 : f32 to vector<1x256xf32>
    %cst_19 = arith.constant 0.000000e+00 : f32
    %118 = vector.broadcast %cst_19 : f32 to vector<1x256xf32>
    %c51_i32 = arith.constant 51 : i32
    %119 = tpu.dynamic_rotate %114 by %c51_i32 dim 1 : vector<1x256xf32>, i32 -> vector<1x256xf32>
    %c51_i32_20 = arith.constant 51 : i32
    %120 = tpu.dynamic_rotate %116 by %c51_i32_20 dim 1 : vector<1x256xf32>, i32 -> vector<1x256xf32>
    %c0_21 = arith.constant 0 : index
    %c0_22 = arith.constant 0 : index
    %121 = vector.load %arg3[%c0_21, %c0_22] : memref<49x256xf32, #tpu.memory_space<vmem>>, vector<1x256xf32>
    %122 = vector.broadcast %0 : f32 to vector<1x256xf32>
    %123 = arith.mulf %122, %119 : vector<1x256xf32>
    %124 = vector.broadcast %49 : f32 to vector<1x256xf32>
    %125 = arith.mulf %124, %120 : vector<1x256xf32>
    %126 = arith.addf %123, %125 : vector<1x256xf32>
    %127 = arith.mulf %126, %121 : vector<1x256xf32>
    %128 = arith.addf %117, %127 : vector<1x256xf32>
    %c50_i32 = arith.constant 50 : i32
    %129 = tpu.dynamic_rotate %114 by %c50_i32 dim 1 : vector<1x256xf32>, i32 -> vector<1x256xf32>
    %c50_i32_23 = arith.constant 50 : i32
    %130 = tpu.dynamic_rotate %116 by %c50_i32_23 dim 1 : vector<1x256xf32>, i32 -> vector<1x256xf32>
    %c1_24 = arith.constant 1 : index
    %c0_25 = arith.constant 0 : index
    %131 = vector.load %arg3[%c1_24, %c0_25] : memref<49x256xf32, #tpu.memory_space<vmem>>, vector<1x256xf32>
    %132 = vector.broadcast %1 : f32 to vector<1x256xf32>
    %133 = arith.mulf %132, %129 : vector<1x256xf32>
    %134 = vector.broadcast %50 : f32 to vector<1x256xf32>
    %135 = arith.mulf %134, %130 : vector<1x256xf32>
    %136 = arith.addf %133, %135 : vector<1x256xf32>
    %137 = arith.mulf %136, %131 : vector<1x256xf32>
    %138 = arith.addf %118, %137 : vector<1x256xf32>
    %c49_i32 = arith.constant 49 : i32
    %139 = tpu.dynamic_rotate %114 by %c49_i32 dim 1 : vector<1x256xf32>, i32 -> vector<1x256xf32>
    %c49_i32_26 = arith.constant 49 : i32
    %140 = tpu.dynamic_rotate %116 by %c49_i32_26 dim 1 : vector<1x256xf32>, i32 -> vector<1x256xf32>
    %c2_27 = arith.constant 2 : index
    %c0_28 = arith.constant 0 : index
    %141 = vector.load %arg3[%c2_27, %c0_28] : memref<49x256xf32, #tpu.memory_space<vmem>>, vector<1x256xf32>
    %142 = vector.broadcast %2 : f32 to vector<1x256xf32>
    %143 = arith.mulf %142, %139 : vector<1x256xf32>
    %144 = vector.broadcast %51 : f32 to vector<1x256xf32>
    %145 = arith.mulf %144, %140 : vector<1x256xf32>
    %146 = arith.addf %143, %145 : vector<1x256xf32>
    %147 = arith.mulf %146, %141 : vector<1x256xf32>
    %148 = arith.addf %128, %147 : vector<1x256xf32>
    %c48_i32 = arith.constant 48 : i32
    %149 = tpu.dynamic_rotate %114 by %c48_i32 dim 1 : vector<1x256xf32>, i32 -> vector<1x256xf32>
    %c48_i32_29 = arith.constant 48 : i32
    %150 = tpu.dynamic_rotate %116 by %c48_i32_29 dim 1 : vector<1x256xf32>, i32 -> vector<1x256xf32>
    %c3_30 = arith.constant 3 : index
    %c0_31 = arith.constant 0 : index
    %151 = vector.load %arg3[%c3_30, %c0_31] : memref<49x256xf32, #tpu.memory_space<vmem>>, vector<1x256xf32>
    %152 = vector.broadcast %3 : f32 to vector<1x256xf32>
    %153 = arith.mulf %152, %149 : vector<1x256xf32>
    %154 = vector.broadcast %52 : f32 to vector<1x256xf32>
    %155 = arith.mulf %154, %150 : vector<1x256xf32>
    %156 = arith.addf %153, %155 : vector<1x256xf32>
    %157 = arith.mulf %156, %151 : vector<1x256xf32>
    %158 = arith.addf %138, %157 : vector<1x256xf32>
    %c47_i32 = arith.constant 47 : i32
    %159 = tpu.dynamic_rotate %114 by %c47_i32 dim 1 : vector<1x256xf32>, i32 -> vector<1x256xf32>
    %c47_i32_32 = arith.constant 47 : i32
    %160 = tpu.dynamic_rotate %116 by %c47_i32_32 dim 1 : vector<1x256xf32>, i32 -> vector<1x256xf32>
    %c4_33 = arith.constant 4 : index
    %c0_34 = arith.constant 0 : index
    %161 = vector.load %arg3[%c4_33, %c0_34] : memref<49x256xf32, #tpu.memory_space<vmem>>, vector<1x256xf32>
    %162 = vector.broadcast %4 : f32 to vector<1x256xf32>
    %163 = arith.mulf %162, %159 : vector<1x256xf32>
    %164 = vector.broadcast %53 : f32 to vector<1x256xf32>
    %165 = arith.mulf %164, %160 : vector<1x256xf32>
    %166 = arith.addf %163, %165 : vector<1x256xf32>
    %167 = arith.mulf %166, %161 : vector<1x256xf32>
    %168 = arith.addf %148, %167 : vector<1x256xf32>
    %c46_i32 = arith.constant 46 : i32
    %169 = tpu.dynamic_rotate %114 by %c46_i32 dim 1 : vector<1x256xf32>, i32 -> vector<1x256xf32>
    %c46_i32_35 = arith.constant 46 : i32
    %170 = tpu.dynamic_rotate %116 by %c46_i32_35 dim 1 : vector<1x256xf32>, i32 -> vector<1x256xf32>
    %c5_36 = arith.constant 5 : index
    %c0_37 = arith.constant 0 : index
    %171 = vector.load %arg3[%c5_36, %c0_37] : memref<49x256xf32, #tpu.memory_space<vmem>>, vector<1x256xf32>
    %172 = vector.broadcast %5 : f32 to vector<1x256xf32>
    %173 = arith.mulf %172, %169 : vector<1x256xf32>
    %174 = vector.broadcast %54 : f32 to vector<1x256xf32>
    %175 = arith.mulf %174, %170 : vector<1x256xf32>
    %176 = arith.addf %173, %175 : vector<1x256xf32>
    %177 = arith.mulf %176, %171 : vector<1x256xf32>
    %178 = arith.addf %158, %177 : vector<1x256xf32>
    %c45_i32 = arith.constant 45 : i32
    %179 = tpu.dynamic_rotate %114 by %c45_i32 dim 1 : vector<1x256xf32>, i32 -> vector<1x256xf32>
    %c45_i32_38 = arith.constant 45 : i32
    %180 = tpu.dynamic_rotate %116 by %c45_i32_38 dim 1 : vector<1x256xf32>, i32 -> vector<1x256xf32>
    %c6_39 = arith.constant 6 : index
    %c0_40 = arith.constant 0 : index
    %181 = vector.load %arg3[%c6_39, %c0_40] : memref<49x256xf32, #tpu.memory_space<vmem>>, vector<1x256xf32>
    %182 = vector.broadcast %6 : f32 to vector<1x256xf32>
    %183 = arith.mulf %182, %179 : vector<1x256xf32>
    %184 = vector.broadcast %55 : f32 to vector<1x256xf32>
    %185 = arith.mulf %184, %180 : vector<1x256xf32>
    %186 = arith.addf %183, %185 : vector<1x256xf32>
    %187 = arith.mulf %186, %181 : vector<1x256xf32>
    %188 = arith.addf %168, %187 : vector<1x256xf32>
    %c35_i32 = arith.constant 35 : i32
    %189 = tpu.dynamic_rotate %114 by %c35_i32 dim 1 : vector<1x256xf32>, i32 -> vector<1x256xf32>
    %c35_i32_41 = arith.constant 35 : i32
    %190 = tpu.dynamic_rotate %116 by %c35_i32_41 dim 1 : vector<1x256xf32>, i32 -> vector<1x256xf32>
    %c7_42 = arith.constant 7 : index
    %c0_43 = arith.constant 0 : index
    %191 = vector.load %arg3[%c7_42, %c0_43] : memref<49x256xf32, #tpu.memory_space<vmem>>, vector<1x256xf32>
    %192 = vector.broadcast %7 : f32 to vector<1x256xf32>
    %193 = arith.mulf %192, %189 : vector<1x256xf32>
    %194 = vector.broadcast %56 : f32 to vector<1x256xf32>
    %195 = arith.mulf %194, %190 : vector<1x256xf32>
    %196 = arith.addf %193, %195 : vector<1x256xf32>
    %197 = arith.mulf %196, %191 : vector<1x256xf32>
    %198 = arith.addf %178, %197 : vector<1x256xf32>
    %c34_i32 = arith.constant 34 : i32
    %199 = tpu.dynamic_rotate %114 by %c34_i32 dim 1 : vector<1x256xf32>, i32 -> vector<1x256xf32>
    %c34_i32_44 = arith.constant 34 : i32
    %200 = tpu.dynamic_rotate %116 by %c34_i32_44 dim 1 : vector<1x256xf32>, i32 -> vector<1x256xf32>
    %c8_45 = arith.constant 8 : index
    %c0_46 = arith.constant 0 : index
    %201 = vector.load %arg3[%c8_45, %c0_46] : memref<49x256xf32, #tpu.memory_space<vmem>>, vector<1x256xf32>
    %202 = vector.broadcast %8 : f32 to vector<1x256xf32>
    %203 = arith.mulf %202, %199 : vector<1x256xf32>
    %204 = vector.broadcast %57 : f32 to vector<1x256xf32>
    %205 = arith.mulf %204, %200 : vector<1x256xf32>
    %206 = arith.addf %203, %205 : vector<1x256xf32>
    %207 = arith.mulf %206, %201 : vector<1x256xf32>
    %208 = arith.addf %188, %207 : vector<1x256xf32>
    %c33_i32 = arith.constant 33 : i32
    %209 = tpu.dynamic_rotate %114 by %c33_i32 dim 1 : vector<1x256xf32>, i32 -> vector<1x256xf32>
    %c33_i32_47 = arith.constant 33 : i32
    %210 = tpu.dynamic_rotate %116 by %c33_i32_47 dim 1 : vector<1x256xf32>, i32 -> vector<1x256xf32>
    %c9_48 = arith.constant 9 : index
    %c0_49 = arith.constant 0 : index
    %211 = vector.load %arg3[%c9_48, %c0_49] : memref<49x256xf32, #tpu.memory_space<vmem>>, vector<1x256xf32>
    %212 = vector.broadcast %9 : f32 to vector<1x256xf32>
    %213 = arith.mulf %212, %209 : vector<1x256xf32>
    %214 = vector.broadcast %58 : f32 to vector<1x256xf32>
    %215 = arith.mulf %214, %210 : vector<1x256xf32>
    %216 = arith.addf %213, %215 : vector<1x256xf32>
    %217 = arith.mulf %216, %211 : vector<1x256xf32>
    %218 = arith.addf %198, %217 : vector<1x256xf32>
    %c32_i32 = arith.constant 32 : i32
    %219 = tpu.dynamic_rotate %114 by %c32_i32 dim 1 : vector<1x256xf32>, i32 -> vector<1x256xf32>
    %c32_i32_50 = arith.constant 32 : i32
    %220 = tpu.dynamic_rotate %116 by %c32_i32_50 dim 1 : vector<1x256xf32>, i32 -> vector<1x256xf32>
    %c10_51 = arith.constant 10 : index
    %c0_52 = arith.constant 0 : index
    %221 = vector.load %arg3[%c10_51, %c0_52] : memref<49x256xf32, #tpu.memory_space<vmem>>, vector<1x256xf32>
    %222 = vector.broadcast %10 : f32 to vector<1x256xf32>
    %223 = arith.mulf %222, %219 : vector<1x256xf32>
    %224 = vector.broadcast %59 : f32 to vector<1x256xf32>
    %225 = arith.mulf %224, %220 : vector<1x256xf32>
    %226 = arith.addf %223, %225 : vector<1x256xf32>
    %227 = arith.mulf %226, %221 : vector<1x256xf32>
    %228 = arith.addf %208, %227 : vector<1x256xf32>
    %c31_i32 = arith.constant 31 : i32
    %229 = tpu.dynamic_rotate %114 by %c31_i32 dim 1 : vector<1x256xf32>, i32 -> vector<1x256xf32>
    %c31_i32_53 = arith.constant 31 : i32
    %230 = tpu.dynamic_rotate %116 by %c31_i32_53 dim 1 : vector<1x256xf32>, i32 -> vector<1x256xf32>
    %c11_54 = arith.constant 11 : index
    %c0_55 = arith.constant 0 : index
    %231 = vector.load %arg3[%c11_54, %c0_55] : memref<49x256xf32, #tpu.memory_space<vmem>>, vector<1x256xf32>
    %232 = vector.broadcast %11 : f32 to vector<1x256xf32>
    %233 = arith.mulf %232, %229 : vector<1x256xf32>
    %234 = vector.broadcast %60 : f32 to vector<1x256xf32>
    %235 = arith.mulf %234, %230 : vector<1x256xf32>
    %236 = arith.addf %233, %235 : vector<1x256xf32>
    %237 = arith.mulf %236, %231 : vector<1x256xf32>
    %238 = arith.addf %218, %237 : vector<1x256xf32>
    %c30_i32 = arith.constant 30 : i32
    %239 = tpu.dynamic_rotate %114 by %c30_i32 dim 1 : vector<1x256xf32>, i32 -> vector<1x256xf32>
    %c30_i32_56 = arith.constant 30 : i32
    %240 = tpu.dynamic_rotate %116 by %c30_i32_56 dim 1 : vector<1x256xf32>, i32 -> vector<1x256xf32>
    %c12_57 = arith.constant 12 : index
    %c0_58 = arith.constant 0 : index
    %241 = vector.load %arg3[%c12_57, %c0_58] : memref<49x256xf32, #tpu.memory_space<vmem>>, vector<1x256xf32>
    %242 = vector.broadcast %12 : f32 to vector<1x256xf32>
    %243 = arith.mulf %242, %239 : vector<1x256xf32>
    %244 = vector.broadcast %61 : f32 to vector<1x256xf32>
    %245 = arith.mulf %244, %240 : vector<1x256xf32>
    %246 = arith.addf %243, %245 : vector<1x256xf32>
    %247 = arith.mulf %246, %241 : vector<1x256xf32>
    %248 = arith.addf %228, %247 : vector<1x256xf32>
    %c29_i32 = arith.constant 29 : i32
    %249 = tpu.dynamic_rotate %114 by %c29_i32 dim 1 : vector<1x256xf32>, i32 -> vector<1x256xf32>
    %c29_i32_59 = arith.constant 29 : i32
    %250 = tpu.dynamic_rotate %116 by %c29_i32_59 dim 1 : vector<1x256xf32>, i32 -> vector<1x256xf32>
    %c13_60 = arith.constant 13 : index
    %c0_61 = arith.constant 0 : index
    %251 = vector.load %arg3[%c13_60, %c0_61] : memref<49x256xf32, #tpu.memory_space<vmem>>, vector<1x256xf32>
    %252 = vector.broadcast %13 : f32 to vector<1x256xf32>
    %253 = arith.mulf %252, %249 : vector<1x256xf32>
    %254 = vector.broadcast %62 : f32 to vector<1x256xf32>
    %255 = arith.mulf %254, %250 : vector<1x256xf32>
    %256 = arith.addf %253, %255 : vector<1x256xf32>
    %257 = arith.mulf %256, %251 : vector<1x256xf32>
    %258 = arith.addf %238, %257 : vector<1x256xf32>
    %c19_i32 = arith.constant 19 : i32
    %259 = tpu.dynamic_rotate %114 by %c19_i32 dim 1 : vector<1x256xf32>, i32 -> vector<1x256xf32>
    %c19_i32_62 = arith.constant 19 : i32
    %260 = tpu.dynamic_rotate %116 by %c19_i32_62 dim 1 : vector<1x256xf32>, i32 -> vector<1x256xf32>
    %c14_63 = arith.constant 14 : index
    %c0_64 = arith.constant 0 : index
    %261 = vector.load %arg3[%c14_63, %c0_64] : memref<49x256xf32, #tpu.memory_space<vmem>>, vector<1x256xf32>
    %262 = vector.broadcast %14 : f32 to vector<1x256xf32>
    %263 = arith.mulf %262, %259 : vector<1x256xf32>
    %264 = vector.broadcast %63 : f32 to vector<1x256xf32>
    %265 = arith.mulf %264, %260 : vector<1x256xf32>
    %266 = arith.addf %263, %265 : vector<1x256xf32>
    %267 = arith.mulf %266, %261 : vector<1x256xf32>
    %268 = arith.addf %248, %267 : vector<1x256xf32>
    %c18_i32 = arith.constant 18 : i32
    %269 = tpu.dynamic_rotate %114 by %c18_i32 dim 1 : vector<1x256xf32>, i32 -> vector<1x256xf32>
    %c18_i32_65 = arith.constant 18 : i32
    %270 = tpu.dynamic_rotate %116 by %c18_i32_65 dim 1 : vector<1x256xf32>, i32 -> vector<1x256xf32>
    %c15_66 = arith.constant 15 : index
    %c0_67 = arith.constant 0 : index
    %271 = vector.load %arg3[%c15_66, %c0_67] : memref<49x256xf32, #tpu.memory_space<vmem>>, vector<1x256xf32>
    %272 = vector.broadcast %15 : f32 to vector<1x256xf32>
    %273 = arith.mulf %272, %269 : vector<1x256xf32>
    %274 = vector.broadcast %64 : f32 to vector<1x256xf32>
    %275 = arith.mulf %274, %270 : vector<1x256xf32>
    %276 = arith.addf %273, %275 : vector<1x256xf32>
    %277 = arith.mulf %276, %271 : vector<1x256xf32>
    %278 = arith.addf %258, %277 : vector<1x256xf32>
    %c17_i32 = arith.constant 17 : i32
    %279 = tpu.dynamic_rotate %114 by %c17_i32 dim 1 : vector<1x256xf32>, i32 -> vector<1x256xf32>
    %c17_i32_68 = arith.constant 17 : i32
    %280 = tpu.dynamic_rotate %116 by %c17_i32_68 dim 1 : vector<1x256xf32>, i32 -> vector<1x256xf32>
    %c16_69 = arith.constant 16 : index
    %c0_70 = arith.constant 0 : index
    %281 = vector.load %arg3[%c16_69, %c0_70] : memref<49x256xf32, #tpu.memory_space<vmem>>, vector<1x256xf32>
    %282 = vector.broadcast %16 : f32 to vector<1x256xf32>
    %283 = arith.mulf %282, %279 : vector<1x256xf32>
    %284 = vector.broadcast %65 : f32 to vector<1x256xf32>
    %285 = arith.mulf %284, %280 : vector<1x256xf32>
    %286 = arith.addf %283, %285 : vector<1x256xf32>
    %287 = arith.mulf %286, %281 : vector<1x256xf32>
    %288 = arith.addf %268, %287 : vector<1x256xf32>
    %c16_i32 = arith.constant 16 : i32
    %289 = tpu.dynamic_rotate %114 by %c16_i32 dim 1 : vector<1x256xf32>, i32 -> vector<1x256xf32>
    %c16_i32_71 = arith.constant 16 : i32
    %290 = tpu.dynamic_rotate %116 by %c16_i32_71 dim 1 : vector<1x256xf32>, i32 -> vector<1x256xf32>
    %c17_72 = arith.constant 17 : index
    %c0_73 = arith.constant 0 : index
    %291 = vector.load %arg3[%c17_72, %c0_73] : memref<49x256xf32, #tpu.memory_space<vmem>>, vector<1x256xf32>
    %292 = vector.broadcast %17 : f32 to vector<1x256xf32>
    %293 = arith.mulf %292, %289 : vector<1x256xf32>
    %294 = vector.broadcast %66 : f32 to vector<1x256xf32>
    %295 = arith.mulf %294, %290 : vector<1x256xf32>
    %296 = arith.addf %293, %295 : vector<1x256xf32>
    %297 = arith.mulf %296, %291 : vector<1x256xf32>
    %298 = arith.addf %278, %297 : vector<1x256xf32>
    %c15_i32 = arith.constant 15 : i32
    %299 = tpu.dynamic_rotate %114 by %c15_i32 dim 1 : vector<1x256xf32>, i32 -> vector<1x256xf32>
    %c15_i32_74 = arith.constant 15 : i32
    %300 = tpu.dynamic_rotate %116 by %c15_i32_74 dim 1 : vector<1x256xf32>, i32 -> vector<1x256xf32>
    %c18_75 = arith.constant 18 : index
    %c0_76 = arith.constant 0 : index
    %301 = vector.load %arg3[%c18_75, %c0_76] : memref<49x256xf32, #tpu.memory_space<vmem>>, vector<1x256xf32>
    %302 = vector.broadcast %18 : f32 to vector<1x256xf32>
    %303 = arith.mulf %302, %299 : vector<1x256xf32>
    %304 = vector.broadcast %67 : f32 to vector<1x256xf32>
    %305 = arith.mulf %304, %300 : vector<1x256xf32>
    %306 = arith.addf %303, %305 : vector<1x256xf32>
    %307 = arith.mulf %306, %301 : vector<1x256xf32>
    %308 = arith.addf %288, %307 : vector<1x256xf32>
    %c14_i32 = arith.constant 14 : i32
    %309 = tpu.dynamic_rotate %114 by %c14_i32 dim 1 : vector<1x256xf32>, i32 -> vector<1x256xf32>
    %c14_i32_77 = arith.constant 14 : i32
    %310 = tpu.dynamic_rotate %116 by %c14_i32_77 dim 1 : vector<1x256xf32>, i32 -> vector<1x256xf32>
    %c19_78 = arith.constant 19 : index
    %c0_79 = arith.constant 0 : index
    %311 = vector.load %arg3[%c19_78, %c0_79] : memref<49x256xf32, #tpu.memory_space<vmem>>, vector<1x256xf32>
    %312 = vector.broadcast %19 : f32 to vector<1x256xf32>
    %313 = arith.mulf %312, %309 : vector<1x256xf32>
    %314 = vector.broadcast %68 : f32 to vector<1x256xf32>
    %315 = arith.mulf %314, %310 : vector<1x256xf32>
    %316 = arith.addf %313, %315 : vector<1x256xf32>
    %317 = arith.mulf %316, %311 : vector<1x256xf32>
    %318 = arith.addf %298, %317 : vector<1x256xf32>
    %c13_i32 = arith.constant 13 : i32
    %319 = tpu.dynamic_rotate %114 by %c13_i32 dim 1 : vector<1x256xf32>, i32 -> vector<1x256xf32>
    %c13_i32_80 = arith.constant 13 : i32
    %320 = tpu.dynamic_rotate %116 by %c13_i32_80 dim 1 : vector<1x256xf32>, i32 -> vector<1x256xf32>
    %c20_81 = arith.constant 20 : index
    %c0_82 = arith.constant 0 : index
    %321 = vector.load %arg3[%c20_81, %c0_82] : memref<49x256xf32, #tpu.memory_space<vmem>>, vector<1x256xf32>
    %322 = vector.broadcast %20 : f32 to vector<1x256xf32>
    %323 = arith.mulf %322, %319 : vector<1x256xf32>
    %324 = vector.broadcast %69 : f32 to vector<1x256xf32>
    %325 = arith.mulf %324, %320 : vector<1x256xf32>
    %326 = arith.addf %323, %325 : vector<1x256xf32>
    %327 = arith.mulf %326, %321 : vector<1x256xf32>
    %328 = arith.addf %308, %327 : vector<1x256xf32>
    %c3_i32 = arith.constant 3 : i32
    %329 = tpu.dynamic_rotate %114 by %c3_i32 dim 1 : vector<1x256xf32>, i32 -> vector<1x256xf32>
    %c3_i32_83 = arith.constant 3 : i32
    %330 = tpu.dynamic_rotate %116 by %c3_i32_83 dim 1 : vector<1x256xf32>, i32 -> vector<1x256xf32>
    %c21_84 = arith.constant 21 : index
    %c0_85 = arith.constant 0 : index
    %331 = vector.load %arg3[%c21_84, %c0_85] : memref<49x256xf32, #tpu.memory_space<vmem>>, vector<1x256xf32>
    %332 = vector.broadcast %21 : f32 to vector<1x256xf32>
    %333 = arith.mulf %332, %329 : vector<1x256xf32>
    %334 = vector.broadcast %70 : f32 to vector<1x256xf32>
    %335 = arith.mulf %334, %330 : vector<1x256xf32>
    %336 = arith.addf %333, %335 : vector<1x256xf32>
    %337 = arith.mulf %336, %331 : vector<1x256xf32>
    %338 = arith.addf %318, %337 : vector<1x256xf32>
    %c2_i32 = arith.constant 2 : i32
    %339 = tpu.dynamic_rotate %114 by %c2_i32 dim 1 : vector<1x256xf32>, i32 -> vector<1x256xf32>
    %c2_i32_86 = arith.constant 2 : i32
    %340 = tpu.dynamic_rotate %116 by %c2_i32_86 dim 1 : vector<1x256xf32>, i32 -> vector<1x256xf32>
    %c22_87 = arith.constant 22 : index
    %c0_88 = arith.constant 0 : index
    %341 = vector.load %arg3[%c22_87, %c0_88] : memref<49x256xf32, #tpu.memory_space<vmem>>, vector<1x256xf32>
    %342 = vector.broadcast %22 : f32 to vector<1x256xf32>
    %343 = arith.mulf %342, %339 : vector<1x256xf32>
    %344 = vector.broadcast %71 : f32 to vector<1x256xf32>
    %345 = arith.mulf %344, %340 : vector<1x256xf32>
    %346 = arith.addf %343, %345 : vector<1x256xf32>
    %347 = arith.mulf %346, %341 : vector<1x256xf32>
    %348 = arith.addf %328, %347 : vector<1x256xf32>
    %c1_i32 = arith.constant 1 : i32
    %349 = tpu.dynamic_rotate %114 by %c1_i32 dim 1 : vector<1x256xf32>, i32 -> vector<1x256xf32>
    %c1_i32_89 = arith.constant 1 : i32
    %350 = tpu.dynamic_rotate %116 by %c1_i32_89 dim 1 : vector<1x256xf32>, i32 -> vector<1x256xf32>
    %c23_90 = arith.constant 23 : index
    %c0_91 = arith.constant 0 : index
    %351 = vector.load %arg3[%c23_90, %c0_91] : memref<49x256xf32, #tpu.memory_space<vmem>>, vector<1x256xf32>
    %352 = vector.broadcast %23 : f32 to vector<1x256xf32>
    %353 = arith.mulf %352, %349 : vector<1x256xf32>
    %354 = vector.broadcast %72 : f32 to vector<1x256xf32>
    %355 = arith.mulf %354, %350 : vector<1x256xf32>
    %356 = arith.addf %353, %355 : vector<1x256xf32>
    %357 = arith.mulf %356, %351 : vector<1x256xf32>
    %358 = arith.addf %338, %357 : vector<1x256xf32>
    %c24_92 = arith.constant 24 : index
    %c0_93 = arith.constant 0 : index
    %359 = vector.load %arg3[%c24_92, %c0_93] : memref<49x256xf32, #tpu.memory_space<vmem>>, vector<1x256xf32>
    %360 = vector.broadcast %24 : f32 to vector<1x256xf32>
    %361 = arith.mulf %360, %114 : vector<1x256xf32>
    %362 = vector.broadcast %73 : f32 to vector<1x256xf32>
    %363 = arith.mulf %362, %116 : vector<1x256xf32>
    %364 = arith.addf %361, %363 : vector<1x256xf32>
    %365 = arith.mulf %364, %359 : vector<1x256xf32>
    %366 = arith.addf %348, %365 : vector<1x256xf32>
    %c255_i32 = arith.constant 255 : i32
    %367 = tpu.dynamic_rotate %114 by %c255_i32 dim 1 : vector<1x256xf32>, i32 -> vector<1x256xf32>
    %c255_i32_94 = arith.constant 255 : i32
    %368 = tpu.dynamic_rotate %116 by %c255_i32_94 dim 1 : vector<1x256xf32>, i32 -> vector<1x256xf32>
    %c25_95 = arith.constant 25 : index
    %c0_96 = arith.constant 0 : index
    %369 = vector.load %arg3[%c25_95, %c0_96] : memref<49x256xf32, #tpu.memory_space<vmem>>, vector<1x256xf32>
    %370 = vector.broadcast %25 : f32 to vector<1x256xf32>
    %371 = arith.mulf %370, %367 : vector<1x256xf32>
    %372 = vector.broadcast %74 : f32 to vector<1x256xf32>
    %373 = arith.mulf %372, %368 : vector<1x256xf32>
    %374 = arith.addf %371, %373 : vector<1x256xf32>
    %375 = arith.mulf %374, %369 : vector<1x256xf32>
    %376 = arith.addf %358, %375 : vector<1x256xf32>
    %c254_i32 = arith.constant 254 : i32
    %377 = tpu.dynamic_rotate %114 by %c254_i32 dim 1 : vector<1x256xf32>, i32 -> vector<1x256xf32>
    %c254_i32_97 = arith.constant 254 : i32
    %378 = tpu.dynamic_rotate %116 by %c254_i32_97 dim 1 : vector<1x256xf32>, i32 -> vector<1x256xf32>
    %c26_98 = arith.constant 26 : index
    %c0_99 = arith.constant 0 : index
    %379 = vector.load %arg3[%c26_98, %c0_99] : memref<49x256xf32, #tpu.memory_space<vmem>>, vector<1x256xf32>
    %380 = vector.broadcast %26 : f32 to vector<1x256xf32>
    %381 = arith.mulf %380, %377 : vector<1x256xf32>
    %382 = vector.broadcast %75 : f32 to vector<1x256xf32>
    %383 = arith.mulf %382, %378 : vector<1x256xf32>
    %384 = arith.addf %381, %383 : vector<1x256xf32>
    %385 = arith.mulf %384, %379 : vector<1x256xf32>
    %386 = arith.addf %366, %385 : vector<1x256xf32>
    %c253_i32 = arith.constant 253 : i32
    %387 = tpu.dynamic_rotate %114 by %c253_i32 dim 1 : vector<1x256xf32>, i32 -> vector<1x256xf32>
    %c253_i32_100 = arith.constant 253 : i32
    %388 = tpu.dynamic_rotate %116 by %c253_i32_100 dim 1 : vector<1x256xf32>, i32 -> vector<1x256xf32>
    %c27_101 = arith.constant 27 : index
    %c0_102 = arith.constant 0 : index
    %389 = vector.load %arg3[%c27_101, %c0_102] : memref<49x256xf32, #tpu.memory_space<vmem>>, vector<1x256xf32>
    %390 = vector.broadcast %27 : f32 to vector<1x256xf32>
    %391 = arith.mulf %390, %387 : vector<1x256xf32>
    %392 = vector.broadcast %76 : f32 to vector<1x256xf32>
    %393 = arith.mulf %392, %388 : vector<1x256xf32>
    %394 = arith.addf %391, %393 : vector<1x256xf32>
    %395 = arith.mulf %394, %389 : vector<1x256xf32>
    %396 = arith.addf %376, %395 : vector<1x256xf32>
    %c243_i32 = arith.constant 243 : i32
    %397 = tpu.dynamic_rotate %114 by %c243_i32 dim 1 : vector<1x256xf32>, i32 -> vector<1x256xf32>
    %c243_i32_103 = arith.constant 243 : i32
    %398 = tpu.dynamic_rotate %116 by %c243_i32_103 dim 1 : vector<1x256xf32>, i32 -> vector<1x256xf32>
    %c28_104 = arith.constant 28 : index
    %c0_105 = arith.constant 0 : index
    %399 = vector.load %arg3[%c28_104, %c0_105] : memref<49x256xf32, #tpu.memory_space<vmem>>, vector<1x256xf32>
    %400 = vector.broadcast %28 : f32 to vector<1x256xf32>
    %401 = arith.mulf %400, %397 : vector<1x256xf32>
    %402 = vector.broadcast %77 : f32 to vector<1x256xf32>
    %403 = arith.mulf %402, %398 : vector<1x256xf32>
    %404 = arith.addf %401, %403 : vector<1x256xf32>
    %405 = arith.mulf %404, %399 : vector<1x256xf32>
    %406 = arith.addf %386, %405 : vector<1x256xf32>
    %c242_i32 = arith.constant 242 : i32
    %407 = tpu.dynamic_rotate %114 by %c242_i32 dim 1 : vector<1x256xf32>, i32 -> vector<1x256xf32>
    %c242_i32_106 = arith.constant 242 : i32
    %408 = tpu.dynamic_rotate %116 by %c242_i32_106 dim 1 : vector<1x256xf32>, i32 -> vector<1x256xf32>
    %c29_107 = arith.constant 29 : index
    %c0_108 = arith.constant 0 : index
    %409 = vector.load %arg3[%c29_107, %c0_108] : memref<49x256xf32, #tpu.memory_space<vmem>>, vector<1x256xf32>
    %410 = vector.broadcast %29 : f32 to vector<1x256xf32>
    %411 = arith.mulf %410, %407 : vector<1x256xf32>
    %412 = vector.broadcast %78 : f32 to vector<1x256xf32>
    %413 = arith.mulf %412, %408 : vector<1x256xf32>
    %414 = arith.addf %411, %413 : vector<1x256xf32>
    %415 = arith.mulf %414, %409 : vector<1x256xf32>
    %416 = arith.addf %396, %415 : vector<1x256xf32>
    %c241_i32 = arith.constant 241 : i32
    %417 = tpu.dynamic_rotate %114 by %c241_i32 dim 1 : vector<1x256xf32>, i32 -> vector<1x256xf32>
    %c241_i32_109 = arith.constant 241 : i32
    %418 = tpu.dynamic_rotate %116 by %c241_i32_109 dim 1 : vector<1x256xf32>, i32 -> vector<1x256xf32>
    %c30_110 = arith.constant 30 : index
    %c0_111 = arith.constant 0 : index
    %419 = vector.load %arg3[%c30_110, %c0_111] : memref<49x256xf32, #tpu.memory_space<vmem>>, vector<1x256xf32>
    %420 = vector.broadcast %30 : f32 to vector<1x256xf32>
    %421 = arith.mulf %420, %417 : vector<1x256xf32>
    %422 = vector.broadcast %79 : f32 to vector<1x256xf32>
    %423 = arith.mulf %422, %418 : vector<1x256xf32>
    %424 = arith.addf %421, %423 : vector<1x256xf32>
    %425 = arith.mulf %424, %419 : vector<1x256xf32>
    %426 = arith.addf %406, %425 : vector<1x256xf32>
    %c240_i32 = arith.constant 240 : i32
    %427 = tpu.dynamic_rotate %114 by %c240_i32 dim 1 : vector<1x256xf32>, i32 -> vector<1x256xf32>
    %c240_i32_112 = arith.constant 240 : i32
    %428 = tpu.dynamic_rotate %116 by %c240_i32_112 dim 1 : vector<1x256xf32>, i32 -> vector<1x256xf32>
    %c31_113 = arith.constant 31 : index
    %c0_114 = arith.constant 0 : index
    %429 = vector.load %arg3[%c31_113, %c0_114] : memref<49x256xf32, #tpu.memory_space<vmem>>, vector<1x256xf32>
    %430 = vector.broadcast %31 : f32 to vector<1x256xf32>
    %431 = arith.mulf %430, %427 : vector<1x256xf32>
    %432 = vector.broadcast %80 : f32 to vector<1x256xf32>
    %433 = arith.mulf %432, %428 : vector<1x256xf32>
    %434 = arith.addf %431, %433 : vector<1x256xf32>
    %435 = arith.mulf %434, %429 : vector<1x256xf32>
    %436 = arith.addf %416, %435 : vector<1x256xf32>
    %c239_i32 = arith.constant 239 : i32
    %437 = tpu.dynamic_rotate %114 by %c239_i32 dim 1 : vector<1x256xf32>, i32 -> vector<1x256xf32>
    %c239_i32_115 = arith.constant 239 : i32
    %438 = tpu.dynamic_rotate %116 by %c239_i32_115 dim 1 : vector<1x256xf32>, i32 -> vector<1x256xf32>
    %c32_116 = arith.constant 32 : index
    %c0_117 = arith.constant 0 : index
    %439 = vector.load %arg3[%c32_116, %c0_117] : memref<49x256xf32, #tpu.memory_space<vmem>>, vector<1x256xf32>
    %440 = vector.broadcast %32 : f32 to vector<1x256xf32>
    %441 = arith.mulf %440, %437 : vector<1x256xf32>
    %442 = vector.broadcast %81 : f32 to vector<1x256xf32>
    %443 = arith.mulf %442, %438 : vector<1x256xf32>
    %444 = arith.addf %441, %443 : vector<1x256xf32>
    %445 = arith.mulf %444, %439 : vector<1x256xf32>
    %446 = arith.addf %426, %445 : vector<1x256xf32>
    %c238_i32 = arith.constant 238 : i32
    %447 = tpu.dynamic_rotate %114 by %c238_i32 dim 1 : vector<1x256xf32>, i32 -> vector<1x256xf32>
    %c238_i32_118 = arith.constant 238 : i32
    %448 = tpu.dynamic_rotate %116 by %c238_i32_118 dim 1 : vector<1x256xf32>, i32 -> vector<1x256xf32>
    %c33_119 = arith.constant 33 : index
    %c0_120 = arith.constant 0 : index
    %449 = vector.load %arg3[%c33_119, %c0_120] : memref<49x256xf32, #tpu.memory_space<vmem>>, vector<1x256xf32>
    %450 = vector.broadcast %33 : f32 to vector<1x256xf32>
    %451 = arith.mulf %450, %447 : vector<1x256xf32>
    %452 = vector.broadcast %82 : f32 to vector<1x256xf32>
    %453 = arith.mulf %452, %448 : vector<1x256xf32>
    %454 = arith.addf %451, %453 : vector<1x256xf32>
    %455 = arith.mulf %454, %449 : vector<1x256xf32>
    %456 = arith.addf %436, %455 : vector<1x256xf32>
    %c237_i32 = arith.constant 237 : i32
    %457 = tpu.dynamic_rotate %114 by %c237_i32 dim 1 : vector<1x256xf32>, i32 -> vector<1x256xf32>
    %c237_i32_121 = arith.constant 237 : i32
    %458 = tpu.dynamic_rotate %116 by %c237_i32_121 dim 1 : vector<1x256xf32>, i32 -> vector<1x256xf32>
    %c34_122 = arith.constant 34 : index
    %c0_123 = arith.constant 0 : index
    %459 = vector.load %arg3[%c34_122, %c0_123] : memref<49x256xf32, #tpu.memory_space<vmem>>, vector<1x256xf32>
    %460 = vector.broadcast %34 : f32 to vector<1x256xf32>
    %461 = arith.mulf %460, %457 : vector<1x256xf32>
    %462 = vector.broadcast %83 : f32 to vector<1x256xf32>
    %463 = arith.mulf %462, %458 : vector<1x256xf32>
    %464 = arith.addf %461, %463 : vector<1x256xf32>
    %465 = arith.mulf %464, %459 : vector<1x256xf32>
    %466 = arith.addf %446, %465 : vector<1x256xf32>
    %c227_i32 = arith.constant 227 : i32
    %467 = tpu.dynamic_rotate %114 by %c227_i32 dim 1 : vector<1x256xf32>, i32 -> vector<1x256xf32>
    %c227_i32_124 = arith.constant 227 : i32
    %468 = tpu.dynamic_rotate %116 by %c227_i32_124 dim 1 : vector<1x256xf32>, i32 -> vector<1x256xf32>
    %c35_125 = arith.constant 35 : index
    %c0_126 = arith.constant 0 : index
    %469 = vector.load %arg3[%c35_125, %c0_126] : memref<49x256xf32, #tpu.memory_space<vmem>>, vector<1x256xf32>
    %470 = vector.broadcast %35 : f32 to vector<1x256xf32>
    %471 = arith.mulf %470, %467 : vector<1x256xf32>
    %472 = vector.broadcast %84 : f32 to vector<1x256xf32>
    %473 = arith.mulf %472, %468 : vector<1x256xf32>
    %474 = arith.addf %471, %473 : vector<1x256xf32>
    %475 = arith.mulf %474, %469 : vector<1x256xf32>
    %476 = arith.addf %456, %475 : vector<1x256xf32>
    %c226_i32 = arith.constant 226 : i32
    %477 = tpu.dynamic_rotate %114 by %c226_i32 dim 1 : vector<1x256xf32>, i32 -> vector<1x256xf32>
    %c226_i32_127 = arith.constant 226 : i32
    %478 = tpu.dynamic_rotate %116 by %c226_i32_127 dim 1 : vector<1x256xf32>, i32 -> vector<1x256xf32>
    %c36_128 = arith.constant 36 : index
    %c0_129 = arith.constant 0 : index
    %479 = vector.load %arg3[%c36_128, %c0_129] : memref<49x256xf32, #tpu.memory_space<vmem>>, vector<1x256xf32>
    %480 = vector.broadcast %36 : f32 to vector<1x256xf32>
    %481 = arith.mulf %480, %477 : vector<1x256xf32>
    %482 = vector.broadcast %85 : f32 to vector<1x256xf32>
    %483 = arith.mulf %482, %478 : vector<1x256xf32>
    %484 = arith.addf %481, %483 : vector<1x256xf32>
    %485 = arith.mulf %484, %479 : vector<1x256xf32>
    %486 = arith.addf %466, %485 : vector<1x256xf32>
    %c225_i32 = arith.constant 225 : i32
    %487 = tpu.dynamic_rotate %114 by %c225_i32 dim 1 : vector<1x256xf32>, i32 -> vector<1x256xf32>
    %c225_i32_130 = arith.constant 225 : i32
    %488 = tpu.dynamic_rotate %116 by %c225_i32_130 dim 1 : vector<1x256xf32>, i32 -> vector<1x256xf32>
    %c37_131 = arith.constant 37 : index
    %c0_132 = arith.constant 0 : index
    %489 = vector.load %arg3[%c37_131, %c0_132] : memref<49x256xf32, #tpu.memory_space<vmem>>, vector<1x256xf32>
    %490 = vector.broadcast %37 : f32 to vector<1x256xf32>
    %491 = arith.mulf %490, %487 : vector<1x256xf32>
    %492 = vector.broadcast %86 : f32 to vector<1x256xf32>
    %493 = arith.mulf %492, %488 : vector<1x256xf32>
    %494 = arith.addf %491, %493 : vector<1x256xf32>
    %495 = arith.mulf %494, %489 : vector<1x256xf32>
    %496 = arith.addf %476, %495 : vector<1x256xf32>
    %c224_i32 = arith.constant 224 : i32
    %497 = tpu.dynamic_rotate %114 by %c224_i32 dim 1 : vector<1x256xf32>, i32 -> vector<1x256xf32>
    %c224_i32_133 = arith.constant 224 : i32
    %498 = tpu.dynamic_rotate %116 by %c224_i32_133 dim 1 : vector<1x256xf32>, i32 -> vector<1x256xf32>
    %c38_134 = arith.constant 38 : index
    %c0_135 = arith.constant 0 : index
    %499 = vector.load %arg3[%c38_134, %c0_135] : memref<49x256xf32, #tpu.memory_space<vmem>>, vector<1x256xf32>
    %500 = vector.broadcast %38 : f32 to vector<1x256xf32>
    %501 = arith.mulf %500, %497 : vector<1x256xf32>
    %502 = vector.broadcast %87 : f32 to vector<1x256xf32>
    %503 = arith.mulf %502, %498 : vector<1x256xf32>
    %504 = arith.addf %501, %503 : vector<1x256xf32>
    %505 = arith.mulf %504, %499 : vector<1x256xf32>
    %506 = arith.addf %486, %505 : vector<1x256xf32>
    %c223_i32 = arith.constant 223 : i32
    %507 = tpu.dynamic_rotate %114 by %c223_i32 dim 1 : vector<1x256xf32>, i32 -> vector<1x256xf32>
    %c223_i32_136 = arith.constant 223 : i32
    %508 = tpu.dynamic_rotate %116 by %c223_i32_136 dim 1 : vector<1x256xf32>, i32 -> vector<1x256xf32>
    %c39_137 = arith.constant 39 : index
    %c0_138 = arith.constant 0 : index
    %509 = vector.load %arg3[%c39_137, %c0_138] : memref<49x256xf32, #tpu.memory_space<vmem>>, vector<1x256xf32>
    %510 = vector.broadcast %39 : f32 to vector<1x256xf32>
    %511 = arith.mulf %510, %507 : vector<1x256xf32>
    %512 = vector.broadcast %88 : f32 to vector<1x256xf32>
    %513 = arith.mulf %512, %508 : vector<1x256xf32>
    %514 = arith.addf %511, %513 : vector<1x256xf32>
    %515 = arith.mulf %514, %509 : vector<1x256xf32>
    %516 = arith.addf %496, %515 : vector<1x256xf32>
    %c222_i32 = arith.constant 222 : i32
    %517 = tpu.dynamic_rotate %114 by %c222_i32 dim 1 : vector<1x256xf32>, i32 -> vector<1x256xf32>
    %c222_i32_139 = arith.constant 222 : i32
    %518 = tpu.dynamic_rotate %116 by %c222_i32_139 dim 1 : vector<1x256xf32>, i32 -> vector<1x256xf32>
    %c40_140 = arith.constant 40 : index
    %c0_141 = arith.constant 0 : index
    %519 = vector.load %arg3[%c40_140, %c0_141] : memref<49x256xf32, #tpu.memory_space<vmem>>, vector<1x256xf32>
    %520 = vector.broadcast %40 : f32 to vector<1x256xf32>
    %521 = arith.mulf %520, %517 : vector<1x256xf32>
    %522 = vector.broadcast %89 : f32 to vector<1x256xf32>
    %523 = arith.mulf %522, %518 : vector<1x256xf32>
    %524 = arith.addf %521, %523 : vector<1x256xf32>
    %525 = arith.mulf %524, %519 : vector<1x256xf32>
    %526 = arith.addf %506, %525 : vector<1x256xf32>
    %c221_i32 = arith.constant 221 : i32
    %527 = tpu.dynamic_rotate %114 by %c221_i32 dim 1 : vector<1x256xf32>, i32 -> vector<1x256xf32>
    %c221_i32_142 = arith.constant 221 : i32
    %528 = tpu.dynamic_rotate %116 by %c221_i32_142 dim 1 : vector<1x256xf32>, i32 -> vector<1x256xf32>
    %c41_143 = arith.constant 41 : index
    %c0_144 = arith.constant 0 : index
    %529 = vector.load %arg3[%c41_143, %c0_144] : memref<49x256xf32, #tpu.memory_space<vmem>>, vector<1x256xf32>
    %530 = vector.broadcast %41 : f32 to vector<1x256xf32>
    %531 = arith.mulf %530, %527 : vector<1x256xf32>
    %532 = vector.broadcast %90 : f32 to vector<1x256xf32>
    %533 = arith.mulf %532, %528 : vector<1x256xf32>
    %534 = arith.addf %531, %533 : vector<1x256xf32>
    %535 = arith.mulf %534, %529 : vector<1x256xf32>
    %536 = arith.addf %516, %535 : vector<1x256xf32>
    %c211_i32 = arith.constant 211 : i32
    %537 = tpu.dynamic_rotate %114 by %c211_i32 dim 1 : vector<1x256xf32>, i32 -> vector<1x256xf32>
    %c211_i32_145 = arith.constant 211 : i32
    %538 = tpu.dynamic_rotate %116 by %c211_i32_145 dim 1 : vector<1x256xf32>, i32 -> vector<1x256xf32>
    %c42_146 = arith.constant 42 : index
    %c0_147 = arith.constant 0 : index
    %539 = vector.load %arg3[%c42_146, %c0_147] : memref<49x256xf32, #tpu.memory_space<vmem>>, vector<1x256xf32>
    %540 = vector.broadcast %42 : f32 to vector<1x256xf32>
    %541 = arith.mulf %540, %537 : vector<1x256xf32>
    %542 = vector.broadcast %91 : f32 to vector<1x256xf32>
    %543 = arith.mulf %542, %538 : vector<1x256xf32>
    %544 = arith.addf %541, %543 : vector<1x256xf32>
    %545 = arith.mulf %544, %539 : vector<1x256xf32>
    %546 = arith.addf %526, %545 : vector<1x256xf32>
    %c210_i32 = arith.constant 210 : i32
    %547 = tpu.dynamic_rotate %114 by %c210_i32 dim 1 : vector<1x256xf32>, i32 -> vector<1x256xf32>
    %c210_i32_148 = arith.constant 210 : i32
    %548 = tpu.dynamic_rotate %116 by %c210_i32_148 dim 1 : vector<1x256xf32>, i32 -> vector<1x256xf32>
    %c43_149 = arith.constant 43 : index
    %c0_150 = arith.constant 0 : index
    %549 = vector.load %arg3[%c43_149, %c0_150] : memref<49x256xf32, #tpu.memory_space<vmem>>, vector<1x256xf32>
    %550 = vector.broadcast %43 : f32 to vector<1x256xf32>
    %551 = arith.mulf %550, %547 : vector<1x256xf32>
    %552 = vector.broadcast %92 : f32 to vector<1x256xf32>
    %553 = arith.mulf %552, %548 : vector<1x256xf32>
    %554 = arith.addf %551, %553 : vector<1x256xf32>
    %555 = arith.mulf %554, %549 : vector<1x256xf32>
    %556 = arith.addf %536, %555 : vector<1x256xf32>
    %c209_i32 = arith.constant 209 : i32
    %557 = tpu.dynamic_rotate %114 by %c209_i32 dim 1 : vector<1x256xf32>, i32 -> vector<1x256xf32>
    %c209_i32_151 = arith.constant 209 : i32
    %558 = tpu.dynamic_rotate %116 by %c209_i32_151 dim 1 : vector<1x256xf32>, i32 -> vector<1x256xf32>
    %c44_152 = arith.constant 44 : index
    %c0_153 = arith.constant 0 : index
    %559 = vector.load %arg3[%c44_152, %c0_153] : memref<49x256xf32, #tpu.memory_space<vmem>>, vector<1x256xf32>
    %560 = vector.broadcast %44 : f32 to vector<1x256xf32>
    %561 = arith.mulf %560, %557 : vector<1x256xf32>
    %562 = vector.broadcast %93 : f32 to vector<1x256xf32>
    %563 = arith.mulf %562, %558 : vector<1x256xf32>
    %564 = arith.addf %561, %563 : vector<1x256xf32>
    %565 = arith.mulf %564, %559 : vector<1x256xf32>
    %566 = arith.addf %546, %565 : vector<1x256xf32>
    %c208_i32 = arith.constant 208 : i32
    %567 = tpu.dynamic_rotate %114 by %c208_i32 dim 1 : vector<1x256xf32>, i32 -> vector<1x256xf32>
    %c208_i32_154 = arith.constant 208 : i32
    %568 = tpu.dynamic_rotate %116 by %c208_i32_154 dim 1 : vector<1x256xf32>, i32 -> vector<1x256xf32>
    %c45_155 = arith.constant 45 : index
    %c0_156 = arith.constant 0 : index
    %569 = vector.load %arg3[%c45_155, %c0_156] : memref<49x256xf32, #tpu.memory_space<vmem>>, vector<1x256xf32>
    %570 = vector.broadcast %45 : f32 to vector<1x256xf32>
    %571 = arith.mulf %570, %567 : vector<1x256xf32>
    %572 = vector.broadcast %94 : f32 to vector<1x256xf32>
    %573 = arith.mulf %572, %568 : vector<1x256xf32>
    %574 = arith.addf %571, %573 : vector<1x256xf32>
    %575 = arith.mulf %574, %569 : vector<1x256xf32>
    %576 = arith.addf %556, %575 : vector<1x256xf32>
    %c207_i32 = arith.constant 207 : i32
    %577 = tpu.dynamic_rotate %114 by %c207_i32 dim 1 : vector<1x256xf32>, i32 -> vector<1x256xf32>
    %c207_i32_157 = arith.constant 207 : i32
    %578 = tpu.dynamic_rotate %116 by %c207_i32_157 dim 1 : vector<1x256xf32>, i32 -> vector<1x256xf32>
    %c46_158 = arith.constant 46 : index
    %c0_159 = arith.constant 0 : index
    %579 = vector.load %arg3[%c46_158, %c0_159] : memref<49x256xf32, #tpu.memory_space<vmem>>, vector<1x256xf32>
    %580 = vector.broadcast %46 : f32 to vector<1x256xf32>
    %581 = arith.mulf %580, %577 : vector<1x256xf32>
    %582 = vector.broadcast %95 : f32 to vector<1x256xf32>
    %583 = arith.mulf %582, %578 : vector<1x256xf32>
    %584 = arith.addf %581, %583 : vector<1x256xf32>
    %585 = arith.mulf %584, %579 : vector<1x256xf32>
    %586 = arith.addf %566, %585 : vector<1x256xf32>
    %c206_i32 = arith.constant 206 : i32
    %587 = tpu.dynamic_rotate %114 by %c206_i32 dim 1 : vector<1x256xf32>, i32 -> vector<1x256xf32>
    %c206_i32_160 = arith.constant 206 : i32
    %588 = tpu.dynamic_rotate %116 by %c206_i32_160 dim 1 : vector<1x256xf32>, i32 -> vector<1x256xf32>
    %c47_161 = arith.constant 47 : index
    %c0_162 = arith.constant 0 : index
    %589 = vector.load %arg3[%c47_161, %c0_162] : memref<49x256xf32, #tpu.memory_space<vmem>>, vector<1x256xf32>
    %590 = vector.broadcast %47 : f32 to vector<1x256xf32>
    %591 = arith.mulf %590, %587 : vector<1x256xf32>
    %592 = vector.broadcast %96 : f32 to vector<1x256xf32>
    %593 = arith.mulf %592, %588 : vector<1x256xf32>
    %594 = arith.addf %591, %593 : vector<1x256xf32>
    %595 = arith.mulf %594, %589 : vector<1x256xf32>
    %596 = arith.addf %576, %595 : vector<1x256xf32>
    %c205_i32 = arith.constant 205 : i32
    %597 = tpu.dynamic_rotate %114 by %c205_i32 dim 1 : vector<1x256xf32>, i32 -> vector<1x256xf32>
    %c205_i32_163 = arith.constant 205 : i32
    %598 = tpu.dynamic_rotate %116 by %c205_i32_163 dim 1 : vector<1x256xf32>, i32 -> vector<1x256xf32>
    %c48_164 = arith.constant 48 : index
    %c0_165 = arith.constant 0 : index
    %599 = vector.load %arg3[%c48_164, %c0_165] : memref<49x256xf32, #tpu.memory_space<vmem>>, vector<1x256xf32>
    %600 = vector.broadcast %48 : f32 to vector<1x256xf32>
    %601 = arith.mulf %600, %597 : vector<1x256xf32>
    %602 = vector.broadcast %97 : f32 to vector<1x256xf32>
    %603 = arith.mulf %602, %598 : vector<1x256xf32>
    %604 = arith.addf %601, %603 : vector<1x256xf32>
    %605 = arith.mulf %604, %599 : vector<1x256xf32>
    %606 = arith.addf %586, %605 : vector<1x256xf32>
    %607 = arith.addf %606, %596 : vector<1x256xf32>
    %608 = vector.broadcast %98 : f32 to vector<1x256xf32>
    %609 = arith.addf %607, %608 : vector<1x256xf32>
    %610 = arith.negf %609 : vector<1x256xf32>
    %611 = math.exp %610 : vector<1x256xf32>
    %cst_166 = arith.constant 1.000000e+00 : f32
    %612 = vector.broadcast %cst_166 : f32 to vector<1x256xf32>
    %613 = arith.addf %612, %611 : vector<1x256xf32>
    %614 = arith.divf %612, %613 : vector<1x256xf32>
    %c0_167 = arith.constant 0 : index
    %c0_168 = arith.constant 0 : index
    %c0_169 = arith.constant 0 : index
    %615 = vector.load %arg6[%c0_167, %c0_168, %c0_169] : memref<2x1x256xf32, #tpu.memory_space<vmem>>, vector<1x1x256xf32>
    %616 = vector.shape_cast %615 : vector<1x1x256xf32> to vector<1x256xf32>
    %617 = vector.shape_cast %614 : vector<1x256xf32> to vector<1x1x256xf32>
    tpu.vector_store %arg6[%c0_167, %c0_168, %c0_169], %617 {strides = array<i32>} : memref<2x1x256xf32, #tpu.memory_space<vmem>>, vector<1x1x256xf32>,
    %c0_170 = arith.constant 0 : index
    %c0_171 = arith.constant 0 : index
    %c0_172 = arith.constant 0 : index
    %618 = vector.load %arg6[%c0_170, %c0_171, %c0_172] : memref<2x1x256xf32, #tpu.memory_space<vmem>>, vector<1x1x256xf32>
    %619 = vector.shape_cast %618 : vector<1x1x256xf32> to vector<1x256xf32>
    %c0_173 = arith.constant 0 : index
    %c0_174 = arith.constant 0 : index
    %c0_175 = arith.constant 0 : index
    %620 = vector.load %arg4[%c0_173, %c0_174, %c0_175] : memref<1x4x256xf32, #tpu.memory_space<vmem>>, vector<1x4x256xf32>
    %621 = vector.shape_cast %620 : vector<1x4x256xf32> to vector<4x256xf32>
    %622 = vector.broadcast %619 : vector<1x256xf32> to vector<4x256xf32>
    %623 = arith.mulf %621, %622 : vector<4x256xf32>
    %c0_176 = arith.constant 0 : index
    %c0_177 = arith.constant 0 : index
    %c0_178 = arith.constant 0 : index
    %624 = vector.load %arg5[%c0_176, %c0_177, %c0_178] : memref<1x4x256xf32, #tpu.memory_space<vmem>>, vector<1x4x256xf32>
    %625 = vector.shape_cast %624 : vector<1x4x256xf32> to vector<4x256xf32>
    %626 = vector.shape_cast %623 : vector<4x256xf32> to vector<1x4x256xf32>
    tpu.vector_store %arg5[%c0_176, %c0_177, %c0_178], %626 {strides = array<i32>} : memref<1x4x256xf32, #tpu.memory_space<vmem>>, vector<1x4x256xf32>,
    return
  }
  func.func @transform_0(%arg0: i32) -> i32 {
    %c0_i32 = arith.constant 0 : i32
    %c0_i32_0 = arith.constant 0 : i32
    return %c0_i32 : i32
  }
  func.func @transform_1(%arg0: i32) -> i32 {
    %c0_i32 = arith.constant 0 : i32
    %c0_i32_0 = arith.constant 0 : i32
    return %c0_i32 : i32
  }
  func.func @transform_2(%arg0: i32) -> (i32, i32) {
    %c0_i32 = arith.constant 0 : i32
    %c0_i32_0 = arith.constant 0 : i32
    %c0_i32_1 = arith.constant 0 : i32
    return %c0_i32, %c0_i32_0 : i32, i32
  }
  func.func @transform_3(%arg0: i32) -> (i32, i32, i32) {
    %c0_i32 = arith.constant 0 : i32
    %c0_i32_0 = arith.constant 0 : i32
    %c0_i32_1 = arith.constant 0 : i32
    return %arg0, %c0_i32, %c0_i32_0 : i32, i32, i32
  }
  func.func @transform_4(%arg0: i32) -> (i32, i32, i32) {
    %c0_i32 = arith.constant 0 : i32
    %c0_i32_0 = arith.constant 0 : i32
    %c0_i32_1 = arith.constant 0 : i32
    return %arg0, %c0_i32, %c0_i32_0 : i32, i32, i32
  }
}

</mosaic_0001>

<bundles_post_ra>
// kernel: spatial_attention.1
= control target key start
LH: loop header
LB: loop body
LE: loop exit
PB: predicated region body
PF: predicated region fallthrough
CT: control target
= control target key end

     0   :  { %s4825_s0 = inlined_call_operand.vmem [shape: f32[98], index: 0, kind: input, shape index: {}]   ;;  %s4826_s1 = inlined_call_operand.<no memory space> [shape: f32[1], index: 1, kind: input, shape index: {}]   ;;  %s4827_s2 = inlined_call_operand.vmem [shape: f32[49,256], index: 2, kind: input, shape index: {}]   ;;  %s4828_s3 = inlined_call_operand.vmem [shape: f32[2,4,256], index: 3, kind: input, shape index: {}]   ;;  %s4829_s4 = inlined_call_operand.vmem [shape: f32[2,4,256], index: 4, kind: output, shape index: {}]  }
   0x1   :  { %4919 = sst [smem:[#allocation64_spill]] %s4825_s0 }
   0x2   :  { %4920 = sst [smem:[#allocation65_spill]] %s4828_s3 }
   0x3   :  { %4921 = sst [smem:[#allocation66_spill]] %s4829_s4 }
   0x4   :  { %9 = sst [smem:[#allocation3]] %s4826_s1 }
   0x5   :  { %10 = vsyncpa [#allocation5], 0  ;;  %s2722_s17 = smov 0  }
   0x6 LB: > { %4922 = sst [smem:[#allocation7_spill]] %s2642_s17  ;;  %s2378_s18 = sadd.s32 4294967295, %s2642_s17   ;;  %s2642_s17 = sphi %s2722_s17, %s16_s17  }
   0x7   : > { %p2380_p0 = scmp.ge.s32.totalorder %s2642_s17, 1  ;;  %p136_p1 = scmp.lt.s32.totalorder %s2642_s17, 3 }
   0x8   : > { %s4923_s0 = sld [smem:[#allocation64_spill]]  ;;  %p2548_p3 = scmp.eq.s32.totalorder %s2378_s18, 0 }
   0x9   : > { %p2733_p2 = pnand %p2380_p0, %p136_p1 }
   0xb   : > { %p2544_p4 = pneg %p2733_p2 }
   0xd   : > { %p2545_p5 = pnand %p2548_p3, %p2544_p4 }
   0xe   : > { %s149_s21 = sshll.u32 %s4923_s0, 4  ;;  %s150_s21 = int_to_ptr.vmem [resolvable:$true] %s149_s21 }
   0xf   : > { %s2617_s22 = scalar_lea.vmem %s150_s21, 16  ;;  %p2619_p7 = pneg %p2545_p5 }
  0x10   : > { %p2618_p6 = scmp.ne.s32.totalorder %s150_s21, %s2617_s22  ;;  %p2625_p10 = scmp.lt.s32.totalorder %s150_s21, %s150_s21 }
  0x11   : > { %p2626_p11 = scmp.lt.s32.totalorder %s2617_s22, %s2617_s22 }
  0x12   : > { %p2620_p8 = pnand %p2619_p7, %p2618_p6 }
  0x13   : > { %p2627_p12 = por %p2626_p11, %p2625_p10 }
  0x14   : > { %p2621_p9 = pneg %p2620_p8 }
  0x16   : > { %p2628_p13 = pnand %p2627_p12, %p2621_p9 }
  0x18   : > { %2631 = shalt.err (!%p2628_p13)
}
  0x19   : > { %s2644_s23 = smov [#allocation4]   ;;  %176 = sbr.rel (%p2733_p2) target bundleno = 653 (0x28d), region = 36 }
  0x1a   : > { %2547 = dma.vmem_to_smem (!%p2545_p5), %s150_s21, 16, %s2644_s23, [#allocation5]  }
  0x20   : > { %2637 = dma.done.wait (%p2548_p3), [#allocation5], 16  }
  0x21   : > { %2639 = vsyncadd (%p2548_p3), [#allocation5], 4294967280 }
  0x22   : > { %182 = sfence }
  0x23   : > { %p203_p0 = scmp.lt.s32.totalorder %s2378_s18, 1  ;;  %vm316_vm0 = vcmask 1043456   ;;  %s4926_s3 = sld [smem:[#allocation65_spill]]  ;;  %v2645_v12 = vmov 1966171168   ;;  %v339_v14 = vlaneseq  ;;  %v4929_v41 = vmov 0 }
  0x24   : > { %v337_v13 = vunpack.c.l.s4 %v2645_v12  ;;  %s2646_s28 = smov 50   ;;  %s2647_s29 = smov 51  }
  0x25   : > { %s5195_s18 = smov (!%p203_p0, %s2378_s18), 1  ;;  %v340_v24 = vshrl.u32 %v339_v14, 7  ;;  %vm2760_vm1 = vcmp.lt.s32.totalorder %v339_v14, 256  ;;  %s2648_s30 = smov 49  }
  0x26   : > { %4925 = sst [smem:[#allocation8_spill]] %s5195_s18  ;;  %s4838_s24 = sshll.u32 %s5195_s18, 3  ;;  %v338_v23 = vunpack.c.0.s8 %v337_v13  ;;  %v4930_v41 = vsel %vm2760_vm1, 4294967295, %v4929_v41 }
  0x27   : > { %4931 = vst [vmem:[#allocation11_spill] sm:$0xff] %v4930_v41  ;;  %v2771_v45 = vsub.s32 0, %v340_v24  ;;  %v2773_v46 = vsub.s32 1, %v340_v24  ;;  %s2649_s5 = smov 48   ;;  %s2650_s6 = smov 47  }
  0x28   : > { %v2756_v33 = vsub.s32 %v338_v23, %v340_v24  ;;  %s2651_s7 = smov 46   ;;  %s2652_s8 = smov 45   ;;  %v3047_v41 = vld [vmem:[%s4827_s2 + $0x4] ss:$8 sm:$0x3] }
  0x29   : > { %s2752_s27 = scalar_lea.vmem %s4926_s3, %s4838_s24  ;;  %s2653_s9 = smov 35  }
  0x2a   : > { %4927 = sst [smem:[#allocation9_spill]] %s2752_s27  ;;  %v312_v0 = vld [vmem:[%s2752_s27] sm:$0xff]  ;;  %4928 = vst [vmem:[#allocation10_spill] sm:$0xff] %v2756_v33  ;;  %s2654_s10 = smov 34  }
  0x2b   : > { %v314_v1 = vcombine.high %v312_v0, %v312_v0  ;;  %v356_v2 = vsel %vm316_vm0, %v312_v0, -inf  ;;  %v317_v3 = vsel %vm316_vm0, %v312_v0, 0.0  ;;  %s2655_s11 = smov 33   ;;  %s2656_s12 = smov 32  }
  0x2c   : > { %v357_v4 = vrot.slane %v356_v2, 4  ;;  %v318_v5 = vrot.slane %v317_v3, 4  ;;  %s2657_s13 = smov 31   ;;  %s2658_s14 = smov 30  }
  0x2d   : > { %v363_v6 = vsel %vm316_vm0, %v314_v1, -inf  ;;  %v324_v7 = vsel %vm316_vm0, %v314_v1, 0.0  ;;  %s2659_s15 = smov 29   ;;  %s2660_s16 = smov 19  }
  0x2e   : > { %v358_v8 = vmax.f32 %v356_v2, %v357_v4  ;;  %v364_v9 = vrot.slane %v363_v6, 4  ;;  %v319_v10 = vadd.f32 %v318_v5, %v317_v3  ;;  %v325_v11 = vrot.slane %v324_v7, 4  ;;  %s2661_s19 = smov 18   ;;  %s2662_s20 = smov 17  }
  0x2f   : > { %s2663_s21 = smov 16   ;;  %s2664_s1 = smov 15  }
  0x30   : > { %v359_v15 = vrot.slane %v358_v8, 2  ;;  %v365_v16 = vmax.f32 %v363_v6, %v364_v9  ;;  %v320_v17 = vrot.slane %v319_v10, 2  ;;  %v326_v18 = vadd.f32 %v325_v11, %v324_v7  ;;  %s2665_s22 = smov 14   ;;  %s2666_s23 = smov 13  }
  0x31   : > { %s2667_s25 = smov 3   ;;  %s2668_s26 = smov 2  }
  0x32   : > { %v360_v19 = vmax.f32 %v358_v8, %v359_v15  ;;  %v366_v20 = vrot.slane %v365_v16, 2  ;;  %v321_v21 = vadd.f32 %v320_v17, %v319_v10  ;;  %v327_v22 = vrot.slane %v326_v18, 2  ;;  %s3096_s24 = sld [smem:[#allocation4 + $0x3b]]  ;;  %s3113_s3 = sld [smem:[#allocation4 + $0x3c]] }
  0x33   : > { %s3111_s0 = sld [smem:[#allocation4 + $0xb]]  ;;  %s4847_s17 = smov 125  }
  0x34   : > { %v361_v25 = vrot.slane %v360_v19, 1  ;;  %v367_v26 = vmax.f32 %v365_v16, %v366_v20  ;;  %v322_v27 = vrot.slane %v321_v21, 1  ;;  %v328_v28 = vadd.f32 %v327_v22, %v326_v18  ;;  %s3131_s4 = sld [smem:[#allocation4 + $0xc]]  ;;  %s3133_s18 = sld [smem:[#allocation4 + $0x3d]] }
  0x35   : > { %s3220_s27 = sld [smem:[#allocation4 + $0x41]] }
  0x36   : > { %v362_v29 = vmax.f32 %v360_v19, %v361_v25  ;;  %v368_v30 = vrot.slane %v367_v26, 1  ;;  %v323_v31 = vadd.f32 %v322_v27, %v321_v21  ;;  %v329_v32 = vrot.slane %v328_v28, 1 }
  0x38   : > { %v369_v34 = vmax.f32 %v367_v26, %v368_v30  ;;  %v330_v35 = vadd.f32 %v329_v32, %v328_v28  ;;  %v331_v36 = vmul.f32 0.25, %v323_v31  ;;  %4953 = sst [smem:[#allocation33_spill]] %s3096_s24  ;;  %s3294_s24 = sld [smem:[#allocation4 + $0x42]] }
  0x3a   : > { %v372_v37 = vcombine.low %v362_v29, %v369_v34  ;;  %v332_v38 = vmul.f32 0.25, %v330_v35  ;;  %v3005_v35 = vld [vmem:[%s4827_s2] ss:$8 sm:$0x3] }
  0x3c   : > { %v379_v39 = vrot.slane %v372_v37, %v2756_v33  ;;  %v335_v40 = vcombine.low %v331_v36, %v332_v38  ;;  %v3015_v36 = vld [vmem:[%s4827_s2 + $0x1] ss:$8 sm:$0x3] }
  0x3e   : > { %v386_v42 = vrot.slane %v379_v39, %v2756_v33  ;;  %v342_v43 = vrot.slane %v335_v40, %v2756_v33  ;;  %v3028_v39 = vld [vmem:[%s4827_s2 + $0x2] ss:$8 sm:$0x3]  ;;  %v3033_v40 = vld [vmem:[%s4827_s2 + $0x3] ss:$8 sm:$0x3] }
  0x40   : > { %389 = vst.msk [vmem:[#allocation2 + $0x2] sm:$0x3] %vm2760_vm1, %v386_v42  ;;  %v349_v44 = vrot.slane %v342_v43, %v2756_v33  ;;  %v3040_v42 = vand.u32 127, %v339_v14  ;;  %v3059_v14 = vld [vmem:[%s4827_s2 + $0x5] ss:$8 sm:$0x3] }
  0x41   : > { %v3159_v43 = vld [vmem:[%s4827_s2 + $0x12] ss:$8 sm:$0x3] }
  0x42   : > { %355 = vst.msk [vmem:[#allocation2] sm:$0x3] %vm2760_vm1, %v349_v44  ;;  %vm409_vm2 = vcmp.lt.s32.totalorder %v3040_v42, 51  ;;  %vm457_vm3 = vcmp.lt.s32.totalorder %v3040_v42, 50  ;;  %4958 = vst [vmem:[#allocation38_spill] sm:$0xff] %v3159_v43  ;;  %vm495_vm4 = vcmp.lt.s32.totalorder %v3040_v42, 49 }
  0x43   : > { %vm533_vm5 = vcmp.lt.s32.totalorder %v3040_v42, 48  ;;  %vm571_vm6 = vcmp.lt.s32.totalorder %v3040_v42, 47  ;;  %vm609_vm7 = vcmp.lt.s32.totalorder %v3040_v42, 46  ;;  %vm647_vm8 = vcmp.lt.s32.totalorder %v3040_v42, 45 }
  0x44   : > { %vm685_vm9 = vcmp.lt.s32.totalorder %v3040_v42, 35  ;;  %vm723_vm10 = vcmp.lt.s32.totalorder %v3040_v42, 34  ;;  %vm761_vm11 = vcmp.lt.s32.totalorder %v3040_v42, 33  ;;  %vm799_vm12 = vcmp.lt.s32.totalorder %v3040_v42, 32 }
  0x45   : > { %vm837_vm13 = vcmp.lt.s32.totalorder %v3040_v42, 31  ;;  %vm875_vm14 = vcmp.lt.s32.totalorder %v3040_v42, 30  ;;  %vm913_vm15 = vcmp.lt.s32.totalorder %v3040_v42, 29  ;;  %vm951_vm0 = vcmp.lt.s32.totalorder %v3040_v42, 19 }
  0x47   : > { %v2775_v47 = vld [vmem:[#allocation2 + $0x2] sm:$0x3] }
  0x48   : > { %v2779_v48 = vrot.slane %v2775_v47, %v2771_v45  ;;  %v2785_v49 = vrot.slane %v2775_v47, %v2773_v46 }
  0x49   : > { %v2791_v50 = vld [vmem:[#allocation2] sm:$0x3] }
  0x4a   : > { %460 = vrot.lane.b32.xlu0 %v2779_v48, %s2646_s28  ;;  %423 = vrot.lane.b32.xlu1 %v2779_v48, %s2647_s29  ;;  %v2797_v51 = vrot.slane %v2791_v50, %v2771_v45  ;;  %v2803_v52 = vrot.slane %v2791_v50, %v2773_v46 }
  0x4e   : > { %498 = vrot.lane.b32.xlu0 %v2779_v48, %s2648_s30  ;;  %425 = vrot.lane.b32.xlu1 %v2785_v49, %s2647_s29 }
  0x52   : > { %536 = vrot.lane.b32.xlu0 %v2779_v48, %s2649_s5  ;;  %462 = vrot.lane.b32.xlu1 %v2785_v49, %s2646_s28 }
  0x56   : > { %574 = vrot.lane.b32.xlu0 %v2779_v48, %s2650_s6  ;;  %500 = vrot.lane.b32.xlu1 %v2785_v49, %s2648_s30 }
  0x5a   : > { %538 = vrot.lane.b32.xlu1 %v2785_v49, %s2649_s5  ;;  %403 = vrot.lane.b32.xlu0 %v2797_v51, %s2647_s29 }
  0x5e   : > { %576 = vrot.lane.b32.xlu1 %v2785_v49, %s2650_s6  ;;  %405 = vrot.lane.b32.xlu0 %v2803_v52, %s2647_s29  ;;  %s2670_s29 = smov 127  }
  0x62   : > { %455 = vrot.lane.b32.xlu1 %v2803_v52, %s2646_s28  ;;  %453 = vrot.lane.b32.xlu0 %v2797_v51, %s2646_s28  ;;  %s2669_s28 = smov 1  }
  0x66   : > { %493 = vrot.lane.b32.xlu1 %v2803_v52, %s2648_s30  ;;  %491 = vrot.lane.b32.xlu0 %v2797_v51, %s2648_s30  ;;  %s2977_s30 = sld [smem:[#allocation4 + $0x31]] }
  0x6a   : > { %531 = vrot.lane.b32.xlu1 %v2803_v52, %s2649_s5  ;;  %529 = vrot.lane.b32.xlu0 %v2797_v51, %s2649_s5  ;;  %s2979_s5 = sld [smem:[#allocation4 + $0x32]] }
  0x6c   : > { %v4970_v43 = vstv %s2977_s30  ;;  %s2674_s30 = smov 114  }
  0x6e   : > { %569 = vrot.lane.b32.xlu1 %v2803_v52, %s2650_s6  ;;  %567 = vrot.lane.b32.xlu0 %v2797_v51, %s2650_s6  ;;  %s2981_s6 = sld [smem:[#allocation4 + $0x33]] }
  0x72   : > { %607 = vrot.lane.b32.xlu1 %v2803_v52, %s2651_s7  ;;  %605 = vrot.lane.b32.xlu0 %v2797_v51, %s2651_s7 }
  0x76   : > { %614 = vrot.lane.b32.xlu1 %v2785_v49, %s2651_s7  ;;  %612 = vrot.lane.b32.xlu0 %v2779_v48, %s2651_s7  ;;  %s2984_s7 = sld [smem:[#allocation4 + $0x34]] }
  0x7a   : > { %645 = vrot.lane.b32.xlu1 %v2803_v52, %s2652_s8  ;;  %643 = vrot.lane.b32.xlu0 %v2797_v51, %s2652_s8 }
  0x7e   : > { %652 = vrot.lane.b32.xlu1 %v2785_v49, %s2652_s8  ;;  %650 = vrot.lane.b32.xlu0 %v2779_v48, %s2652_s8  ;;  %s2987_s8 = sld [smem:[#allocation4 + $0x35]] }
  0x82   : > { %683 = vrot.lane.b32.xlu1 %v2803_v52, %s2653_s9  ;;  %681 = vrot.lane.b32.xlu0 %v2797_v51, %s2653_s9 }
  0x86   : > { %690 = vrot.lane.b32.xlu1 %v2785_v49, %s2653_s9  ;;  %688 = vrot.lane.b32.xlu0 %v2779_v48, %s2653_s9  ;;  %s2989_s9 = sld [smem:[#allocation4]] }
  0x8a   : > { %721 = vrot.lane.b32.xlu1 %v2803_v52, %s2654_s10  ;;  %719 = vrot.lane.b32.xlu0 %v2797_v51, %s2654_s10 }
  0x8e   : > { %728 = vrot.lane.b32.xlu1 %v2785_v49, %s2654_s10  ;;  %726 = vrot.lane.b32.xlu0 %v2779_v48, %s2654_s10  ;;  %s2995_s10 = sld [smem:[#allocation4 + $0x1]] }
  0x92   : > { %759 = vrot.lane.b32.xlu1 %v2803_v52, %s2655_s11  ;;  %757 = vrot.lane.b32.xlu0 %v2797_v51, %s2655_s11 }
  0x96   : > { %766 = vrot.lane.b32.xlu1 %v2785_v49, %s2655_s11  ;;  %764 = vrot.lane.b32.xlu0 %v2779_v48, %s2655_s11  ;;  %s2997_s11 = sld [smem:[#allocation4 + $0x2]] }
  0x9a   : > { %797 = vrot.lane.b32.xlu1 %v2803_v52, %s2656_s12  ;;  %795 = vrot.lane.b32.xlu0 %v2797_v51, %s2656_s12 }
  0x9e   : > { %804 = vrot.lane.b32.xlu1 %v2785_v49, %s2656_s12  ;;  %802 = vrot.lane.b32.xlu0 %v2779_v48, %s2656_s12  ;;  %s2999_s12 = sld [smem:[#allocation4 + $0x3]] }
  0xa2   : > { %835 = vrot.lane.b32.xlu1 %v2803_v52, %s2657_s13  ;;  %833 = vrot.lane.b32.xlu0 %v2797_v51, %s2657_s13 }
  0xa6   : > { %842 = vrot.lane.b32.xlu1 %v2785_v49, %s2657_s13  ;;  %840 = vrot.lane.b32.xlu0 %v2779_v48, %s2657_s13  ;;  %s2671_s13 = smov 126  }
  0xaa   : > { %873 = vrot.lane.b32.xlu1 %v2803_v52, %s2658_s14  ;;  %871 = vrot.lane.b32.xlu0 %v2797_v51, %s2658_s14 }
  0xae   : > { %880 = vrot.lane.b32.xlu1 %v2785_v49, %s2658_s14  ;;  %878 = vrot.lane.b32.xlu0 %v2779_v48, %s2658_s14  ;;  %s3037_s14 = sld [smem:[#allocation4 + $0x7]] }
  0xb2   : > { %911 = vrot.lane.b32.xlu1 %v2803_v52, %s2659_s15  ;;  %909 = vrot.lane.b32.xlu0 %v2797_v51, %s2659_s15 }
  0xb4   : > { %4946 = sst [smem:[#allocation26_spill]] %s3037_s14  ;;  %s3477_s14 = sld [smem:[#allocation4 + $0x45]] }
  0xb6   : > { %918 = vrot.lane.b32.xlu1 %v2785_v49, %s2659_s15  ;;  %916 = vrot.lane.b32.xlu0 %v2779_v48, %s2659_s15  ;;  %s3148_s15 = sld [smem:[#allocation4 + $0x3e]] }
  0xba   : > { %949 = vrot.lane.b32.xlu1 %v2803_v52, %s2660_s16  ;;  %947 = vrot.lane.b32.xlu0 %v2797_v51, %s2660_s16  ;;  %5001 = sst [smem:[#allocation59_spill]] %s3477_s14  ;;  %s3646_s14 = sld [smem:[#allocation4 + $0x48]] }
  0xbc   : > { %v2853_v53 = vpop.permute.xlu0 %460  ;;  %v2855_v54 = vpop.permute.xlu1 %423 }
  0xbe   : > { %956 = vrot.lane.b32.xlu1 %v2785_v49, %s2660_s16  ;;  %954 = vrot.lane.b32.xlu0 %v2779_v48, %s2660_s16  ;;  %s3007_s16 = sld [smem:[#allocation4 + $0x4]] }
  0xc0   : > { %v2859_v55 = vpop.permute.xlu0 %498  ;;  %v2861_v56 = vpop.permute.xlu1 %425 }
  0xc2   : > { %987 = vrot.lane.b32.xlu1 %v2803_v52, %s2661_s19  ;;  %985 = vrot.lane.b32.xlu0 %v2797_v51, %s2661_s19 }
  0xc4   : > { %v2865_v57 = vpop.permute.xlu0 %536  ;;  %v2867_v58 = vpop.permute.xlu1 %462 }
  0xc6   : > { %994 = vrot.lane.b32.xlu1 %v2785_v49, %s2661_s19  ;;  %992 = vrot.lane.b32.xlu0 %v2779_v48, %s2661_s19  ;;  %s3009_s19 = sld [smem:[#allocation4 + $0x5]] }
  0xc8   : > { %v2871_v59 = vpop.permute.xlu0 %574  ;;  %v2873_v60 = vpop.permute.xlu1 %500 }
  0xca   : > { %1025 = vrot.lane.b32.xlu1 %v2803_v52, %s2662_s20  ;;  %1023 = vrot.lane.b32.xlu0 %v2797_v51, %s2662_s20 }
  0xcc   : > { %v2877_v61 = vpop.permute.xlu1 %538  ;;  %v2879_v62 = vpop.permute.xlu0 %403  ;;  %4941 = sst [smem:[#allocation21_spill]] %s3009_s19  ;;  %s3161_s19 = sld [smem:[#allocation4 + $0xe]] }
  0xce   : > { %1032 = vrot.lane.b32.xlu1 %v2785_v49, %s2662_s20  ;;  %1030 = vrot.lane.b32.xlu0 %v2779_v48, %s2662_s20  ;;  %s3094_s20 = sld [smem:[#allocation4 + $0xa]] }
  0xd0   : > { %v2883_v63 = vpop.permute.xlu1 %576  ;;  %v2885_v0 = vpop.permute.xlu0 %405 }
  0xd2   : > { %1063 = vrot.lane.b32.xlu1 %v2803_v52, %s2663_s21  ;;  %1061 = vrot.lane.b32.xlu0 %v2797_v51, %s2663_s21 }
  0xd4   : > { %v2889_v1 = vpop.permute.xlu1 %455  ;;  %v2891_v2 = vpop.permute.xlu0 %453  ;;  %4952 = sst [smem:[#allocation32_spill]] %s3094_s20  ;;  %s2673_s20 = smov 115  }
  0xd6   : > { %1070 = vrot.lane.b32.xlu1 %v2785_v49, %s2663_s21  ;;  %1068 = vrot.lane.b32.xlu0 %v2779_v48, %s2663_s21  ;;  %s3049_s21 = sld [smem:[#allocation4 + $0x38]] }
  0xd8   : > { %v2895_v3 = vpop.permute.xlu1 %493  ;;  %v2897_v4 = vpop.permute.xlu0 %491 }
  0xda   : > { %1101 = vrot.lane.b32.xlu1 %v2803_v52, %s2664_s1  ;;  %1099 = vrot.lane.b32.xlu0 %v2797_v51, %s2664_s1 }
  0xdc   : > { %v2901_v5 = vpop.permute.xlu1 %531  ;;  %v2903_v6 = vpop.permute.xlu0 %529  ;;  %4947 = sst [smem:[#allocation27_spill]] %s3049_s21  ;;  %s3188_s21 = sld [smem:[#allocation4 + $0x40]] }
  0xde   : > { %1108 = vrot.lane.b32.xlu1 %v2785_v49, %s2664_s1  ;;  %1106 = vrot.lane.b32.xlu0 %v2779_v48, %s2664_s1  ;;  %s3017_s1 = sld [smem:[#allocation4 + $0x36]] }
  0xe0   : > { %v2907_v7 = vpop.permute.xlu1 %569  ;;  %v2909_v8 = vpop.permute.xlu0 %567 }
  0xe2   : > { %1139 = vrot.lane.b32.xlu1 %v2803_v52, %s2665_s22  ;;  %1137 = vrot.lane.b32.xlu0 %v2797_v51, %s2665_s22 }
  0xe4   : > { %v2913_v9 = vpop.permute.xlu1 %607  ;;  %v2915_v10 = vpop.permute.xlu0 %605 }
  0xe6   : > { %1146 = vrot.lane.b32.xlu1 %v2785_v49, %s2665_s22  ;;  %1144 = vrot.lane.b32.xlu0 %v2779_v48, %s2665_s22  ;;  %s3019_s22 = sld [smem:[#allocation4 + $0x6]] }
  0xe8   : > { %v2919_v11 = vpop.permute.xlu1 %614  ;;  %v2921_v12 = vpop.permute.xlu0 %612 }
  0xea   : > { %1177 = vrot.lane.b32.xlu1 %v2803_v52, %s2666_s23  ;;  %1175 = vrot.lane.b32.xlu0 %v2797_v51, %s2666_s23 }
  0xec   : > { %v2925_v13 = vpop.permute.xlu1 %645  ;;  %v2927_v15 = vpop.permute.xlu0 %643  ;;  %4942 = sst [smem:[#allocation22_spill]] %s3019_s22  ;;  %s4959_s22 = smov 125  }
  0xee   : > { %1184 = vrot.lane.b32.xlu1 %v2785_v49, %s2666_s23  ;;  %1182 = vrot.lane.b32.xlu0 %v2779_v48, %s2666_s23  ;;  %s3051_s23 = sld [smem:[#allocation4 + $0x8]] }
  0xf0   : > { %v2931_v16 = vpop.permute.xlu1 %652  ;;  %v2933_v17 = vpop.permute.xlu0 %650 }
  0xf2   : > { %1215 = vrot.lane.b32.xlu1 %v2803_v52, %s2667_s25  ;;  %1213 = vrot.lane.b32.xlu0 %v2797_v51, %s2667_s25 }
  0xf4   : > { %v2937_v18 = vpop.permute.xlu1 %683  ;;  %v2939_v19 = vpop.permute.xlu0 %681 }
  0xf6   : > { %1222 = vrot.lane.b32.xlu1 %v2785_v49, %s2667_s25  ;;  %1220 = vrot.lane.b32.xlu0 %v2779_v48, %s2667_s25  ;;  %s3075_s25 = sld [smem:[#allocation4 + $0x9]] }
  0xf8   : > { %v2943_v20 = vpop.permute.xlu1 %690  ;;  %v2945_v21 = vpop.permute.xlu0 %688 }
  0xfa   : > { %1253 = vrot.lane.b32.xlu1 %v2803_v52, %s2668_s26  ;;  %1251 = vrot.lane.b32.xlu0 %v2797_v51, %s2668_s26 }
  0xfc   : > { %v2949_v22 = vpop.permute.xlu1 %721  ;;  %v2951_v23 = vpop.permute.xlu0 %719  ;;  %4948 = sst [smem:[#allocation28_spill]] %s3075_s25  ;;  %s3234_s25 = sld [smem:[#allocation4 + $0x11]] }
  0xfd   : > { %4932 = vst [vmem:[#allocation12_spill] sm:$0xff] %v2951_v23 }
  0xfe   : > { %1260 = vrot.lane.b32.xlu1 %v2785_v49, %s2668_s26  ;;  %1258 = vrot.lane.b32.xlu0 %v2779_v48, %s2668_s26  ;;  %s3077_s26 = sld [smem:[#allocation4 + $0x3a]] }
 0x100   : > { %v2955_v24 = vpop.permute.xlu1 %728  ;;  %v2957_v25 = vpop.permute.xlu0 %726 }
 0x102   : > { %1291 = vrot.lane.b32.xlu1 %v2803_v52, %s2669_s28  ;;  %1289 = vrot.lane.b32.xlu0 %v2797_v51, %s2669_s28 }
 0x104   : > { %v2961_v26 = vpop.permute.xlu1 %759  ;;  %v2963_v27 = vpop.permute.xlu0 %757  ;;  %4949 = sst [smem:[#allocation29_spill]] %s3077_s26  ;;  %s3397_s26 = sld [smem:[#allocation4 + $0x44]] }
 0x105   : > { %4933 = vst [vmem:[#allocation13_spill] sm:$0xff] %v2961_v26  ;;  %4934 = vst [vmem:[#allocation14_spill] sm:$0xff] %v2963_v27  ;;  %v427_v26 = vsel %vm409_vm2, %v2855_v54, %v2861_v56 }
 0x106   : > { %1298 = vrot.lane.b32.xlu1 %v2785_v49, %s2669_s28  ;;  %1296 = vrot.lane.b32.xlu0 %v2779_v48, %s2669_s28  ;;  %s3061_s28 = sld [smem:[#allocation4 + $0x39]] }
 0x108   : > { %v2967_v28 = vpop.permute.xlu1 %766  ;;  %v2969_v29 = vpop.permute.xlu0 %764 }
 0x109   : > { %4935 = vst [vmem:[#allocation15_spill] sm:$0xff] %v2967_v28  ;;  %4936 = vst [vmem:[#allocation16_spill] sm:$0xff] %v2969_v29  ;;  %v3247_v29 = vld [vmem:[%s4827_s2 + $0x17] ss:$8 sm:$0x3] }
 0x10a   : > { %1350 = vrot.lane.b32.xlu1 %v2803_v52, %s2670_s29  ;;  %1348 = vrot.lane.b32.xlu0 %v2797_v51, %s2670_s29  ;;  %4966 = vst [vmem:[#allocation45_spill] sm:$0xff] %v3247_v29 }
 0x10c   : > { %v2973_v30 = vpop.permute.xlu1 %797  ;;  %v2975_v31 = vpop.permute.xlu0 %795 }
 0x10d   : > { %4937 = vst [vmem:[#allocation17_spill] sm:$0xff] %v2973_v30  ;;  %4938 = vst [vmem:[#allocation18_spill] sm:$0xff] %v2975_v31  ;;  %v3184_v30 = vld [vmem:[%s4827_s2 + $0x13] ss:$8 sm:$0x3] }
 0x10e   : > { %1357 = vrot.lane.b32.xlu1 %v2785_v49, %s2670_s29  ;;  %1355 = vrot.lane.b32.xlu0 %v2779_v48, %s2670_s29  ;;  %s3035_s29 = sld [smem:[#allocation4 + $0x37]]  ;;  %4960 = vst [vmem:[#allocation39_spill] sm:$0xff] %v3184_v30  ;;  %v3271_v31 = vld [vmem:[%s4827_s2 + $0x20] ss:$8 sm:$0x3] }
 0x10f   : > { %4969 = vst [vmem:[#allocation48_spill] sm:$0xff] %v3271_v31 }
 0x110   : > { %v2991_v32 = vpop.permute.xlu1 %804  ;;  %v2993_v34 = vpop.permute.xlu0 %802 }
 0x111   : > { %4939 = vst [vmem:[#allocation19_spill] sm:$0xff] %v2991_v32  ;;  %4940 = vst [vmem:[#allocation20_spill] sm:$0xff] %v2993_v34  ;;  %v3092_v34 = vld [vmem:[%s4827_s2 + $0x7] ss:$8 sm:$0x3] }
 0x112   : > { %1388 = vrot.lane.b32.xlu1 %v2803_v52, %s2671_s13  ;;  %1386 = vrot.lane.b32.xlu0 %v2797_v51, %s2671_s13 }
 0x114   : > { %v3021_v37 = vpop.permute.xlu1 %835  ;;  %v3023_v38 = vpop.permute.xlu0 %833  ;;  %4945 = sst [smem:[#allocation25_spill]] %s3035_s29  ;;  %s3171_s29 = sld [smem:[#allocation4 + $0x3f]] }
 0x115   : > { %4943 = vst [vmem:[#allocation23_spill] sm:$0xff] %v3021_v37  ;;  %4944 = vst [vmem:[#allocation24_spill] sm:$0xff] %v3023_v38  ;;  %v3073_v38 = vld [vmem:[%s4827_s2 + $0x6] ss:$8 sm:$0x3] }
 0x116   : > { %1395 = vrot.lane.b32.xlu1 %v2785_v49, %s2671_s13  ;;  %1393 = vrot.lane.b32.xlu0 %v2779_v48, %s2671_s13  ;;  %s3146_s13 = sld [smem:[#allocation4 + $0xd]]  ;;  %v3232_v37 = vld [vmem:[%s4827_s2 + $0x16] ss:$8 sm:$0x3] }
 0x117   : > { %4965 = vst [vmem:[#allocation44_spill] sm:$0xff] %v3232_v37  ;;  %v465_v37 = vsel %vm457_vm3, %v2867_v58, %v2853_v53 }
 0x118   : > { %v3079_v33 = vpop.permute.xlu1 %842  ;;  %v3081_v44 = vpop.permute.xlu0 %840 }
 0x119   : > { %4950 = vst [vmem:[#allocation30_spill] sm:$0xff] %v3079_v33  ;;  %4951 = vst [vmem:[#allocation31_spill] sm:$0xff] %v3081_v44  ;;  %v3109_v44 = vld [vmem:[%s4827_s2 + $0x10] ss:$8 sm:$0x3] }
 0x11a   : > { %4954 = vst [vmem:[#allocation34_spill] sm:$0xff] %v3109_v44  ;;  %1426 = vrot.lane.b32.xlu1 %v2803_v52, %s4847_s17  ;;  %v3127_v33 = vld [vmem:[%s4827_s2 + $0x11] ss:$8 sm:$0x3]  ;;  %1424 = vrot.lane.b32.xlu0 %v2797_v51, %s4847_s17  ;;  %s3173_s17 = sld [smem:[#allocation4 + $0xf]] }
 0x11b   : > { %4955 = vst [vmem:[#allocation35_spill] sm:$0xff] %v3127_v33  ;;  %v3202_v44 = vld [vmem:[%s4827_s2 + $0x14] ss:$8 sm:$0x3] }
 0x11c   : > { %v3142_v32 = vpop.permute.xlu1 %873  ;;  %v3144_v27 = vpop.permute.xlu0 %871  ;;  %4962 = vst [vmem:[#allocation41_spill] sm:$0xff] %v3202_v44  ;;  %v3218_v33 = vld [vmem:[%s4827_s2 + $0x15] ss:$8 sm:$0x3]  ;;  %v428_v44 = vsel %vm409_vm2, %v2861_v56, %v2855_v54  ;;  %v4973_v54 = vmov %v4970_v43  ;;  %v410_v56 = vsel %vm409_vm2, %v2879_v62, %v2885_v0 }
 0x11d   : > { %4956 = vst [vmem:[#allocation36_spill] sm:$0xff] %v3142_v32  ;;  %4957 = vst [vmem:[#allocation37_spill] sm:$0xff] %v3144_v27  ;;  %v435_v23 = vmul.f32 %v4973_v54, %v427_v26  ;;  %v497_v26 = vsel %vm495_vm4, %v2895_v3, %v2897_v4  ;;  %v503_v54 = vsel %vm495_vm4, %v2873_v60, %v2859_v55 }
 0x11e   : > { %1433 = vrot.lane.b32.xlu1 %v2785_v49, %s4959_s22  ;;  %1431 = vrot.lane.b32.xlu0 %v2779_v48, %s4959_s22  ;;  %s3206_s22 = sld [smem:[#allocation4 + $0x10]]  ;;  %4964 = vst [vmem:[#allocation43_spill] sm:$0xff] %v3218_v33  ;;  %v434_v33 = vmul.f32 %v4970_v43, %v428_v44  ;;  %v411_v43 = vsel %vm409_vm2, %v2885_v0, %v2879_v62  ;;  %v3334_v0 = vld [vmem:[%s4827_s2 + $0x21] ss:$8 sm:$0x3]  ;;  %vm989_vm2 = vcmp.lt.s32.totalorder %v3040_v42, 18 }
 0x11f   : > { %4977 = vst [vmem:[#allocation52_spill] sm:$0xff] %v3334_v0  ;;  %v4988_v0 = vstv %s2984_s7 }
 0x120   : > { %v3197_v27 = vpop.permute.xlu1 %880  ;;  %v3204_v32 = vpop.permute.xlu0 %878 }
 0x121   : > { %4961 = vst [vmem:[#allocation40_spill] sm:$0xff] %v3197_v27  ;;  %4963 = vst [vmem:[#allocation42_spill] sm:$0xff] %v3204_v32  ;;  %v464_v27 = vsel %vm457_vm3, %v2853_v53, %v2867_v58 }
 0x122   : > { %1464 = vrot.lane.b32.xlu1 %v2803_v52, %s2673_s20  ;;  %1462 = vrot.lane.b32.xlu0 %v2797_v51, %s2673_s20 }
 0x124   : > { %v3249_v30 = vpop.permute.xlu1 %911  ;;  %v3252_v32 = vpop.permute.xlu0 %909 }
 0x125   : > { %4967 = vst [vmem:[#allocation46_spill] sm:$0xff] %v3249_v30  ;;  %4968 = vst [vmem:[#allocation47_spill] sm:$0xff] %v3252_v32  ;;  %v4975_v30 = vstv %s2979_s5  ;;  %s3354_s5 = sld [smem:[#allocation4 + $0x43]] }
 0x126   : > { %1471 = vrot.lane.b32.xlu1 %v2785_v49, %s2673_s20  ;;  %1469 = vrot.lane.b32.xlu0 %v2779_v48, %s2673_s20  ;;  %s3318_s20 = sld [smem:[#allocation4 + $0x12]]  ;;  %v472_v53 = vmul.f32 %v4975_v30, %v465_v37  ;;  %v4976_v29 = vmov %v4975_v30  ;;  %v459_v30 = vsel %vm457_vm3, %v2889_v1, %v2891_v2  ;;  %v496_v37 = vsel %vm495_vm4, %v2897_v4, %v2895_v3 }
 0x127   : > { %v473_v58 = vmul.f32 %v4976_v29, %v464_v27  ;;  %v502_v27 = vsel %vm495_vm4, %v2859_v55, %v2873_v60  ;;  %v458_v29 = vsel %vm457_vm3, %v2891_v2, %v2889_v1  ;;  %v541_v1 = vsel %vm533_vm5, %v2877_v61, %v2865_v57 }
 0x128   : > { %v3298_v28 = vpop.permute.xlu1 %918  ;;  %v3300_v32 = vpop.permute.xlu0 %916  ;;  %v4978_v2 = vstv %s2989_s9  ;;  %v540_v55 = vsel %vm533_vm5, %v2865_v57, %v2877_v61  ;;  %v4982_v60 = vstv %s2997_s11  ;;  %s3382_s9 = sld [smem:[#allocation4 + $0x13]]  ;;  %s3426_s11 = sld [smem:[#allocation4 + $0x14]]  ;;  %vm1027_vm3 = vcmp.lt.s32.totalorder %v3040_v42, 17 }
 0x129   : > { %4971 = vst [vmem:[#allocation49_spill] sm:$0xff] %v3298_v28  ;;  %4972 = vst [vmem:[#allocation50_spill] sm:$0xff] %v3300_v32  ;;  %v431_v62 = vmul.f32 %v4978_v2, %v411_v43  ;;  %v4979_v3 = vmov %v4978_v2  ;;  %v507_v32 = vmul.f32 %v4982_v60, %v497_v26  ;;  %v579_v2 = vsel %vm571_vm6, %v2883_v63, %v2871_v59 }
 0x12a   : > { %1502 = vrot.lane.b32.xlu1 %v2803_v52, %s2674_s30  ;;  %1500 = vrot.lane.b32.xlu0 %v2797_v51, %s2674_s30  ;;  %v432_v4 = vmul.f32 %v4979_v3, %v410_v56  ;;  %v4983_v3 = vstv %s2995_s10  ;;  %v4985_v61 = vmov %v4982_v60  ;;  %v4986_v26 = vstv %s2981_s6  ;;  %s3506_s6 = sld [smem:[#allocation4 + $0x49]]  ;;  %s2676_s10 = smov 112  }
 0x12b   : > { %v508_v28 = vmul.f32 %v4985_v61, %v496_v37  ;;  %v510_v60 = vmul.f32 %v4986_v26, %v503_v54  ;;  %v4987_v56 = vmov %v4986_v26  ;;  %v436_v37 = vadd.f32 %v434_v33, %v431_v62 }
 0x12c   : > { %4974 = sst [smem:[#allocation51_spill]] %s3318_s20  ;;  %v3368_v44 = vpop.permute.xlu1 %949  ;;  %v3370_v31 = vpop.permute.xlu0 %947  ;;  %v511_v43 = vmul.f32 %v4987_v56, %v502_v27  ;;  %v535_v54 = vsel %vm533_vm5, %v2901_v5, %v2903_v6  ;;  %v4993_v33 = vstv %s2984_s7  ;;  %s3594_s7 = sld [smem:[#allocation4 + $0x47]]  ;;  %vm1065_vm4 = vcmp.lt.s32.totalorder %v3040_v42, 16 }
 0x12d   : > { %4980 = vst [vmem:[#allocation53_spill] sm:$0xff] %v3368_v44  ;;  %4981 = vst [vmem:[#allocation54_spill] sm:$0xff] %v3370_v31  ;;  %v469_v31 = vmul.f32 %v4983_v3, %v459_v30  ;;  %v4984_v44 = vmov %v4983_v3  ;;  %v548_v30 = vmul.f32 %v4988_v0, %v541_v1  ;;  %v437_v3 = vadd.f32 %v435_v23, %v432_v4  ;;  %s3678_s20 = sld [smem:[#allocation4 + $0x19]] }
 0x12e   : > { %v470_v57 = vmul.f32 %v4984_v44, %v458_v29  ;;  %1509 = vrot.lane.b32.xlu1 %v2785_v49, %s2674_s30  ;;  %1507 = vrot.lane.b32.xlu0 %v2779_v48, %s2674_s30  ;;  %v578_v29 = vsel %vm571_vm6, %v2871_v59, %v2883_v63  ;;  %v3424_v59 = vld [vmem:[%s4827_s2 + $0x22] ss:$8 sm:$0x3]  ;;  %4992 = sst [smem:[#allocation58_spill]] %s3426_s11  ;;  %v549_v63 = vmul.f32 %v4993_v33, %v540_v55  ;;  %v4994_v23 = vstv %s2987_s8  ;;  %s2675_s30 = smov 113  }
 0x12f   : > { %4991 = vst [vmem:[#allocation57_spill] sm:$0xff] %v3424_v59  ;;  %v586_v62 = vmul.f32 %v4994_v23, %v579_v2  ;;  %v512_v1 = vadd.f32 %v510_v60, %v507_v32  ;;  %v474_v56 = vadd.f32 %v472_v53, %v469_v31  ;;  %v513_v26 = vadd.f32 %v511_v43, %v508_v28  ;;  %s5012_s8 = sld [smem:[#allocation22_spill]]  ;;  %s3555_s11 = sld [smem:[#allocation4 + $0x15]] }
 0x130   : > { %v3417_v0 = vpop.permute.xlu1 %956  ;;  %v3419_v27 = vpop.permute.xlu0 %954  ;;  %v475_v61 = vadd.f32 %v473_v58, %v470_v57  ;;  %v534_v44 = vsel %vm533_vm5, %v2903_v6, %v2901_v5  ;;  %v4996_v55 = vstv %s2999_s12  ;;  %v4997_v31 = vrot.slane %v3005_v35, %v2771_v45  ;;  %s3504_s12 = sld [smem:[#allocation4 + $0x18]] }
 0x131   : > { %4989 = vst [vmem:[#allocation55_spill] sm:$0xff] %v3417_v0  ;;  %4990 = vst [vmem:[#allocation56_spill] sm:$0xff] %v3419_v27  ;;  %v4995_v27 = vmov %v4994_v23  ;;  %v545_v33 = vmul.f32 %v4996_v55, %v535_v54  ;;  %v4998_v5 = vrot.slane %v3005_v35, %v2773_v46  ;;  %v573_v58 = vsel %vm571_vm6, %v2907_v7, %v2909_v8 }
 0x132   : > { %1540 = vrot.lane.b32.xlu1 %v2803_v52, %s2675_s30  ;;  %v587_v0 = vmul.f32 %v4995_v27, %v578_v29  ;;  %1538 = vrot.lane.b32.xlu0 %v2797_v51, %s2675_s30  ;;  %v449_v53 = vmul.f32 %v4997_v31, %v436_v37  ;;  %v4999_v60 = vrot.slane %v3028_v39, %v2771_v45  ;;  %v3475_v27 = vld [vmem:[%s4827_s2 + $0x23] ss:$8 sm:$0x3]  ;;  %vm1141_vm5 = vcmp.lt.s32.totalorder %v3040_v42, 14 }
 0x133   : > { %v450_v6 = vmul.f32 %v4998_v5, %v437_v3  ;;  %v5000_v35 = vmov %v4996_v55  ;;  %v572_v3 = vsel %vm571_vm6, %v2909_v8, %v2907_v7  ;;  %v5002_v23 = vrot.slane %v3015_v36, %v2771_v45 }
 0x134   : > { %v3456_v43 = vpop.permute.xlu1 %987  ;;  %v3458_v2 = vpop.permute.xlu0 %985  ;;  %v525_v29 = vmul.f32 %v4999_v60, %v512_v1  ;;  %v546_v37 = vmul.f32 %v5000_v35, %v534_v44  ;;  %v5003_v44 = vrot.slane %v3015_v36, %v2773_v46  ;;  %v5004_v7 = vrot.slane %v3028_v39, %v2773_v46 }
 0x135   : > { %v487_v1 = vmul.f32 %v5002_v23, %v474_v56  ;;  %v550_v5 = vadd.f32 %v548_v30, %v545_v33  ;;  %v5005_v60 = vstv %s3007_s16  ;;  %v616_v36 = vsel %vm609_vm7, %v2921_v12, %v2919_v11  ;;  %s5007_s16 = sld [smem:[#allocation21_spill]]  ;;  %v5049_v23 = vld [vmem:[#allocation14_spill] sm:$0xff]  ;;  %v5058_v33 = vld [vmem:[#allocation31_spill] sm:$0xff] }
 0x136   : > { %v3485_v55 = vmul.f32 %v5003_v44, %v475_v61  ;;  %v526_v8 = vmul.f32 %v5004_v7, %v513_v26  ;;  %1547 = vrot.lane.b32.xlu1 %v2785_v49, %s2675_s30  ;;  %v583_v35 = vmul.f32 %v5005_v60, %v573_v58  ;;  %v617_v39 = vsel %vm609_vm7, %v2919_v11, %v2921_v12  ;;  %v5057_v58 = vld [vmem:[#allocation30_spill] sm:$0xff] }
 0x137   : > { %1545 = vrot.lane.b32.xlu0 %v2779_v48, %s2675_s30  ;;  %v5006_v30 = vmov %v5005_v60  ;;  %v3519_v11 = vadd.f32 %v525_v29, %v449_v53  ;;  %v551_v12 = vadd.f32 %v549_v63, %v546_v37  ;;  %v610_v44 = vsel %vm609_vm7, %v2915_v10, %v2913_v9  ;;  %s5010_s30 = sld [smem:[#allocation25_spill]] }
 0x138   : > { %v584_v56 = vmul.f32 %v5006_v30, %v572_v3  ;;  %v3510_v61 = vpop.permute.xlu1 %994  ;;  %v3512_v26 = vpop.permute.xlu0 %992  ;;  %v611_v3 = vsel %vm609_vm7, %v2913_v9, %v2915_v10  ;;  %v5008_v7 = vstv %s3017_s1  ;;  %v654_v63 = vsel %vm647_vm8, %v2933_v17, %v2931_v16  ;;  %s5021_s1 = sld [smem:[#allocation27_spill]] }
 0x139   : > { %v624_v60 = vmul.f32 %v5008_v7, %v617_v39  ;;  %v5009_v30 = vmov %v5008_v7  ;;  %v655_v53 = vsel %vm647_vm8, %v2931_v16, %v2933_v17  ;;  %v528_v9 = vadd.f32 %v526_v8, %v450_v6  ;;  %v3553_v16 = vld [vmem:[%s4827_s2 + $0x24] ss:$8 sm:$0x3] }
 0x13a   : > { %v625_v57 = vmul.f32 %v5009_v30, %v616_v36  ;;  %1578 = vrot.lane.b32.xlu1 %v2803_v52, %s2676_s10  ;;  %v5011_v10 = vrot.slane %v3033_v40, %v2771_v45  ;;  %v588_v37 = vadd.f32 %v586_v62, %v583_v35  ;;  %v649_v36 = vsel %vm647_vm8, %v2925_v13, %v2927_v15 }
 0x13b   : > { %1576 = vrot.lane.b32.xlu0 %v2797_v51, %s2676_s10  ;;  %5013 = vst [vmem:[#allocation60_spill] sm:$0xff] %v3553_v16  ;;  %v589_v17 = vadd.f32 %v587_v0, %v584_v56  ;;  %v5014_v6 = vstv %s5007_s16  ;;  %v648_v35 = vsel %vm647_vm8, %v2927_v15, %v2925_v13  ;;  %v5016_v30 = vrot.slane %v3033_v40, %v2773_v46  ;;  %s3577_s16 = sld [smem:[#allocation4 + $0x46]] }
 0x13c   : > { %v563_v29 = vmul.f32 %v5011_v10, %v550_v5  ;;  %v621_v8 = vmul.f32 %v5014_v6, %v611_v3  ;;  %v5015_v62 = vmov %v5014_v6  ;;  %v3565_v39 = vpop.permute.xlu1 %1025  ;;  %v3567_v7 = vpop.permute.xlu0 %1023  ;;  %v5019_v13 = vstv %s5012_s8  ;;  %s5062_s8 = sld [smem:[#allocation32_spill]] }
 0x13d   : > { %v622_v5 = vmul.f32 %v5015_v62, %v610_v44  ;;  %v564_v10 = vmul.f32 %v5016_v30, %v551_v12  ;;  %v5017_v28 = vstv %s5010_s30  ;;  %v659_v15 = vmul.f32 %v5019_v13, %v649_v36  ;;  %s3592_s30 = sld [smem:[#allocation4 + $0x16]] }
 0x13e   : > { %v662_v0 = vmul.f32 %v5017_v28, %v655_v53  ;;  %v5018_v56 = vmov %v5017_v28  ;;  %v626_v6 = vadd.f32 %v624_v60, %v621_v8  ;;  %1585 = vrot.lane.b32.xlu1 %v2785_v49, %s2676_s10  ;;  %v5020_v40 = vmov %v5019_v13 }
 0x13f   : > { %v663_v3 = vmul.f32 %v5018_v56, %v654_v63  ;;  %v627_v62 = vadd.f32 %v625_v57, %v622_v5  ;;  %v660_v12 = vmul.f32 %v5020_v40, %v648_v35  ;;  %v693_v28 = vsel %vm685_vm9, %v2943_v20, %v2945_v21  ;;  %1583 = vrot.lane.b32.xlu0 %v2779_v48, %s2676_s10  ;;  %s2677_s10 = smov 111   ;;  %v5043_v56 = vld [vmem:[#allocation16_spill] sm:$0xff] }
 0x140   : > { %v1329_v57 = vstv %s3504_s12  ;;  %v1331_v60 = vstv %s3506_s6  ;;  %v565_v63 = vadd.f32 %v563_v29, %v487_v1  ;;  %v5022_v53 = vrot.slane %v3047_v41, %v2771_v45  ;;  %v3604_v35 = vpop.permute.xlu1 %1032  ;;  %v3606_v30 = vpop.permute.xlu0 %1030  ;;  %s3618_s12 = sld [smem:[#allocation4 + $0x17]]  ;;  %s5025_s6 = sld [smem:[#allocation26_spill]] }
 0x141   : > { %v5023_v8 = vrot.slane %v3047_v41, %v2773_v46  ;;  %v664_v13 = vadd.f32 %v662_v0, %v659_v15  ;;  %v665_v40 = vadd.f32 %v663_v3, %v660_v12  ;;  %v687_v1 = vsel %vm685_vm9, %v2937_v18, %v2939_v19  ;;  %v3629_v0 = vld [vmem:[%s4827_s2 + $0x25] ss:$8 sm:$0x3] }
 0x142   : > { %v601_v36 = vmul.f32 %v5022_v53, %v588_v37  ;;  %v692_v41 = vsel %vm685_vm9, %v2945_v21, %v2943_v20  ;;  %v566_v29 = vadd.f32 %v564_v10, %v3485_v55  ;;  %v5024_v37 = vstv %s5021_s1  ;;  %1616 = vrot.lane.b32.xlu1 %v2803_v52, %s2677_s10  ;;  %5026 = vst [vmem:[#allocation61_spill] sm:$0xff] %v3629_v0  ;;  %s5046_s1 = sld [smem:[#allocation28_spill]] }
 0x143   : > { %v602_v5 = vmul.f32 %v5023_v8, %v589_v17  ;;  %v700_v17 = vmul.f32 %v5024_v37, %v693_v28  ;;  %v1330_v20 = vmul.f32 %v1329_v57, %v2791_v50  ;;  %v1332_v21 = vmul.f32 %v1331_v60, %v2775_v47  ;;  %1614 = vrot.lane.b32.xlu0 %v2797_v51, %s2677_s10 }
 0x144   : > { %v5027_v55 = vrot.slane %v3059_v14, %v2771_v45  ;;  %v5028_v3 = vrot.slane %v3059_v14, %v2773_v46  ;;  %v686_v12 = vsel %vm685_vm9, %v2939_v19, %v2937_v18  ;;  %v603_v47 = vadd.f32 %v601_v36, %v3519_v11  ;;  %v3662_v11 = vpop.permute.xlu0 %1061 }
 0x145   : > { %v604_v28 = vadd.f32 %v602_v5, %v528_v9  ;;  %v5030_v60 = vmov %v5024_v37  ;;  %v5031_v53 = vrot.slane %v3073_v38, %v2771_v45  ;;  %v5032_v19 = vrot.slane %v3073_v38, %v2773_v46  ;;  %v3670_v5 = vld [vmem:[%s4827_s2 + $0x26] ss:$8 sm:$0x3] }
 0x146   : > { %v639_v10 = vmul.f32 %v5027_v55, %v626_v6  ;;  %v640_v15 = vmul.f32 %v5028_v3, %v627_v62  ;;  %v5029_v6 = vstv %s5025_s6  ;;  %v701_v14 = vmul.f32 %v5030_v60, %v692_v41  ;;  %v3653_v62 = vpop.permute.xlu1 %1063  ;;  %5033 = vst [vmem:[#allocation62_spill] sm:$0xff] %v3670_v5  ;;  %1623 = vrot.lane.b32.xlu1 %v2785_v49, %s2677_s10  ;;  %s2678_s6 = smov 110  }
 0x147   : > { %v697_v57 = vmul.f32 %v5029_v6, %v687_v1  ;;  %v677_v18 = vmul.f32 %v5031_v53, %v664_v13  ;;  %v678_v8 = vmul.f32 %v5032_v19, %v665_v40  ;;  %v5034_v13 = vmov %v5029_v6  ;;  %1621 = vrot.lane.b32.xlu0 %v2779_v48, %s2677_s10  ;;  %v5037_v19 = vld [vmem:[#allocation12_spill] sm:$0xff]  ;;  %s3802_s10 = sld [smem:[#allocation4 + $0x4a]] }
 0x148   : > { %v698_v1 = vmul.f32 %v5034_v13, %v686_v12  ;;  %v1333_v40 = vadd.f32 %v1332_v21, %v1330_v20  ;;  %v641_v37 = vadd.f32 %v639_v10, %v565_v63  ;;  %v3680_v55 = vadd.f32 %v640_v15, %v566_v29  ;;  %v2509_v12 = vld [vmem:[%s4827_s2 + $0x30] ss:$8 sm:$0x3]  ;;  %v3705_v10 = vld [vmem:[%s4827_s2 + $0x27] ss:$8 sm:$0x3] }
 0x149   : > { %v702_v41 = vadd.f32 %v700_v17, %v697_v57  ;;  %v730_v63 = vsel %vm723_vm10, %v2957_v25, %v2955_v24  ;;  %v731_v29 = vsel %vm723_vm10, %v2955_v24, %v2957_v25  ;;  %5035 = vst [vmem:[#allocation63_spill] sm:$0xff] %v3705_v10  ;;  %v3707_v15 = vadd.f32 %v677_v18, %v603_v47  ;;  %v3712_v24 = vpop.permute.xlu0 %1068  ;;  %v5051_v17 = vld [vmem:[#allocation20_spill] sm:$0xff] }
 0x14a   : > { %v703_v6 = vadd.f32 %v701_v14, %v698_v1  ;;  %v3698_v20 = vpop.permute.xlu1 %1070  ;;  %v3709_v57 = vadd.f32 %v678_v8, %v604_v28  ;;  %v5036_v14 = vrot.slane %v3092_v34, %v2771_v45  ;;  %v724_v47 = vsel %vm723_vm10, %v5037_v19, %v2949_v22  ;;  %1654 = vrot.lane.b32.xlu1 %v2803_v52, %s2678_s6 }
 0x14b   : > { %v725_v28 = vsel %vm723_vm10, %v2949_v22, %v5037_v19  ;;  %v3729_v18 = vmul.f32 %v2509_v12, %v1333_v40  ;;  %v5039_v8 = vstv %s3061_s28  ;;  %1652 = vrot.lane.b32.xlu0 %v2797_v51, %s2678_s6  ;;  %v5041_v21 = vrot.slane %v3092_v34, %v2773_v46  ;;  %v5042_v19 = vld [vmem:[#allocation15_spill] sm:$0xff]  ;;  %s5044_s28 = sld [smem:[#allocation29_spill]] }
 0x14c   : > { %v715_v53 = vmul.f32 %v5036_v14, %v702_v41  ;;  %v738_v13 = vmul.f32 %v5039_v8, %v731_v29  ;;  %v5040_v1 = vmov %v5039_v8  ;;  %v768_v40 = vsel %vm761_vm11, %v5043_v56, %v5042_v19  ;;  %v5050_v29 = vld [vmem:[#allocation19_spill] sm:$0xff] }
 0x14d   : > { %5038 = vst [vmem:[#allocation12_spill] sm:$0xff] %v3729_v18  ;;  %v739_v41 = vmul.f32 %v5040_v1, %v730_v63  ;;  %v3742_v22 = vmul.f32 %v5041_v21, %v703_v6  ;;  %v769_v12 = vsel %vm761_vm11, %v5042_v19, %v5043_v56  ;;  %v5045_v34 = vstv %s3051_s23  ;;  %v5048_v1 = vld [vmem:[#allocation13_spill] sm:$0xff]  ;;  %v3768_v19 = vpop.permute.xlu0 %1099  ;;  %s5052_s23 = sld [smem:[#allocation33_spill]] }
 0x14e   : > { %v3752_v63 = vpop.permute.xlu1 %1101  ;;  %v735_v6 = vmul.f32 %v5045_v34, %v725_v28  ;;  %v5047_v21 = vmov %v5045_v34  ;;  %v762_v3 = vsel %vm761_vm11, %v5049_v23, %v5048_v1  ;;  %v763_v56 = vsel %vm761_vm11, %v5048_v1, %v5049_v23  ;;  %1661 = vrot.lane.b32.xlu1 %v2785_v49, %s2678_s6  ;;  %v5066_v34 = vld [vmem:[#allocation40_spill] sm:$0xff] }
 0x14f   : > { %v736_v8 = vmul.f32 %v5047_v21, %v724_v47  ;;  %v3770_v25 = vadd.f32 %v715_v53, %v641_v37  ;;  %v806_v28 = vsel %vm799_vm12, %v5051_v17, %v5050_v29  ;;  %v807_v47 = vsel %vm799_vm12, %v5050_v29, %v5051_v17  ;;  %1659 = vrot.lane.b32.xlu0 %v2779_v48, %s2678_s6  ;;  %s2679_s6 = smov 109  }
 0x150   : > { %v740_v23 = vadd.f32 %v738_v13, %v735_v6  ;;  %v5055_v14 = vstv %s5046_s1  ;;  %v844_v17 = vsel %vm837_vm13, %v5058_v33, %v5057_v58  ;;  %v845_v13 = vsel %vm837_vm13, %v5057_v58, %v5058_v33  ;;  %s4378_s1 = sld [smem:[#allocation4 + $0x1d]] }
 0x151   : > { %v741_v21 = vadd.f32 %v739_v41, %v736_v8  ;;  %v5053_v1 = vstv %s5044_s28  ;;  %v773_v60 = vmul.f32 %v5055_v14, %v763_v56  ;;  %v5056_v38 = vmov %v5055_v14  ;;  %v5059_v14 = vld [vmem:[#allocation17_spill] sm:$0xff]  ;;  %v3816_v6 = vpop.permute.xlu0 %1106  ;;  %v5065_v56 = vld [vmem:[#allocation24_spill] sm:$0xff]  ;;  %s4666_s28 = sld [smem:[#allocation4 + $0x5b]] }
 0x152   : > { %v776_v37 = vmul.f32 %v5053_v1, %v769_v12  ;;  %v5054_v53 = vmov %v5053_v1  ;;  %v774_v36 = vmul.f32 %v5056_v38, %v762_v3  ;;  %v3800_v41 = vpop.permute.xlu1 %1108  ;;  %v5060_v38 = vld [vmem:[#allocation18_spill] sm:$0xff]  ;;  %v5064_v8 = vld [vmem:[#allocation23_spill] sm:$0xff]  ;;  %1692 = vrot.lane.b32.xlu1 %v2803_v52, %s2679_s6  ;;  %v5070_v50 = vstv %s5062_s8  ;;  %s4686_s8 = sld [smem:[#allocation4 + $0x5c]] }
 0x153   : > { %v777_v44 = vmul.f32 %v5054_v53, %v768_v40  ;;  %v800_v3 = vsel %vm799_vm12, %v5060_v38, %v5059_v14  ;;  %v801_v40 = vsel %vm799_vm12, %v5059_v14, %v5060_v38  ;;  %v5061_v12 = vstv %s5052_s23  ;;  %v5067_v14 = vld [vmem:[#allocation42_spill] sm:$0xff]  ;;  %1690 = vrot.lane.b32.xlu0 %v2797_v51, %s2679_s6  ;;  %s4380_s23 = sld [smem:[#allocation4 + $0x4e]] }
 0x154   : > { %v814_v33 = vmul.f32 %v5061_v12, %v807_v47  ;;  %v5063_v58 = vmov %v5061_v12  ;;  %v838_v1 = vsel %vm837_vm13, %v5065_v56, %v5064_v8  ;;  %v839_v53 = vsel %vm837_vm13, %v5064_v8, %v5065_v56 }
 0x155   : > { %v815_v29 = vmul.f32 %v5063_v58, %v806_v28  ;;  %v882_v47 = vsel %vm875_vm14, %v5067_v14, %v5066_v34  ;;  %v883_v28 = vsel %vm875_vm14, %v5066_v34, %v5067_v14  ;;  %v778_v38 = vadd.f32 %v776_v37, %v773_v60  ;;  %v5072_v34 = vld [vmem:[#allocation36_spill] sm:$0xff]  ;;  %v5073_v14 = vld [vmem:[#allocation37_spill] sm:$0xff] }
 0x156   : > { %v779_v12 = vadd.f32 %v777_v44, %v774_v36  ;;  %v5068_v58 = vstv %s3113_s3  ;;  %v811_v32 = vmul.f32 %v5070_v50, %v801_v40  ;;  %v5071_v9 = vmov %v5070_v50  ;;  %v3853_v36 = vpop.permute.xlu1 %1139  ;;  %1699 = vrot.lane.b32.xlu1 %v2785_v49, %s2679_s6  ;;  %s2681_s3 = smov 98  }
 0x157   : > { %v852_v8 = vmul.f32 %v5068_v58, %v845_v13  ;;  %v5069_v56 = vmov %v5068_v58  ;;  %v812_v54 = vmul.f32 %v5071_v9, %v800_v3  ;;  %v876_v31 = vsel %vm875_vm14, %v5073_v14, %v5072_v34  ;;  %v3863_v58 = vpop.permute.xlu0 %1137  ;;  %1697 = vrot.lane.b32.xlu0 %v2779_v48, %s2679_s6  ;;  %s4544_s6 = sld [smem:[#allocation4 + $0x24]] }
 0x158   : > { %v853_v4 = vmul.f32 %v5069_v56, %v844_v17  ;;  %v877_v44 = vsel %vm875_vm14, %v5072_v34, %v5073_v14  ;;  %v5074_v60 = vstv %s3111_s0  ;;  %v5076_v13 = vstv %s3133_s18  ;;  %v5078_v56 = vld [vmem:[#allocation34_spill] sm:$0xff]  ;;  %s2680_s0 = smov 99   ;;  %s4564_s18 = sld [smem:[#allocation4 + $0x25]] }
 0x159   : > { %v849_v37 = vmul.f32 %v5074_v60, %v839_v53  ;;  %v5075_v17 = vmov %v5074_v60  ;;  %v890_v9 = vmul.f32 %v5076_v13, %v883_v28  ;;  %v5077_v3 = vmov %v5076_v13 }
 0x15a   : > { %v850_v50 = vmul.f32 %v5075_v17, %v838_v1  ;;  %v891_v40 = vmul.f32 %v5077_v3, %v882_v47  ;;  %v5079_v5 = vrot.slane %v5078_v56, %v2771_v45  ;;  %v5080_v34 = vrot.slane %v5078_v56, %v2773_v46  ;;  %1730 = vrot.lane.b32.xlu1 %v2803_v52, %s2680_s0 }
 0x15b   : > { %v816_v16 = vadd.f32 %v814_v33, %v811_v32  ;;  %v817_v59 = vadd.f32 %v815_v29, %v812_v54  ;;  %v854_v1 = vadd.f32 %v852_v8, %v849_v37  ;;  %v5081_v28 = vstv %s3131_s4  ;;  %v5086_v29 = vld [vmem:[#allocation49_spill] sm:$0xff]  ;;  %v5087_v8 = vld [vmem:[#allocation50_spill] sm:$0xff]  ;;  %1728 = vrot.lane.b32.xlu0 %v2797_v51, %s2680_s0  ;;  %s2689_s4 = smov 81  }
 0x15c   : > { %v753_v18 = vmul.f32 %v5079_v5, %v740_v23  ;;  %v754_v14 = vmul.f32 %v5080_v34, %v741_v21  ;;  %v855_v53 = vadd.f32 %v853_v4, %v850_v50  ;;  %v887_v60 = vmul.f32 %v5081_v28, %v877_v44  ;;  %v5083_v5 = vld [vmem:[#allocation35_spill] sm:$0xff]  ;;  %v3886_v4 = vpop.permute.xlu1 %1146  ;;  %v5088_v37 = vld [vmem:[#allocation38_spill] sm:$0xff] }
 0x15d   : > { %v5082_v47 = vmov %v5081_v28  ;;  %v718_v13 = vadd.f32 %v3742_v22, %v3680_v55  ;;  %v5084_v23 = vrot.slane %v5083_v5, %v2771_v45  ;;  %v5085_v32 = vrot.slane %v5083_v5, %v2773_v46  ;;  %v5091_v34 = vld [vmem:[#allocation39_spill] sm:$0xff] }
 0x15e   : > { %v888_v17 = vmul.f32 %v5082_v47, %v876_v31  ;;  %v892_v33 = vadd.f32 %v890_v9, %v887_v60  ;;  %v920_v55 = vsel %vm913_vm15, %v5087_v8, %v5086_v29  ;;  %v921_v22 = vsel %vm913_vm15, %v5086_v29, %v5087_v8  ;;  %1737 = vrot.lane.b32.xlu1 %v2785_v49, %s2680_s0 }
 0x15f   : > { %v791_v3 = vmul.f32 %v5084_v23, %v778_v38  ;;  %v792_v54 = vmul.f32 %v5085_v32, %v779_v12  ;;  %v3898_v38 = vpop.permute.xlu0 %1144  ;;  %v755_v12 = vadd.f32 %v753_v18, %v3707_v15  ;;  %v756_v44 = vadd.f32 %v754_v14, %v3709_v57  ;;  %v5094_v18 = vld [vmem:[#allocation46_spill] sm:$0xff]  ;;  %v5095_v14 = vld [vmem:[#allocation47_spill] sm:$0xff]  ;;  %1735 = vrot.lane.b32.xlu0 %v2779_v48, %s2680_s0  ;;  %s4404_s0 = sld [smem:[#allocation4 + $0x1e]] }
 0x160   : > { %v893_v31 = vadd.f32 %v891_v40, %v888_v17  ;;  %v5089_v50 = vrot.slane %v5088_v37, %v2771_v45  ;;  %v5090_v40 = vrot.slane %v5088_v37, %v2773_v46  ;;  %v5092_v28 = vrot.slane %v5091_v34, %v2771_v45  ;;  %v5098_v23 = vld [vmem:[#allocation55_spill] sm:$0xff]  ;;  %v5099_v32 = vld [vmem:[#allocation56_spill] sm:$0xff]  ;;  %v3936_v8 = vpop.permute.xlu1 %1177 }
 0x161   : > { %v5093_v15 = vrot.slane %v5091_v34, %v2773_v46  ;;  %v5096_v47 = vstv %s3148_s15  ;;  %v959_v29 = vsel %vm951_vm0, %v5098_v23, %v5099_v32  ;;  %v793_v37 = vadd.f32 %v791_v3, %v3770_v25  ;;  %v5105_v25 = vld [vmem:[#allocation53_spill] sm:$0xff]  ;;  %s5159_s15 = sld [smem:[#allocation59_spill]] }
 0x162   : > { %v829_v9 = vmul.f32 %v5089_v50, %v816_v16  ;;  %v830_v56 = vmul.f32 %v5090_v40, %v817_v59  ;;  %v867_v60 = vmul.f32 %v5092_v28, %v854_v1  ;;  %v914_v16 = vsel %vm913_vm15, %v5095_v14, %v5094_v18  ;;  %1768 = vrot.lane.b32.xlu1 %v2803_v52, %s2681_s3 }
 0x163   : > { %v868_v57 = vmul.f32 %v5093_v15, %v855_v53  ;;  %v915_v59 = vsel %vm913_vm15, %v5094_v18, %v5095_v14  ;;  %v928_v1 = vmul.f32 %v5096_v47, %v921_v22  ;;  %v5097_v17 = vmov %v5096_v47  ;;  %v5100_v22 = vld [vmem:[#allocation41_spill] sm:$0xff]  ;;  %v3946_v15 = vpop.permute.xlu0 %1175  ;;  %1766 = vrot.lane.b32.xlu0 %v2797_v51, %s2681_s3 }
 0x164   : > { %v929_v5 = vmul.f32 %v5097_v17, %v920_v55  ;;  %v958_v53 = vsel %vm951_vm0, %v5099_v32, %v5098_v23  ;;  %v794_v50 = vadd.f32 %v792_v54, %v718_v13  ;;  %v5101_v55 = vrot.slane %v5100_v22, %v2771_v45  ;;  %v5106_v13 = vld [vmem:[#allocation54_spill] sm:$0xff] }
 0x165   : > { %v5102_v34 = vrot.slane %v5100_v22, %v2773_v46  ;;  %v5103_v18 = vstv %s3146_s13  ;;  %v952_v3 = vsel %vm951_vm0, %v5106_v13, %v5105_v25  ;;  %v953_v54 = vsel %vm951_vm0, %v5105_v25, %v5106_v13  ;;  %s5151_s13 = sld [smem:[#allocation58_spill]] }
 0x166   : > { %v905_v40 = vmul.f32 %v5101_v55, %v892_v33  ;;  %v925_v14 = vmul.f32 %v5103_v18, %v915_v59  ;;  %v5104_v47 = vmov %v5103_v18  ;;  %v831_v33 = vadd.f32 %v829_v9, %v755_v12  ;;  %1775 = vrot.lane.b32.xlu1 %v2785_v49, %s2681_s3 }
 0x167   : > { %v906_v28 = vmul.f32 %v5102_v34, %v893_v31  ;;  %v926_v17 = vmul.f32 %v5104_v47, %v914_v16  ;;  %v832_v31 = vadd.f32 %v830_v56, %v756_v44  ;;  %v5107_v23 = vstv %s3171_s29  ;;  %v3966_v47 = vpop.permute.xlu1 %1184  ;;  %v3980_v9 = vpop.permute.xlu0 %1182  ;;  %1773 = vrot.lane.b32.xlu0 %v2779_v48, %s2681_s3  ;;  %s5141_s29 = sld [smem:[#allocation51_spill]]  ;;  %s4406_s3 = sld [smem:[#allocation4 + $0x4f]] }
 0x168   : > { %v966_v32 = vmul.f32 %v5107_v23, %v959_v29  ;;  %v5108_v59 = vmov %v5107_v23  ;;  %v869_v16 = vadd.f32 %v867_v60, %v793_v37  ;;  %v870_v55 = vadd.f32 %v868_v57, %v794_v50 }
 0x169   : > { %v967_v22 = vmul.f32 %v5108_v59, %v958_v53  ;;  %v930_v34 = vadd.f32 %v928_v1, %v925_v14  ;;  %v931_v18 = vadd.f32 %v929_v5, %v926_v17  ;;  %v5109_v21 = vstv %s3161_s19  ;;  %v5120_v59 = vld [vmem:[#allocation44_spill] sm:$0xff]  ;;  %s2682_s19 = smov 97  }
 0x16a   : > { %v963_v10 = vmul.f32 %v5109_v21, %v953_v54  ;;  %v5110_v0 = vmov %v5109_v21  ;;  %v996_v12 = vsel %vm989_vm2, %v3512_v26, %v3510_v61  ;;  %v997_v44 = vsel %vm989_vm2, %v3510_v61, %v3512_v26  ;;  %1806 = vrot.lane.b32.xlu1 %v2803_v52, %s2682_s19 }
 0x16b   : > { %v964_v25 = vmul.f32 %v5110_v0, %v952_v3  ;;  %v907_v56 = vadd.f32 %v905_v40, %v831_v33  ;;  %v908_v60 = vadd.f32 %v906_v28, %v832_v31  ;;  %v1034_v0 = vsel %vm1027_vm3, %v3606_v30, %v3604_v35  ;;  %1804 = vrot.lane.b32.xlu0 %v2797_v51, %s2682_s19 }
 0x16c   : > { %v1035_v21 = vsel %vm1027_vm3, %v3604_v35, %v3606_v30  ;;  %v968_v61 = vadd.f32 %v966_v32, %v963_v10  ;;  %v990_v57 = vsel %vm989_vm2, %v3458_v2, %v3456_v43  ;;  %v991_v1 = vsel %vm989_vm2, %v3456_v43, %v3458_v2  ;;  %v4013_v43 = vpop.permute.xlu1 %1215  ;;  %v5113_v2 = vld [vmem:[#allocation43_spill] sm:$0xff] }
 0x16d   : > { %v969_v26 = vadd.f32 %v967_v22, %v964_v25  ;;  %v5111_v35 = vstv %s3188_s21  ;;  %v1028_v53 = vsel %vm1027_vm3, %v3567_v7, %v3565_v39  ;;  %v1029_v29 = vsel %vm1027_vm3, %v3565_v39, %v3567_v7  ;;  %v1214_v39 = vpop.permute.xlu0 %1213  ;;  %s2683_s21 = smov 96  }
 0x16e   : > { %v1004_v30 = vmul.f32 %v5111_v35, %v997_v44  ;;  %v5112_v10 = vmov %v5111_v35  ;;  %v5114_v37 = vrot.slane %v5113_v2, %v2771_v45  ;;  %v5115_v40 = vrot.slane %v5113_v2, %v2773_v46  ;;  %1813 = vrot.lane.b32.xlu1 %v2785_v49, %s2682_s19 }
 0x16f   : > { %v1005_v5 = vmul.f32 %v5112_v10, %v996_v12  ;;  %v5116_v14 = vstv %s3220_s27  ;;  %vm1103_vm6 = vcmp.lt.s32.totalorder %v3040_v42, 15  ;;  %vm1217_vm7 = vcmp.lt.s32.totalorder %v3040_v42, 3  ;;  %1811 = vrot.lane.b32.xlu0 %v2779_v48, %s2682_s19  ;;  %s4269_s27 = sld [smem:[#allocation4 + $0x4b]]  ;;  %s4566_s19 = sld [smem:[#allocation4 + $0x56]] }
 0x170   : > { %v943_v50 = vmul.f32 %v5114_v37, %v930_v34  ;;  %v944_v28 = vmul.f32 %v5115_v40, %v931_v18  ;;  %v1042_v17 = vmul.f32 %v5116_v14, %v1035_v21  ;;  %v5117_v13 = vmov %v5116_v14 }
 0x171   : > { %v1043_v3 = vmul.f32 %v5117_v13, %v1034_v0  ;;  %v5118_v7 = vstv %s3173_s17  ;;  %v1072_v23 = vsel %vm1065_vm4, %v3712_v24, %v3698_v20  ;;  %v1073_v32 = vsel %vm1065_vm4, %v3698_v20, %v3712_v24  ;;  %v4054_v20 = vld [vmem:[%s4827_s2 + $0x31] ss:$8 sm:$0x3]  ;;  %s2684_s17 = smov 95  }
 0x172   : > { %v1001_v54 = vmul.f32 %v5118_v7, %v991_v1  ;;  %v5119_v33 = vmov %v5118_v7  ;;  %v5121_v22 = vrot.slane %v5120_v59, %v2771_v45  ;;  %v5122_v18 = vrot.slane %v5120_v59, %v2773_v46  ;;  %v1223_v1 = vpop.permute.xlu1 %1222  ;;  %1844 = vrot.lane.b32.xlu1 %v2803_v52, %s2683_s21 }
 0x173   : > { %v1002_v31 = vmul.f32 %v5119_v33, %v990_v57  ;;  %v5123_v12 = vstv %s3206_s22  ;;  %v945_v37 = vadd.f32 %v943_v50, %v869_v16  ;;  %v946_v40 = vadd.f32 %v944_v28, %v870_v55  ;;  %v5129_v16 = vld [vmem:[#allocation45_spill] sm:$0xff]  ;;  %1842 = vrot.lane.b32.xlu0 %v2797_v51, %s2683_s21  ;;  %s4263_s22 = sld [smem:[#allocation4 + $0x1a]] }
 0x174   : > { %v981_v34 = vmul.f32 %v5121_v22, %v968_v61  ;;  %v982_v25 = vmul.f32 %v5122_v18, %v969_v26  ;;  %v1039_v44 = vmul.f32 %v5123_v12, %v1029_v29  ;;  %v5124_v0 = vmov %v5123_v12 }
 0x175   : > { %v1040_v21 = vmul.f32 %v5124_v0, %v1028_v53  ;;  %v1006_v24 = vadd.f32 %v1004_v30, %v1001_v54  ;;  %v1007_v57 = vadd.f32 %v1005_v5, %v1002_v31  ;;  %v1066_v61 = vsel %vm1065_vm4, %v3662_v11, %v3653_v62  ;;  %v1221_v5 = vpop.permute.xlu0 %1220 }
 0x176   : > { %v1067_v26 = vsel %vm1065_vm4, %v3653_v62, %v3662_v11  ;;  %v1044_v35 = vadd.f32 %v1042_v17, %v1039_v44  ;;  %v5125_v53 = vstv %s3294_s24  ;;  %vm1179_vm8 = vcmp.lt.s32.totalorder %v3040_v42, 13  ;;  %v4093_v31 = vpop.permute.xlu1 %1253  ;;  %1851 = vrot.lane.b32.xlu1 %v2785_v49, %s2683_s21  ;;  %s4764_s24 = sld [smem:[#allocation4 + $0x2f]] }
 0x177   : > { %v1045_v10 = vadd.f32 %v1043_v3, %v1040_v21  ;;  %v1080_v29 = vmul.f32 %v5125_v53, %v1073_v32  ;;  %v5126_v2 = vmov %v5125_v53  ;;  %v1375_v62 = vrot.slane %v4054_v20, %v2771_v45  ;;  %1849 = vrot.lane.b32.xlu0 %v2779_v48, %s2683_s21  ;;  %s4430_s21 = sld [smem:[#allocation4 + $0x50]] }
 0x178   : > { %v1081_v30 = vmul.f32 %v5126_v2, %v1072_v23  ;;  %v1379_v11 = vrot.slane %v4054_v20, %v2773_v46  ;;  %v983_v14 = vadd.f32 %v981_v34, %v907_v56  ;;  %v984_v17 = vadd.f32 %v982_v25, %v908_v60  ;;  %v5132_v23 = vld [vmem:[#allocation48_spill] sm:$0xff] }
 0x179   : > { %v5127_v13 = vstv %s3234_s25  ;;  %v5130_v55 = vrot.slane %v5129_v16, %v2771_v45  ;;  %v5131_v28 = vrot.slane %v5129_v16, %v2773_v46  ;;  %v1148_v56 = vsel %vm1141_vm5, %v3898_v38, %v3886_v4  ;;  %v4101_v12 = vpop.permute.xlu0 %1251  ;;  %s2685_s25 = smov 94  }
 0x17a   : > { %v1077_v3 = vmul.f32 %v5127_v13, %v1067_v26  ;;  %v5128_v7 = vmov %v5127_v13  ;;  %v1149_v60 = vsel %vm1141_vm5, %v3886_v4, %v3898_v38  ;;  %v5133_v32 = vrot.slane %v5132_v23, %v2771_v45  ;;  %1882 = vrot.lane.b32.xlu1 %v2803_v52, %s2684_s17 }
 0x17b   : > { %v1078_v54 = vmul.f32 %v5128_v7, %v1066_v61  ;;  %v1019_v50 = vmul.f32 %v5130_v55, %v1006_v24  ;;  %v1020_v33 = vmul.f32 %v5131_v28, %v1007_v57  ;;  %v5134_v22 = vrot.slane %v5132_v23, %v2773_v46  ;;  %1880 = vrot.lane.b32.xlu0 %v2797_v51, %s2684_s17 }
 0x17c   : > { %v1057_v59 = vmul.f32 %v5133_v32, %v1044_v35  ;;  %v1082_v18 = vadd.f32 %v1080_v29, %v1077_v3  ;;  %vm1293_vm9 = vcmp.lt.s32.totalorder %v3040_v42, 1  ;;  %v1142_v4 = vsel %vm1141_vm5, %v3863_v58, %v3853_v36  ;;  %v1261_v35 = vpop.permute.xlu1 %1260 }
 0x17d   : > { %v1058_v34 = vmul.f32 %v5134_v22, %v1045_v10  ;;  %v1083_v25 = vadd.f32 %v1081_v30, %v1078_v54  ;;  %v1143_v38 = vsel %vm1141_vm5, %v3853_v36, %v3863_v58  ;;  %v1224_v44 = vsel %vm1217_vm7, %v1221_v5, %v1223_v1 }
 0x17e   : > { %v1225_v0 = vsel %vm1217_vm7, %v1223_v1, %v1221_v5  ;;  %v1110_v21 = vsel %vm1103_vm6, %v3816_v6, %v3800_v41  ;;  %v1111_v36 = vsel %vm1103_vm6, %v3800_v41, %v3816_v6  ;;  %v5135_v58 = vstv %s3397_s26  ;;  %1889 = vrot.lane.b32.xlu1 %v2785_v49, %s2684_s17  ;;  %s2686_s26 = smov 93  }
 0x17f   : > { %v1156_v24 = vmul.f32 %v5135_v58, %v1149_v60  ;;  %v5136_v57 = vmov %v5135_v58  ;;  %v1104_v26 = vsel %vm1103_vm6, %v3768_v19, %v3752_v63  ;;  %v1105_v1 = vsel %vm1103_vm6, %v3752_v63, %v3768_v19  ;;  %v1259_v63 = vpop.permute.xlu0 %1258  ;;  %v5142_v19 = vld [vmem:[#allocation52_spill] sm:$0xff]  ;;  %1887 = vrot.lane.b32.xlu0 %v2779_v48, %s2684_s17  ;;  %s4744_s17 = sld [smem:[#allocation4 + $0x2e]] }
 0x180   : > { %v1157_v61 = vmul.f32 %v5136_v57, %v1148_v56  ;;  %v1218_v41 = vsel %vm1217_vm7, %v1214_v39, %v4013_v43  ;;  %v1219_v6 = vsel %vm1217_vm7, %v4013_v43, %v1214_v39  ;;  %v5137_v10 = vstv %s3382_s9  ;;  %s4329_s9 = sld [smem:[#allocation4 + $0x4c]] }
 0x181   : > { %v1153_v53 = vmul.f32 %v5137_v10, %v1143_v38  ;;  %v5138_v29 = vmov %v5137_v10  ;;  %v5139_v30 = vstv %s3577_s16  ;;  %vm1255_vm10 = vcmp.lt.s32.totalorder %v3040_v42, 2  ;;  %s4644_s16 = sld [smem:[#allocation4 + $0x29]] }
 0x182   : > { %v1154_v2 = vmul.f32 %v5138_v29, %v1142_v4  ;;  %v1232_v5 = vmul.f32 %v5139_v30, %v1225_v0  ;;  %v5140_v13 = vmov %v5139_v30  ;;  %v5143_v7 = vrot.slane %v5142_v19, %v2771_v45  ;;  %1920 = vrot.lane.b32.xlu1 %v2803_v52, %s2685_s25 }
 0x183   : > { %v1233_v3 = vmul.f32 %v5140_v13, %v1224_v44  ;;  %v5144_v39 = vrot.slane %v5142_v19, %v2773_v46  ;;  %v5145_v16 = vstv %s3354_s5  ;;  %v1158_v60 = vadd.f32 %v1156_v24, %v1153_v53  ;;  %v5156_v13 = vld [vmem:[#allocation61_spill] sm:$0xff]  ;;  %1918 = vrot.lane.b32.xlu0 %v2797_v51, %s2685_s25  ;;  %s4327_s5 = sld [smem:[#allocation4 + $0x1b]] }
 0x184   : > { %v1095_v43 = vmul.f32 %v5143_v7, %v1082_v18  ;;  %v1118_v55 = vmul.f32 %v5145_v16, %v1111_v36  ;;  %v5146_v28 = vmov %v5145_v16  ;;  %v1159_v23 = vadd.f32 %v1157_v61, %v1154_v2 }
 0x185   : > { %v1096_v54 = vmul.f32 %v5144_v39, %v1083_v25  ;;  %v1119_v56 = vmul.f32 %v5146_v28, %v1110_v21  ;;  %v5147_v32 = vstv %s3555_s11  ;;  %vm1352_vm11 = vcmp.lt.s32.totalorder %v3040_v42, 127  ;;  %v1292_v21 = vpop.permute.xlu1 %1291  ;;  %s4786_s11 = sld [smem:[#allocation4 + $0x61]] }
 0x186   : > { %v1229_v22 = vmul.f32 %v5147_v32, %v1219_v6  ;;  %v5148_v4 = vmov %v5147_v32  ;;  %v1021_v18 = vadd.f32 %v1019_v50, %v945_v37  ;;  %v1022_v44 = vadd.f32 %v1020_v33, %v946_v40  ;;  %v1290_v40 = vpop.permute.xlu0 %1289  ;;  %1927 = vrot.lane.b32.xlu1 %v2785_v49, %s2685_s25 }
 0x187   : > { %v1230_v38 = vmul.f32 %v5148_v4, %v1218_v41  ;;  %v5149_v25 = vstv %s5141_s29  ;;  %v1180_v24 = vsel %vm1179_vm8, %v3946_v15, %v3936_v8  ;;  %v1181_v57 = vsel %vm1179_vm8, %v3936_v8, %v3946_v15  ;;  %1925 = vrot.lane.b32.xlu0 %v2779_v48, %s2685_s25  ;;  %s4428_s29 = sld [smem:[#allocation4 + $0x1f]]  ;;  %s2691_s25 = smov 79  }
 0x188   : > { %v1115_v0 = vmul.f32 %v5149_v25, %v1105_v1  ;;  %v5150_v36 = vmov %v5149_v25  ;;  %v1234_v61 = vadd.f32 %v1232_v5, %v1229_v22  ;;  %v4182_v50 = vadd.f32 %v1057_v59, %v983_v14 }
 0x189   : > { %v1116_v58 = vmul.f32 %v5150_v36, %v1104_v26  ;;  %v1235_v37 = vadd.f32 %v1233_v3, %v1230_v38  ;;  %v4184_v33 = vadd.f32 %v1058_v34, %v984_v17  ;;  %v1097_v26 = vadd.f32 %v1095_v43, %v1021_v18  ;;  %v1299_v30 = vpop.permute.xlu1 %1298 }
 0x18a   : > { %v1098_v1 = vadd.f32 %v1096_v54, %v1022_v44  ;;  %v1120_v41 = vadd.f32 %v1118_v55, %v1115_v0  ;;  %v5152_v10 = vrot.slane %v3475_v27, %v2771_v45  ;;  %v5153_v8 = vrot.slane %v3475_v27, %v2773_v46  ;;  %v1297_v39 = vpop.permute.xlu0 %1296  ;;  %1958 = vrot.lane.b32.xlu1 %v2803_v52, %s2686_s26 }
 0x18b   : > { %v1121_v6 = vadd.f32 %v1119_v56, %v1116_v58  ;;  %v5154_v14 = vstv %s5151_s13  ;;  %v1294_v29 = vsel %vm1293_vm9, %v1290_v40, %v1292_v21  ;;  %v1295_v2 = vsel %vm1293_vm9, %v1292_v21, %v1290_v40  ;;  %1956 = vrot.lane.b32.xlu0 %v2797_v51, %s2686_s26  ;;  %s2690_s13 = smov 80  }
 0x18c   : > { %v1171_v53 = vmul.f32 %v5152_v10, %v1158_v60  ;;  %v1172_v15 = vmul.f32 %v5153_v8, %v1159_v23  ;;  %v1191_v59 = vmul.f32 %v5154_v14, %v1181_v57  ;;  %v5155_v17 = vmov %v5154_v14 }
 0x18d   : > { %v1192_v34 = vmul.f32 %v5155_v17, %v1180_v24  ;;  %v1186_v27 = vsel %vm1179_vm8, %v3980_v9, %v3966_v47  ;;  %v1187_v5 = vsel %vm1179_vm8, %v3966_v47, %v3980_v9  ;;  %v5157_v3 = vrot.slane %v5156_v13, %v2771_v45  ;;  %v1351_v0 = vpop.permute.xlu1 %1350 }
 0x18e   : > { %v5158_v7 = vrot.slane %v5156_v13, %v2773_v46  ;;  %v1262_v54 = vsel %vm1255_vm10, %v1259_v63, %v1261_v35  ;;  %v1263_v16 = vsel %vm1255_vm10, %v1261_v35, %v1259_v63  ;;  %v1300_v47 = vsel %vm1293_vm9, %v1297_v39, %v1299_v30  ;;  %v1349_v57 = vpop.permute.xlu0 %1348  ;;  %1965 = vrot.lane.b32.xlu1 %v2785_v49, %s2686_s26 }
 0x18f   : > { %v1247_v19 = vmul.f32 %v5157_v3, %v1234_v61  ;;  %v1301_v9 = vsel %vm1293_vm9, %v1299_v30, %v1297_v39  ;;  %v5160_v55 = vstv %s3618_s12  ;;  %v5162_v23 = vstv %s3646_s14  ;;  %1963 = vrot.lane.b32.xlu0 %v2779_v48, %s2686_s26  ;;  %s2687_s12 = smov 83   ;;  %s2692_s26 = smov 78  }
 0x190   : > { %v1248_v43 = vmul.f32 %v5158_v7, %v1235_v37  ;;  %v1305_v28 = vmul.f32 %v5160_v55, %v1295_v2  ;;  %v5161_v56 = vmov %v5160_v55  ;;  %v1308_v32 = vmul.f32 %v5162_v23, %v1301_v9  ;;  %s4664_s14 = sld [smem:[#allocation4 + $0x2a]] }
 0x191   : > { %v1306_v60 = vmul.f32 %v5161_v56, %v1294_v29  ;;  %v5163_v22 = vmov %v5162_v23  ;;  %vm1390_vm12 = vcmp.lt.s32.totalorder %v3040_v42, 126  ;;  %v1173_v35 = vadd.f32 %v1171_v53, %v1097_v26  ;;  %v1358_v3 = vpop.permute.xlu1 %1357 }
 0x192   : > { %v1309_v4 = vmul.f32 %v5163_v22, %v1300_v47  ;;  %v1174_v63 = vadd.f32 %v1172_v15, %v1098_v1  ;;  %v5164_v38 = vstv %s5159_s15  ;;  %v1256_v36 = vsel %vm1255_vm10, %v4101_v12, %v4093_v31  ;;  %1996 = vrot.lane.b32.xlu1 %v2803_v52, %s2687_s12  ;;  %s4586_s15 = sld [smem:[#allocation4 + $0x57]] }
 0x193   : > { %v1194_v18 = vmul.f32 %v5164_v38, %v1187_v5  ;;  %v5165_v44 = vmov %v5164_v38  ;;  %v1257_v58 = vsel %vm1255_vm10, %v4093_v31, %v4101_v12  ;;  %v1310_v21 = vadd.f32 %v1308_v32, %v1305_v28  ;;  %v5168_v31 = vld [vmem:[#allocation63_spill] sm:$0xff]  ;;  %1994 = vrot.lane.b32.xlu0 %v2797_v51, %s2687_s12 }
 0x194   : > { %v1195_v25 = vmul.f32 %v5165_v44, %v1186_v27  ;;  %v1311_v24 = vadd.f32 %v1309_v4, %v1306_v60  ;;  %v5166_v61 = vstv %s3594_s7  ;;  %v1353_v1 = vsel %vm1352_vm11, %v1349_v57, %v1351_v0  ;;  %s4356_s7 = sld [smem:[#allocation4 + $0x4d]] }
 0x195   : > { %v1270_v37 = vmul.f32 %v5166_v61, %v1263_v16  ;;  %v5167_v40 = vmov %v5166_v61  ;;  %v1354_v10 = vsel %vm1352_vm11, %v1351_v0, %v1349_v57  ;;  %v1249_v53 = vadd.f32 %v1247_v19, %v1173_v35  ;;  %v5173_v19 = vld [vmem:[#allocation57_spill] sm:$0xff]  ;;  %v1356_v16 = vpop.permute.xlu0 %1355  ;;  %v5180_v35 = vld [vmem:[#allocation60_spill] sm:$0xff] }
 0x196   : > { %v1271_v26 = vmul.f32 %v5167_v40, %v1262_v54  ;;  %v1250_v8 = vadd.f32 %v1248_v43, %v1174_v63  ;;  %v5169_v12 = vrot.slane %v5168_v31, %v2771_v45  ;;  %v5170_v14 = vrot.slane %v5168_v31, %v2773_v46  ;;  %v5183_v0 = vld [vmem:[#allocation12_spill] sm:$0xff]  ;;  %v5184_v40 = vld [vmem:[#allocation62_spill] sm:$0xff]  ;;  %2003 = vrot.lane.b32.xlu1 %v2785_v49, %s2687_s12 }
 0x197   : > { %v1196_v29 = vadd.f32 %v1194_v18, %v1191_v59  ;;  %v1197_v2 = vadd.f32 %v1195_v25, %v1192_v34  ;;  %v5171_v30 = vstv %s3592_s30  ;;  %v5174_v7 = vrot.slane %v5173_v19, %v2771_v45  ;;  %v1389_v25 = vpop.permute.xlu1 %1388  ;;  %s4354_s30 = sld [smem:[#allocation4 + $0x1c]]  ;;  %2001 = vrot.lane.b32.xlu0 %v2779_v48, %s2687_s12  ;;  %s2693_s12 = smov 77  }
 0x198   : > { %v1323_v15 = vmul.f32 %v5169_v12, %v1310_v21  ;;  %v1324_v17 = vmul.f32 %v5170_v14, %v1311_v24  ;;  %v1267_v27 = vmul.f32 %v5171_v30, %v1257_v58  ;;  %v5172_v5 = vmov %v5171_v30 }
 0x199   : > { %v1268_v13 = vmul.f32 %v5172_v5, %v1256_v36  ;;  %v1133_v43 = vmul.f32 %v5174_v7, %v1120_v41  ;;  %v5175_v39 = vrot.slane %v5173_v19, %v2773_v46  ;;  %v1359_v55 = vsel %vm1352_vm11, %v1356_v16, %v1358_v3  ;;  %v1387_v61 = vpop.permute.xlu0 %1386 }
 0x19a   : > { %v1325_v34 = vadd.f32 %v1323_v15, %v1249_v53  ;;  %v1326_v54 = vadd.f32 %v1324_v17, %v1250_v8  ;;  %v1272_v47 = vadd.f32 %v1270_v37, %v1267_v27  ;;  %v1360_v28 = vsel %vm1352_vm11, %v1358_v3, %v1356_v16  ;;  %v2511_v37 = vld [vmem:[%s4827_s2 + $0x32] ss:$8 sm:$0x3] }
 0x19b   : > { %v1134_v59 = vmul.f32 %v5175_v39, %v1121_v6  ;;  %v1273_v9 = vadd.f32 %v1271_v26, %v1268_v13  ;;  %v5176_v56 = vstv %s3678_s20  ;;  %v5178_v32 = vstv %s3802_s10  ;;  %s2688_s10 = smov 82   ;;  %s4766_s20 = sld [smem:[#allocation4 + $0x60]] }
 0x19c   : > { %v1364_v41 = vmul.f32 %v5176_v56, %v1353_v1  ;;  %v5177_v60 = vmov %v5176_v56  ;;  %v1367_v6 = vmul.f32 %v5178_v32, %v1359_v55  ;;  %v5179_v22 = vmov %v5178_v32  ;;  %2034 = vrot.lane.b32.xlu1 %v2803_v52, %s2688_s10  ;;  %2032 = vrot.lane.b32.xlu0 %v2797_v51, %s2688_s10 }
 0x19d   : > { %v1365_v23 = vmul.f32 %v5177_v60, %v1354_v10  ;;  %v1368_v4 = vmul.f32 %v5179_v22, %v1360_v28  ;;  %v5181_v63 = vrot.slane %v5180_v35, %v2771_v45  ;;  %v5182_v18 = vrot.slane %v5180_v35, %v2773_v46  ;;  %v1394_v27 = vpop.permute.xlu0 %1393  ;;  %v2512_v28 = vld [vmem:[%s4827_s2 + $0x33] ss:$8 sm:$0x3] }
 0x19e   : > { %v1339_v36 = vrot.slane %v5183_v0, %v2771_v45  ;;  %v1135_v58 = vadd.f32 %v1133_v43, %v4182_v50  ;;  %v1136_v21 = vadd.f32 %v1134_v59, %v4184_v33  ;;  %v1369_v24 = vadd.f32 %v1367_v6, %v1364_v41 }
 0x19f   : > { %v1209_v38 = vmul.f32 %v5181_v63, %v1196_v29  ;;  %v1210_v44 = vmul.f32 %v5182_v18, %v1197_v2  ;;  %v1370_v57 = vadd.f32 %v1368_v4, %v1365_v23  ;;  %v5185_v26 = vrot.slane %v5184_v40, %v2771_v45  ;;  %v1396_v29 = vpop.permute.xlu1 %1395 }
 0x1a0   : > { %v5186_v10 = vrot.slane %v5184_v40, %v2773_v46  ;;  %v1391_v50 = vsel %vm1390_vm12, %v1387_v61, %v1389_v25  ;;  %v1392_v33 = vsel %vm1390_vm12, %v1389_v25, %v1387_v61  ;;  %v1382_v8 = vmul.f32 %v1375_v62, %v1369_v24  ;;  %2041 = vrot.lane.b32.xlu1 %v2785_v49, %s2688_s10 }
 0x1a1   : > { %v1285_v1 = vmul.f32 %v5185_v26, %v1272_v47  ;;  %v1383_v31 = vmul.f32 %v1379_v11, %v1370_v57  ;;  %v1401_v12 = vstv %s4263_s22  ;;  %v1343_v15 = vrot.slane %v5183_v0, %v2773_v46  ;;  %v1425_v47 = vpop.permute.xlu0 %1424  ;;  %2039 = vrot.lane.b32.xlu0 %v2779_v48, %s2688_s10  ;;  %s4452_s22 = sld [smem:[#allocation4 + $0x20]]  ;;  %s4684_s10 = sld [smem:[#allocation4 + $0x2b]] }
 0x1a2   : > { %v1286_v53 = vmul.f32 %v5186_v10, %v1273_v9  ;;  %v1211_v14 = vadd.f32 %v1209_v38, %v1135_v58  ;;  %v1212_v17 = vadd.f32 %v1210_v44, %v1136_v21  ;;  %v1404_v2 = vstv %s4269_s27  ;;  %s4454_s27 = sld [smem:[#allocation4 + $0x51]] }
 0x1a3   : > { %v1413_v30 = vrot.slane %v2511_v37, %v2771_v45  ;;  %v4331_v62 = vadd.f32 %v1382_v8, %v1325_v34  ;;  %v4333_v20 = vadd.f32 %v1383_v31, %v1326_v54  ;;  %v1417_v11 = vrot.slane %v2511_v37, %v2773_v46  ;;  %v1427_v34 = vpop.permute.xlu1 %1426 }
 0x1a4   : > { %vm1428_vm13 = vcmp.lt.s32.totalorder %v3040_v42, 125  ;;  %v1287_v5 = vadd.f32 %v1285_v1, %v1211_v14  ;;  %v1288_v13 = vadd.f32 %v1286_v53, %v1212_v17  ;;  %v1397_v3 = vsel %vm1390_vm12, %v1394_v27, %v1396_v29  ;;  %v2513_v1 = vld [vmem:[%s4827_s2 + $0x34] ss:$8 sm:$0x3]  ;;  %2072 = vrot.lane.b32.xlu1 %v2803_v52, %s2689_s4 }
 0x1a5   : > { %v1398_v19 = vsel %vm1390_vm12, %v1396_v29, %v1394_v27  ;;  %v1402_v7 = vmul.f32 %v1401_v12, %v1391_v50  ;;  %v1403_v43 = vmul.f32 %v1401_v12, %v1392_v33  ;;  %v1405_v39 = vmul.f32 %v1404_v2, %v1397_v3  ;;  %v1432_v38 = vpop.permute.xlu0 %1431  ;;  %2070 = vrot.lane.b32.xlu0 %v2797_v51, %s2689_s4 }
 0x1a6   : > { %v1406_v59 = vmul.f32 %v1404_v2, %v1398_v19  ;;  %v1429_v9 = vsel %vm1428_vm13, %v1425_v47, %v1427_v34  ;;  %v1430_v55 = vsel %vm1428_vm13, %v1427_v34, %v1425_v47  ;;  %v1346_v56 = vadd.f32 %v1339_v36, %v1287_v5 }
 0x1a7   : > { %v1407_v54 = vadd.f32 %v1405_v39, %v1402_v7  ;;  %v1347_v41 = vadd.f32 %v1343_v15, %v1288_v13  ;;  %v1439_v32 = vstv %s4327_s5  ;;  %v1434_v6 = vpop.permute.xlu1 %1433  ;;  %v1442_v22 = vstv %s4329_s9  ;;  %s4476_s5 = sld [smem:[#allocation4 + $0x21]]  ;;  %s4478_s9 = sld [smem:[#allocation4 + $0x52]] }
 0x1a8   : > { %v1408_v16 = vadd.f32 %v1406_v59, %v1403_v43  ;;  %v1451_v63 = vrot.slane %v2512_v28, %v2771_v45  ;;  %v1455_v18 = vrot.slane %v2512_v28, %v2773_v46  ;;  %v1435_v44 = vsel %vm1428_vm13, %v1432_v38, %v1434_v6  ;;  %v2514_v43 = vld [vmem:[%s4827_s2 + $0x35] ss:$8 sm:$0x3]  ;;  %2079 = vrot.lane.b32.xlu1 %v2785_v49, %s2689_s4 }
 0x1a9   : > { %v1420_v60 = vmul.f32 %v1413_v30, %v1407_v54  ;;  %v1436_v25 = vsel %vm1428_vm13, %v1434_v6, %v1432_v38  ;;  %vm1466_vm14 = vcmp.lt.s32.totalorder %v3040_v42, 115  ;;  %v1440_v0 = vmul.f32 %v1439_v32, %v1429_v9  ;;  %v1463_v37 = vpop.permute.xlu0 %1462  ;;  %2077 = vrot.lane.b32.xlu0 %v2779_v48, %s2689_s4  ;;  %s4706_s4 = sld [smem:[#allocation4 + $0x5d]] }
 0x1aa   : > { %v1421_v23 = vmul.f32 %v1417_v11, %v1408_v16  ;;  %v1441_v36 = vmul.f32 %v1439_v32, %v1430_v55  ;;  %v1443_v58 = vmul.f32 %v1442_v22, %v1435_v44  ;;  %v1444_v21 = vmul.f32 %v1442_v22, %v1436_v25  ;;  %v2515_v25 = vld [vmem:[%s4827_s2 + $0x36] ss:$8 sm:$0x3] }
 0x1ab   : > { %v1422_v4 = vadd.f32 %v1420_v60, %v1346_v56  ;;  %v1465_v24 = vpop.permute.xlu1 %1464  ;;  %v1477_v50 = vstv %s4354_s30  ;;  %v1480_v8 = vstv %s4356_s7  ;;  %v1489_v15 = vrot.slane %v2513_v1, %v2771_v45  ;;  %s4500_s30 = sld [smem:[#allocation4 + $0x22]]  ;;  %s4502_s7 = sld [smem:[#allocation4 + $0x53]] }
 0x1ac   : > { %v1423_v35 = vadd.f32 %v1421_v23, %v1347_v41  ;;  %v1445_v57 = vadd.f32 %v1443_v58, %v1440_v0  ;;  %v1446_v61 = vadd.f32 %v1444_v21, %v1441_v36  ;;  %v1467_v40 = vsel %vm1466_vm14, %v1463_v37, %v1465_v24  ;;  %2110 = vrot.lane.b32.xlu1 %v2803_v52, %s2690_s13 }
 0x1ad   : > { %v1468_v26 = vsel %vm1466_vm14, %v1465_v24, %v1463_v37  ;;  %v1470_v14 = vpop.permute.xlu0 %1469  ;;  %v1493_v17 = vrot.slane %v2513_v1, %v2773_v46  ;;  %vm1504_vm15 = vcmp.lt.s32.totalorder %v3040_v42, 114  ;;  %v1478_v30 = vmul.f32 %v1477_v50, %v1467_v40  ;;  %2108 = vrot.lane.b32.xlu0 %v2797_v51, %s2690_s13 }
 0x1ae   : > { %v1458_v10 = vmul.f32 %v1451_v63, %v1445_v57  ;;  %v1459_v53 = vmul.f32 %v1455_v18, %v1446_v61  ;;  %v1515_v34 = vstv %s4378_s1  ;;  %v1518_v16 = vstv %s4380_s23  ;;  %s4524_s1 = sld [smem:[#allocation4 + $0x23]]  ;;  %s4526_s23 = sld [smem:[#allocation4 + $0x54]] }
 0x1af   : > { %v1472_v33 = vpop.permute.xlu1 %1471  ;;  %v1527_v55 = vrot.slane %v2514_v43, %v2771_v45  ;;  %v1531_v56 = vrot.slane %v2514_v43, %v2773_v46  ;;  %vm1542_vm0 = vcmp.lt.s32.totalorder %v3040_v42, 113  ;;  %v1553_v58 = vstv %s4404_s0  ;;  %s4546_s0 = sld [smem:[#allocation4 + $0x55]] }
 0x1b0   : > { %v1460_v31 = vadd.f32 %v1458_v10, %v4331_v62  ;;  %v1461_v12 = vadd.f32 %v1459_v53, %v4333_v20  ;;  %v1473_v29 = vsel %vm1466_vm14, %v1470_v14, %v1472_v33  ;;  %v1474_v2 = vsel %vm1466_vm14, %v1472_v33, %v1470_v14  ;;  %2117 = vrot.lane.b32.xlu1 %v2785_v49, %s2690_s13 }
 0x1b1   : > { %v1479_v62 = vmul.f32 %v1477_v50, %v1468_v26  ;;  %v1481_v20 = vmul.f32 %v1480_v8, %v1473_v29  ;;  %v1482_v11 = vmul.f32 %v1480_v8, %v1474_v2  ;;  %v1501_v3 = vpop.permute.xlu0 %1500  ;;  %v1556_v24 = vstv %s4406_s3  ;;  %v2516_v2 = vld [vmem:[%s4827_s2 + $0x37] ss:$8 sm:$0x3]  ;;  %2115 = vrot.lane.b32.xlu0 %v2779_v48, %s2690_s13  ;;  %s4584_s13 = sld [smem:[#allocation4 + $0x26]]  ;;  %s4704_s3 = sld [smem:[#allocation4 + $0x2c]] }
 0x1b2   : > { %v1565_v37 = vrot.slane %v2515_v25, %v2771_v45  ;;  %v1569_v26 = vrot.slane %v2515_v25, %v2773_v46  ;;  %vm1580_vm2 = vcmp.lt.s32.totalorder %v3040_v42, 112  ;;  %vm1618_vm3 = vcmp.lt.s32.totalorder %v3040_v42, 111 }
 0x1b3   : > { %v1503_v27 = vpop.permute.xlu1 %1502  ;;  %v1483_v5 = vadd.f32 %v1481_v20, %v1478_v30  ;;  %v1484_v13 = vadd.f32 %v1482_v11, %v1479_v62  ;;  %v1591_v20 = vstv %s4428_s29  ;;  %vm1656_vm4 = vcmp.lt.s32.totalorder %v3040_v42, 110  ;;  %s4724_s29 = sld [smem:[#allocation4 + $0x2d]] }
 0x1b4   : > { %v1505_v19 = vsel %vm1504_vm15, %v1501_v3, %v1503_v27  ;;  %v1506_v7 = vsel %vm1504_vm15, %v1503_v27, %v1501_v3  ;;  %v1594_v27 = vstv %s4430_s21  ;;  %v1603_v3 = vrot.slane %v2516_v2, %v2771_v45  ;;  %2148 = vrot.lane.b32.xlu1 %v2803_v52, %s2691_s25  ;;  %s4726_s21 = sld [smem:[#allocation4 + $0x5e]] }
 0x1b5   : > { %v1496_v39 = vmul.f32 %v1489_v15, %v1483_v5  ;;  %v1497_v59 = vmul.f32 %v1493_v17, %v1484_v13  ;;  %v1508_v28 = vpop.permute.xlu0 %1507  ;;  %v1516_v23 = vmul.f32 %v1515_v34, %v1505_v19  ;;  %v1517_v32 = vmul.f32 %v1515_v34, %v1506_v7  ;;  %2146 = vrot.lane.b32.xlu0 %v2797_v51, %s2691_s25 }
 0x1b6   : > { %v1607_v7 = vrot.slane %v2516_v2, %v2773_v46  ;;  %vm1694_vm5 = vcmp.lt.s32.totalorder %v3040_v42, 109  ;;  %vm1732_vm6 = vcmp.lt.s32.totalorder %v3040_v42, 99  ;;  %vm1770_vm7 = vcmp.lt.s32.totalorder %v3040_v42, 98 }
 0x1b7   : > { %v1510_v54 = vpop.permute.xlu1 %1509  ;;  %v1498_v47 = vadd.f32 %v1496_v39, %v1422_v4  ;;  %v1499_v9 = vadd.f32 %v1497_v59, %v1423_v35  ;;  %vm1808_vm8 = vcmp.lt.s32.totalorder %v3040_v42, 97  ;;  %vm1846_vm9 = vcmp.lt.s32.totalorder %v3040_v42, 96 }
 0x1b8   : > { %v1511_v41 = vsel %vm1504_vm15, %v1508_v28, %v1510_v54  ;;  %v1512_v60 = vsel %vm1504_vm15, %v1510_v54, %v1508_v28  ;;  %2155 = vrot.lane.b32.xlu1 %v2785_v49, %s2691_s25  ;;  %vm1884_vm10 = vcmp.lt.s32.totalorder %v3040_v42, 95  ;;  %vm1922_vm11 = vcmp.lt.s32.totalorder %v3040_v42, 94 }
 0x1b9   : > { %v1519_v6 = vmul.f32 %v1518_v16, %v1511_v41  ;;  %v1520_v22 = vmul.f32 %v1518_v16, %v1512_v60  ;;  %v1539_v38 = vpop.permute.xlu0 %1538  ;;  %v2517_v60 = vld [vmem:[%s4827_s2 + $0x40] ss:$8 sm:$0x3]  ;;  %2153 = vrot.lane.b32.xlu0 %v2779_v48, %s2691_s25  ;;  %s4606_s25 = sld [smem:[#allocation4 + $0x58]]  ;;  %vm1960_vm12 = vcmp.lt.s32.totalorder %v3040_v42, 93  ;;  %vm1998_vm13 = vcmp.lt.s32.totalorder %v3040_v42, 83 }
 0x1ba   : > { %vm2036_vm14 = vcmp.lt.s32.totalorder %v3040_v42, 82  ;;  %vm2074_vm15 = vcmp.lt.s32.totalorder %v3040_v42, 81 }
 0x1bb   : > { %v1541_v4 = vpop.permute.xlu1 %1540  ;;  %v1521_v35 = vadd.f32 %v1519_v6, %v1516_v23  ;;  %v1522_v63 = vadd.f32 %v1520_v22, %v1517_v32  ;;  %v1629_v6 = vstv %s4452_s22  ;;  %s4746_s22 = sld [smem:[#allocation4 + $0x5f]] }
 0x1bc   : > { %v1543_v18 = vsel %vm1542_vm0, %v1539_v38, %v1541_v4  ;;  %v1544_v44 = vsel %vm1542_vm0, %v1541_v4, %v1539_v38  ;;  %v1632_v4 = vstv %s4454_s27  ;;  %v1641_v38 = vrot.slane %v2517_v60, %v2771_v45  ;;  %2186 = vrot.lane.b32.xlu1 %v2803_v52, %s2692_s26  ;;  %s4604_s27 = sld [smem:[#allocation4 + $0x27]] }
 0x1bd   : > { %v1534_v0 = vmul.f32 %v1527_v55, %v1521_v35  ;;  %v1535_v36 = vmul.f32 %v1531_v56, %v1522_v63  ;;  %v1546_v40 = vpop.permute.xlu0 %1545  ;;  %v1554_v53 = vmul.f32 %v1553_v58, %v1543_v18  ;;  %v1555_v50 = vmul.f32 %v1553_v58, %v1544_v44  ;;  %2184 = vrot.lane.b32.xlu0 %v2797_v51, %s2692_s26 }
 0x1be   : > { %v1645_v44 = vrot.slane %v2517_v60, %v2773_v46 }
 0x1bf   : > { %v1548_v21 = vpop.permute.xlu1 %1547  ;;  %v1536_v57 = vadd.f32 %v1534_v0, %v1460_v31  ;;  %v1537_v61 = vadd.f32 %v1535_v36, %v1461_v12 }
 0x1c0   : > { %v1549_v1 = vsel %vm1542_vm0, %v1546_v40, %v1548_v21  ;;  %v1550_v10 = vsel %vm1542_vm0, %v1548_v21, %v1546_v40  ;;  %2193 = vrot.lane.b32.xlu1 %v2785_v49, %s2692_s26  ;;  %vm2112_vm0 = vcmp.lt.s32.totalorder %v3040_v42, 80 }
 0x1c1   : > { %v1557_v33 = vmul.f32 %v1556_v24, %v1549_v1  ;;  %v1558_v8 = vmul.f32 %v1556_v24, %v1550_v10  ;;  %v1577_v14 = vpop.permute.xlu0 %1576  ;;  %v2518_v10 = vld [vmem:[%s4827_s2 + $0x41] ss:$8 sm:$0x3]  ;;  %2191 = vrot.lane.b32.xlu0 %v2779_v48, %s2692_s26  ;;  %s4784_s26 = sld [smem:[#allocation4 + $0x30]] }
 0x1c3   : > { %v1579_v31 = vpop.permute.xlu1 %1578  ;;  %v1559_v12 = vadd.f32 %v1557_v33, %v1554_v53  ;;  %v1560_v15 = vadd.f32 %v1558_v8, %v1555_v50  ;;  %v1667_v33 = vstv %s4476_s5  ;;  %s4624_s5 = sld [smem:[#allocation4 + $0x28]] }
 0x1c4   : > { %v1581_v17 = vsel %vm1580_vm2, %v1577_v14, %v1579_v31  ;;  %v1582_v29 = vsel %vm1580_vm2, %v1579_v31, %v1577_v14  ;;  %v1670_v31 = vstv %s4478_s9  ;;  %v1679_v14 = vrot.slane %v2518_v10, %v2771_v45  ;;  %2224 = vrot.lane.b32.xlu1 %v2803_v52, %s2693_s12  ;;  %s4626_s9 = sld [smem:[#allocation4 + $0x59]] }
 0x1c5   : > { %v1572_v30 = vmul.f32 %v1565_v37, %v1559_v12  ;;  %v1573_v62 = vmul.f32 %v1569_v26, %v1560_v15  ;;  %v1584_v19 = vpop.permute.xlu0 %1583  ;;  %v1592_v59 = vmul.f32 %v1591_v20, %v1581_v17  ;;  %v1593_v34 = vmul.f32 %v1591_v20, %v1582_v29  ;;  %2222 = vrot.lane.b32.xlu0 %v2797_v51, %s2693_s12 }
 0x1c6   : > { %v1683_v29 = vrot.slane %v2518_v10, %v2773_v46  ;;  %v1705_v51 = vstv %s4500_s30  ;;  %s4646_s30 = sld [smem:[#allocation4 + $0x5a]] }
 0x1c7   : > { %v1586_v11 = vpop.permute.xlu1 %1585  ;;  %v1574_v5 = vadd.f32 %v1572_v30, %v1498_v47  ;;  %v1575_v13 = vadd.f32 %v1573_v62, %v1499_v9 }
 0x1c8   : > { %v1587_v43 = vsel %vm1580_vm2, %v1584_v19, %v1586_v11  ;;  %v1588_v39 = vsel %vm1580_vm2, %v1586_v11, %v1584_v19  ;;  %2231 = vrot.lane.b32.xlu1 %v2785_v49, %s2693_s12  ;;  %vm2150_vm2 = vcmp.lt.s32.totalorder %v3040_v42, 79 }
 0x1c9   : > { %v1595_v54 = vmul.f32 %v1594_v27, %v1587_v43  ;;  %v1596_v16 = vmul.f32 %v1594_v27, %v1588_v39  ;;  %v1615_v28 = vpop.permute.xlu0 %1614  ;;  %v2519_v43 = vld [vmem:[%s4827_s2 + $0x42] ss:$8 sm:$0x3]  ;;  %2229 = vrot.lane.b32.xlu0 %v2779_v48, %s2693_s12  ;;  %s5187_s12 = sld [smem:[#allocation9_spill]] }
 0x1cb   : > { %v1617_v47 = vpop.permute.xlu1 %1616  ;;  %v1597_v9 = vadd.f32 %v1595_v54, %v1592_v59  ;;  %v1598_v55 = vadd.f32 %v1596_v16, %v1593_v34  ;;  %v1708_v54 = vstv %s4502_s7  ;;  %s311_s7 = sld [smem:[#allocation3]] }
 0x1cc   : > { %v1619_v56 = vsel %vm1618_vm3, %v1615_v28, %v1617_v47  ;;  %v1620_v41 = vsel %vm1618_vm3, %v1617_v47, %v1615_v28 }
 0x1cd   : > { %v1610_v23 = vmul.f32 %v1603_v3, %v1597_v9  ;;  %v1611_v32 = vmul.f32 %v1607_v7, %v1598_v55  ;;  %v1622_v18 = vpop.permute.xlu0 %1621  ;;  %v1630_v36 = vmul.f32 %v1629_v6, %v1619_v56  ;;  %v1631_v58 = vmul.f32 %v1629_v6, %v1620_v41 }
 0x1ce   : > { %v1717_v9 = vrot.slane %v2519_v43, %v2771_v45  ;;  %v1721_v55 = vrot.slane %v2519_v43, %v2773_v46 }
 0x1cf   : > { %v1624_v22 = vpop.permute.xlu1 %1623  ;;  %v1612_v35 = vadd.f32 %v1610_v23, %v1536_v57  ;;  %v1613_v63 = vadd.f32 %v1611_v32, %v1537_v61 }
 0x1d0   : > { %v1625_v25 = vsel %vm1618_vm3, %v1622_v18, %v1624_v22  ;;  %v1626_v0 = vsel %vm1618_vm3, %v1624_v22, %v1622_v18  ;;  %vm2188_vm3 = vcmp.lt.s32.totalorder %v3040_v42, 78 }
 0x1d1   : > { %v1633_v21 = vmul.f32 %v1632_v4, %v1625_v25  ;;  %v1634_v24 = vmul.f32 %v1632_v4, %v1626_v0  ;;  %v1653_v40 = vpop.permute.xlu0 %1652  ;;  %v1743_v25 = vstv %s4524_s1 }
 0x1d3   : > { %v1655_v57 = vpop.permute.xlu1 %1654  ;;  %v1635_v61 = vadd.f32 %v1633_v21, %v1630_v36  ;;  %v1636_v37 = vadd.f32 %v1634_v24, %v1631_v58  ;;  %v1746_v36 = vstv %s4526_s23 }
 0x1d4   : > { %v1657_v26 = vsel %vm1656_vm4, %v1653_v40, %v1655_v57  ;;  %v1658_v1 = vsel %vm1656_vm4, %v1655_v57, %v1653_v40 }
 0x1d5   : > { %v1648_v53 = vmul.f32 %v1641_v38, %v1635_v61  ;;  %v1649_v50 = vmul.f32 %v1645_v44, %v1636_v37  ;;  %v1660_v17 = vpop.permute.xlu0 %1659  ;;  %v1668_v62 = vmul.f32 %v1667_v33, %v1657_v26  ;;  %v1669_v20 = vmul.f32 %v1667_v33, %v1658_v1  ;;  %v2520_v38 = vld [vmem:[%s4827_s2 + $0x43] ss:$8 sm:$0x3] }
 0x1d6   : > { %v1755_v24 = vrot.slane %v2520_v38, %v2771_v45  ;;  %v1759_v61 = vrot.slane %v2520_v38, %v2773_v46 }
 0x1d7   : > { %v1662_v8 = vpop.permute.xlu1 %1661  ;;  %v1650_v12 = vadd.f32 %v1648_v53, %v1574_v5  ;;  %v1651_v15 = vadd.f32 %v1649_v50, %v1575_v13 }
 0x1d8   : > { %v1663_v2 = vsel %vm1656_vm4, %v1660_v17, %v1662_v8  ;;  %v1664_v30 = vsel %vm1656_vm4, %v1662_v8, %v1660_v17  ;;  %vm2226_vm4 = vcmp.lt.s32.totalorder %v3040_v42, 77 }
 0x1d9   : > { %v1671_v11 = vmul.f32 %v1670_v31, %v1663_v2  ;;  %v1672_v27 = vmul.f32 %v1670_v31, %v1664_v30  ;;  %v1691_v19 = vpop.permute.xlu0 %1690  ;;  %v1781_v2 = vstv %s4544_s6 }
 0x1db   : > { %v1693_v5 = vpop.permute.xlu1 %1692  ;;  %v1673_v13 = vadd.f32 %v1671_v11, %v1668_v62  ;;  %v1674_v3 = vadd.f32 %v1672_v27, %v1669_v20  ;;  %v1784_v62 = vstv %s4546_s0 }
 0x1dc   : > { %v1695_v7 = vsel %vm1694_vm5, %v1691_v19, %v1693_v5  ;;  %v1696_v52 = vsel %vm1694_vm5, %v1693_v5, %v1691_v19 }
 0x1dd   : > { %v1686_v39 = vmul.f32 %v1679_v14, %v1673_v13  ;;  %v1687_v59 = vmul.f32 %v1683_v29, %v1674_v3  ;;  %v1698_v49 = vpop.permute.xlu0 %1697  ;;  %v1706_v56 = vmul.f32 %v1705_v51, %v1695_v7  ;;  %v1707_v41 = vmul.f32 %v1705_v51, %v1696_v52  ;;  %v2521_v14 = vld [vmem:[%s4827_s2 + $0x44] ss:$8 sm:$0x3] }
 0x1de   : > { %v1793_v27 = vrot.slane %v2521_v14, %v2771_v45  ;;  %v1797_v13 = vrot.slane %v2521_v14, %v2773_v46 }
 0x1df   : > { %v1700_v34 = vpop.permute.xlu1 %1699  ;;  %v1688_v16 = vadd.f32 %v1686_v39, %v1612_v35  ;;  %v1689_v47 = vadd.f32 %v1687_v59, %v1613_v63 }
 0x1e0   : > { %v1701_v28 = vsel %vm1694_vm5, %v1698_v49, %v1700_v34  ;;  %v1702_v48 = vsel %vm1694_vm5, %v1700_v34, %v1698_v49 }
 0x1e1   : > { %v1709_v60 = vmul.f32 %v1708_v54, %v1701_v28  ;;  %v1710_v23 = vmul.f32 %v1708_v54, %v1702_v48  ;;  %v1729_v4 = vpop.permute.xlu0 %1728  ;;  %v1819_v28 = vstv %s4564_s18 }
 0x1e3   : > { %v1731_v32 = vpop.permute.xlu1 %1730  ;;  %v1711_v6 = vadd.f32 %v1709_v60, %v1706_v56  ;;  %v1712_v22 = vadd.f32 %v1710_v23, %v1707_v41  ;;  %v1822_v56 = vstv %s4566_s19 }
 0x1e4   : > { %v1733_v35 = vsel %vm1732_vm6, %v1729_v4, %v1731_v32  ;;  %v1734_v63 = vsel %vm1732_vm6, %v1731_v32, %v1729_v4 }
 0x1e5   : > { %v1724_v18 = vmul.f32 %v1717_v9, %v1711_v6  ;;  %v1725_v44 = vmul.f32 %v1721_v55, %v1712_v22  ;;  %v1736_v57 = vpop.permute.xlu0 %1735  ;;  %v1744_v26 = vmul.f32 %v1743_v25, %v1733_v35  ;;  %v1745_v1 = vmul.f32 %v1743_v25, %v1734_v63  ;;  %v2522_v9 = vld [vmem:[%s4827_s2 + $0x45] ss:$8 sm:$0x3] }
 0x1e6   : > { %v1831_v23 = vrot.slane %v2522_v9, %v2771_v45  ;;  %v1835_v6 = vrot.slane %v2522_v9, %v2773_v46 }
 0x1e7   : > { %v1738_v0 = vpop.permute.xlu1 %1737  ;;  %v1726_v58 = vadd.f32 %v1724_v18, %v1650_v12  ;;  %v1727_v21 = vadd.f32 %v1725_v44, %v1651_v15 }
 0x1e8   : > { %v1739_v37 = vsel %vm1732_vm6, %v1736_v57, %v1738_v0  ;;  %v1740_v40 = vsel %vm1732_vm6, %v1738_v0, %v1736_v57 }
 0x1e9   : > { %v1747_v10 = vmul.f32 %v1746_v36, %v1739_v37  ;;  %v1748_v53 = vmul.f32 %v1746_v36, %v1740_v40  ;;  %v1767_v31 = vpop.permute.xlu0 %1766  ;;  %v1857_v37 = vstv %s4584_s13 }
 0x1eb   : > { %v1769_v50 = vpop.permute.xlu1 %1768  ;;  %v1749_v33 = vadd.f32 %v1747_v10, %v1744_v26  ;;  %v1750_v8 = vadd.f32 %v1748_v53, %v1745_v1  ;;  %v1860_v26 = vstv %s4586_s15 }
 0x1ec   : > { %v1771_v12 = vsel %vm1770_vm7, %v1767_v31, %v1769_v50  ;;  %v1772_v15 = vsel %vm1770_vm7, %v1769_v50, %v1767_v31 }
 0x1ed   : > { %v1762_v17 = vmul.f32 %v1755_v24, %v1749_v33  ;;  %v1763_v29 = vmul.f32 %v1759_v61, %v1750_v8  ;;  %v1774_v5 = vpop.permute.xlu0 %1773  ;;  %v1782_v7 = vmul.f32 %v1781_v2, %v1771_v12  ;;  %v1783_v52 = vmul.f32 %v1781_v2, %v1772_v15  ;;  %v2523_v24 = vld [vmem:[%s4827_s2 + $0x46] ss:$8 sm:$0x3] }
 0x1ee   : > { %v1869_v53 = vrot.slane %v2523_v24, %v2771_v45  ;;  %v1873_v33 = vrot.slane %v2523_v24, %v2773_v46 }
 0x1ef   : > { %v1776_v30 = vpop.permute.xlu1 %1775  ;;  %v1764_v20 = vadd.f32 %v1762_v17, %v1688_v16  ;;  %v1765_v11 = vadd.f32 %v1763_v29, %v1689_v47 }
 0x1f0   : > { %v1777_v3 = vsel %vm1770_vm7, %v1774_v5, %v1776_v30  ;;  %v1778_v19 = vsel %vm1770_vm7, %v1776_v30, %v1774_v5 }
 0x1f1   : > { %v1785_v43 = vmul.f32 %v1784_v62, %v1777_v3  ;;  %v1786_v39 = vmul.f32 %v1784_v62, %v1778_v19  ;;  %v1805_v54 = vpop.permute.xlu0 %1804  ;;  %v1895_v3 = vstv %s4604_s27 }
 0x1f3   : > { %v1807_v59 = vpop.permute.xlu1 %1806  ;;  %v1787_v51 = vadd.f32 %v1785_v43, %v1782_v7  ;;  %v1788_v34 = vadd.f32 %v1786_v39, %v1783_v52  ;;  %v1898_v7 = vstv %s4606_s25 }
 0x1f4   : > { %v1809_v16 = vsel %vm1808_vm8, %v1805_v54, %v1807_v59  ;;  %v1810_v47 = vsel %vm1808_vm8, %v1807_v59, %v1805_v54 }
 0x1f5   : > { %v1800_v49 = vmul.f32 %v1793_v27, %v1787_v51  ;;  %v1801_v55 = vmul.f32 %v1797_v13, %v1788_v34  ;;  %v1812_v32 = vpop.permute.xlu0 %1811  ;;  %v1820_v35 = vmul.f32 %v1819_v28, %v1809_v16  ;;  %v1821_v63 = vmul.f32 %v1819_v28, %v1810_v47  ;;  %v2524_v13 = vld [vmem:[%s4827_s2 + $0x47] ss:$8 sm:$0x3] }
 0x1f6   : > { %v1907_v59 = vrot.slane %v2524_v13, %v2771_v45  ;;  %v1911_v51 = vrot.slane %v2524_v13, %v2773_v46 }
 0x1f7   : > { %v1814_v48 = vpop.permute.xlu1 %1813  ;;  %v1802_v41 = vadd.f32 %v1800_v49, %v1726_v58  ;;  %v1803_v60 = vadd.f32 %v1801_v55, %v1727_v21 }
 0x1f8   : > { %v1815_v22 = vsel %vm1808_vm8, %v1812_v32, %v1814_v48  ;;  %v1816_v4 = vsel %vm1808_vm8, %v1814_v48, %v1812_v32  ;;  %v1933_v32 = vstv %s4624_s5 }
 0x1f9   : > { %v1823_v38 = vmul.f32 %v1822_v56, %v1815_v22  ;;  %v1824_v18 = vmul.f32 %v1822_v56, %v1816_v4  ;;  %v1843_v36 = vpop.permute.xlu0 %1842 }
 0x1fb   : > { %v1845_v44 = vpop.permute.xlu1 %1844  ;;  %v1825_v25 = vadd.f32 %v1823_v38, %v1820_v35  ;;  %v1826_v0 = vadd.f32 %v1824_v18, %v1821_v63  ;;  %v1936_v35 = vstv %s4626_s9 }
 0x1fc   : > { %v1847_v58 = vsel %vm1846_vm9, %v1843_v36, %v1845_v44  ;;  %v1848_v21 = vsel %vm1846_vm9, %v1845_v44, %v1843_v36 }
 0x1fd   : > { %v1838_v57 = vmul.f32 %v1831_v23, %v1825_v25  ;;  %v1839_v61 = vmul.f32 %v1835_v6, %v1826_v0  ;;  %v1850_v50 = vpop.permute.xlu0 %1849  ;;  %v1858_v12 = vmul.f32 %v1857_v37, %v1847_v58  ;;  %v1859_v15 = vmul.f32 %v1857_v37, %v1848_v21  ;;  %v2525_v23 = vld [vmem:[%s4827_s2 + $0x50] ss:$8 sm:$0x3] }
 0x1fe   : > { %v1945_v44 = vrot.slane %v2525_v23, %v2771_v45  ;;  %v1949_v25 = vrot.slane %v2525_v23, %v2773_v46 }
 0x1ff   : > { %v1852_v40 = vpop.permute.xlu1 %1851  ;;  %v1840_v1 = vadd.f32 %v1838_v57, %v1764_v20  ;;  %v1841_v10 = vadd.f32 %v1839_v61, %v1765_v11 }
 0x200   : > { %v1853_v8 = vsel %vm1846_vm9, %v1850_v50, %v1852_v40  ;;  %v1854_v31 = vsel %vm1846_vm9, %v1852_v40, %v1850_v50  ;;  %v1971_v50 = vstv %s4644_s16 }
 0x201   : > { %v1861_v14 = vmul.f32 %v1860_v26, %v1853_v8  ;;  %v1862_v17 = vmul.f32 %v1860_v26, %v1854_v31  ;;  %v1881_v62 = vpop.permute.xlu0 %1880 }
 0x203   : > { %v1883_v29 = vpop.permute.xlu1 %1882  ;;  %v1863_v2 = vadd.f32 %v1861_v14, %v1858_v12  ;;  %v1864_v30 = vadd.f32 %v1862_v17, %v1859_v15  ;;  %v1974_v12 = vstv %s4646_s30 }
 0x204   : > { %v1885_v20 = vsel %vm1884_vm10, %v1881_v62, %v1883_v29  ;;  %v1886_v11 = vsel %vm1884_vm10, %v1883_v29, %v1881_v62 }
 0x205   : > { %v1876_v27 = vmul.f32 %v1869_v53, %v1863_v2  ;;  %v1877_v5 = vmul.f32 %v1873_v33, %v1864_v30  ;;  %v1888_v39 = vpop.permute.xlu0 %1887  ;;  %v1896_v16 = vmul.f32 %v1895_v3, %v1885_v20  ;;  %v1897_v47 = vmul.f32 %v1895_v3, %v1886_v11  ;;  %v2526_v53 = vld [vmem:[%s4827_s2 + $0x51] ss:$8 sm:$0x3] }
 0x206   : > { %v1983_v29 = vrot.slane %v2526_v53, %v2771_v45  ;;  %v1987_v2 = vrot.slane %v2526_v53, %v2773_v46 }
 0x207   : > { %v1890_v19 = vpop.permute.xlu1 %1889  ;;  %v1878_v52 = vadd.f32 %v1876_v27, %v1802_v41  ;;  %v1879_v43 = vadd.f32 %v1877_v5, %v1803_v60 }
 0x208   : > { %v1891_v34 = vsel %vm1884_vm10, %v1888_v39, %v1890_v19  ;;  %v1892_v54 = vsel %vm1884_vm10, %v1890_v19, %v1888_v39  ;;  %v2527_v39 = vld [vmem:[%s4827_s2 + $0x52] ss:$8 sm:$0x3] }
 0x209   : > { %v1899_v9 = vmul.f32 %v1898_v7, %v1891_v34  ;;  %v1900_v49 = vmul.f32 %v1898_v7, %v1892_v54  ;;  %v1919_v56 = vpop.permute.xlu0 %1918 }
 0x20b   : > { %v1921_v55 = vpop.permute.xlu1 %1920  ;;  %v1901_v28 = vadd.f32 %v1899_v9, %v1896_v16  ;;  %v1902_v48 = vadd.f32 %v1900_v49, %v1897_v47  ;;  %v2012_v16 = vstv %s4666_s28 }
 0x20c   : > { %v1923_v6 = vsel %vm1922_vm11, %v1919_v56, %v1921_v55  ;;  %v1924_v22 = vsel %vm1922_vm11, %v1921_v55, %v1919_v56  ;;  %v2021_v55 = vrot.slane %v2527_v39, %v2771_v45 }
 0x20d   : > { %v1914_v41 = vmul.f32 %v1907_v59, %v1901_v28  ;;  %v1915_v60 = vmul.f32 %v1911_v51, %v1902_v48  ;;  %v1926_v18 = vpop.permute.xlu0 %1925  ;;  %v1934_v58 = vmul.f32 %v1933_v32, %v1923_v6  ;;  %v1935_v21 = vmul.f32 %v1933_v32, %v1924_v22 }
 0x20e   : > { %v2009_v59 = vstv %s4664_s14  ;;  %v2025_v28 = vrot.slane %v2527_v39, %v2773_v46  ;;  %s5188_s14 = sld [smem:[#allocation8_spill]] }
 0x20f   : > { %v1928_v4 = vpop.permute.xlu1 %1927  ;;  %v1916_v63 = vadd.f32 %v1914_v41, %v1840_v1  ;;  %v1917_v38 = vadd.f32 %v1915_v60, %v1841_v10 }
 0x210   : > { %v1929_v0 = vsel %vm1922_vm11, %v1926_v18, %v1928_v4  ;;  %v1930_v36 = vsel %vm1922_vm11, %v1928_v4, %v1926_v18  ;;  %v2528_v18 = vld [vmem:[%s4827_s2 + $0x53] ss:$8 sm:$0x3] }
 0x211   : > { %v1937_v24 = vmul.f32 %v1936_v35, %v1929_v0  ;;  %v1938_v57 = vmul.f32 %v1936_v35, %v1930_v36  ;;  %v1957_v26 = vpop.permute.xlu0 %1956 }
 0x213   : > { %v1959_v61 = vpop.permute.xlu1 %1958  ;;  %v1939_v37 = vadd.f32 %v1937_v24, %v1934_v58  ;;  %v1940_v40 = vadd.f32 %v1938_v57, %v1935_v21  ;;  %v2050_v58 = vstv %s4686_s8 }
 0x214   : > { %v1961_v33 = vsel %vm1960_vm12, %v1957_v26, %v1959_v61  ;;  %v1962_v8 = vsel %vm1960_vm12, %v1959_v61, %v1957_v26  ;;  %v2059_v61 = vrot.slane %v2528_v18, %v2771_v45  ;;  %s5191_s28 = sshll.u32 %s5188_s14, 3 }
 0x215   : > { %v1952_v1 = vmul.f32 %v1945_v44, %v1939_v37  ;;  %v1953_v10 = vmul.f32 %v1949_v25, %v1940_v40  ;;  %v1964_v17 = vpop.permute.xlu0 %1963  ;;  %v1972_v20 = vmul.f32 %v1971_v50, %v1961_v33  ;;  %v1973_v11 = vmul.f32 %v1971_v50, %v1962_v8 }
 0x216   : > { %v2047_v44 = vstv %s4684_s10  ;;  %v2063_v37 = vrot.slane %v2528_v18, %v2773_v46  ;;  %s5192_s10 = sld [smem:[#allocation66_spill]] }
 0x217   : > { %v1966_v31 = vpop.permute.xlu1 %1965  ;;  %v1954_v15 = vadd.f32 %v1952_v1, %v1878_v52  ;;  %v1955_v14 = vadd.f32 %v1953_v10, %v1879_v43 }
 0x218   : > { %v1967_v30 = vsel %vm1960_vm12, %v1964_v17, %v1966_v31  ;;  %v1968_v62 = vsel %vm1960_vm12, %v1966_v31, %v1964_v17  ;;  %v2529_v17 = vld [vmem:[%s4827_s2 + $0x54] ss:$8 sm:$0x3] }
 0x219   : > { %v1975_v27 = vmul.f32 %v1974_v12, %v1967_v30  ;;  %v1976_v5 = vmul.f32 %v1974_v12, %v1968_v62  ;;  %v1995_v7 = vpop.permute.xlu0 %1994 }
 0x21b   : > { %v1997_v13 = vpop.permute.xlu1 %1996  ;;  %v1977_v3 = vadd.f32 %v1975_v27, %v1972_v20  ;;  %v1978_v19 = vadd.f32 %v1976_v5, %v1973_v11  ;;  %v2088_v20 = vstv %s4706_s4 }
 0x21c   : > { %v1999_v51 = vsel %vm1998_vm13, %v1995_v7, %v1997_v13  ;;  %v2000_v34 = vsel %vm1998_vm13, %v1997_v13, %v1995_v7  ;;  %v2097_v13 = vrot.slane %v2529_v17, %v2771_v45  ;;  %s212_s8 = scalar_lea.vmem %s5192_s10, %s5191_s28 }
 0x21d   : > { %v1990_v52 = vmul.f32 %v1983_v29, %v1977_v3  ;;  %v1991_v43 = vmul.f32 %v1987_v2, %v1978_v19  ;;  %v2002_v49 = vpop.permute.xlu0 %2001  ;;  %v2010_v41 = vmul.f32 %v2009_v59, %v1999_v51  ;;  %v2011_v60 = vmul.f32 %v2009_v59, %v2000_v34 }
 0x21e   : > { %v2085_v29 = vstv %s4704_s3  ;;  %v2101_v3 = vrot.slane %v2529_v17, %v2773_v46 }
 0x21f   : > { %v2004_v54 = vpop.permute.xlu1 %2003  ;;  %v1992_v47 = vadd.f32 %v1990_v52, %v1916_v63  ;;  %v1993_v9 = vadd.f32 %v1991_v43, %v1917_v38 }
 0x220   : > { %v2005_v48 = vsel %vm1998_vm13, %v2002_v49, %v2004_v54  ;;  %v2006_v56 = vsel %vm1998_vm13, %v2004_v54, %v2002_v49  ;;  %v2530_v49 = vld [vmem:[%s4827_s2 + $0x55] ss:$8 sm:$0x3] }
 0x221   : > { %v2013_v23 = vmul.f32 %v2012_v16, %v2005_v48  ;;  %v2014_v32 = vmul.f32 %v2012_v16, %v2006_v56  ;;  %v2033_v35 = vpop.permute.xlu0 %2032 }
 0x223   : > { %v2035_v6 = vpop.permute.xlu1 %2034  ;;  %v2015_v22 = vadd.f32 %v2013_v23, %v2010_v41  ;;  %v2016_v4 = vadd.f32 %v2014_v32, %v2011_v60  ;;  %v2126_v41 = vstv %s4726_s21 }
 0x224   : > { %v2037_v25 = vsel %vm2036_vm14, %v2033_v35, %v2035_v6  ;;  %v2038_v0 = vsel %vm2036_vm14, %v2035_v6, %v2033_v35  ;;  %v2135_v6 = vrot.slane %v2530_v49, %v2771_v45 }
 0x225   : > { %v2028_v63 = vmul.f32 %v2021_v55, %v2015_v22  ;;  %v2029_v38 = vmul.f32 %v2025_v28, %v2016_v4  ;;  %v2040_v57 = vpop.permute.xlu0 %2039  ;;  %v2048_v1 = vmul.f32 %v2047_v44, %v2037_v25  ;;  %v2049_v10 = vmul.f32 %v2047_v44, %v2038_v0 }
 0x226   : > { %v2123_v55 = vstv %s4724_s29  ;;  %v2139_v22 = vrot.slane %v2530_v49, %v2773_v46 }
 0x227   : > { %v2042_v36 = vpop.permute.xlu1 %2041  ;;  %v2030_v21 = vadd.f32 %v2028_v63, %v1954_v15  ;;  %v2031_v24 = vadd.f32 %v2029_v38, %v1955_v14 }
 0x228   : > { %v2043_v40 = vsel %vm2036_vm14, %v2040_v57, %v2042_v36  ;;  %v2044_v26 = vsel %vm2036_vm14, %v2042_v36, %v2040_v57  ;;  %v2531_v57 = vld [vmem:[%s4827_s2 + $0x56] ss:$8 sm:$0x3] }
 0x229   : > { %v2051_v53 = vmul.f32 %v2050_v58, %v2043_v40  ;;  %v2052_v50 = vmul.f32 %v2050_v58, %v2044_v26  ;;  %v2071_v12 = vpop.permute.xlu0 %2070 }
 0x22b   : > { %v2073_v33 = vpop.permute.xlu1 %2072  ;;  %v2053_v8 = vadd.f32 %v2051_v53, %v2048_v1  ;;  %v2054_v31 = vadd.f32 %v2052_v50, %v2049_v10  ;;  %v2164_v1 = vstv %s4746_s22 }
 0x22c   : > { %v2075_v2 = vsel %vm2074_vm15, %v2071_v12, %v2073_v33  ;;  %v2076_v30 = vsel %vm2074_vm15, %v2073_v33, %v2071_v12  ;;  %v2173_v33 = vrot.slane %v2531_v57, %v2771_v45 }
 0x22d   : > { %v2066_v15 = vmul.f32 %v2059_v61, %v2053_v8  ;;  %v2067_v14 = vmul.f32 %v2063_v37, %v2054_v31  ;;  %v2078_v5 = vpop.permute.xlu0 %2077  ;;  %v2086_v52 = vmul.f32 %v2085_v29, %v2075_v2  ;;  %v2087_v43 = vmul.f32 %v2085_v29, %v2076_v30 }
 0x22e   : > { %v2161_v61 = vstv %s4744_s17  ;;  %v2177_v8 = vrot.slane %v2531_v57, %v2773_v46 }
 0x22f   : > { %v2080_v62 = vpop.permute.xlu1 %2079  ;;  %v2068_v11 = vadd.f32 %v2066_v15, %v1992_v47  ;;  %v2069_v27 = vadd.f32 %v2067_v14, %v1993_v9 }
 0x230   : > { %v2081_v19 = vsel %vm2074_vm15, %v2078_v5, %v2080_v62  ;;  %v2082_v7 = vsel %vm2074_vm15, %v2080_v62, %v2078_v5  ;;  %v2532_v5 = vld [vmem:[%s4827_s2 + $0x57] ss:$8 sm:$0x3] }
 0x231   : > { %v2089_v39 = vmul.f32 %v2088_v20, %v2081_v19  ;;  %v2090_v59 = vmul.f32 %v2088_v20, %v2082_v7  ;;  %v2109_v16 = vpop.permute.xlu0 %2108 }
 0x233   : > { %v2111_v51 = vpop.permute.xlu1 %2110  ;;  %v2091_v34 = vadd.f32 %v2089_v39, %v2086_v52  ;;  %v2092_v54 = vadd.f32 %v2090_v59, %v2087_v43  ;;  %v2202_v52 = vstv %s4766_s20 }
 0x234   : > { %v2113_v28 = vsel %vm2112_vm0, %v2109_v16, %v2111_v51  ;;  %v2114_v48 = vsel %vm2112_vm0, %v2111_v51, %v2109_v16  ;;  %v2211_v51 = vrot.slane %v2532_v5, %v2771_v45 }
 0x235   : > { %v2104_v47 = vmul.f32 %v2097_v13, %v2091_v34  ;;  %v2105_v9 = vmul.f32 %v2101_v3, %v2092_v54  ;;  %v2116_v32 = vpop.permute.xlu0 %2115  ;;  %v2124_v63 = vmul.f32 %v2123_v55, %v2113_v28  ;;  %v2125_v38 = vmul.f32 %v2123_v55, %v2114_v48 }
 0x236   : > { %v2199_v13 = vstv %s4764_s24  ;;  %v2215_v34 = vrot.slane %v2532_v5, %v2773_v46 }
 0x237   : > { %v2118_v56 = vpop.permute.xlu1 %2117  ;;  %v2106_v60 = vadd.f32 %v2104_v47, %v2030_v21  ;;  %v2107_v23 = vadd.f32 %v2105_v9, %v2031_v24 }
 0x238   : > { %v2119_v4 = vsel %vm2112_vm0, %v2116_v32, %v2118_v56  ;;  %v2120_v35 = vsel %vm2112_vm0, %v2118_v56, %v2116_v32  ;;  %v2533_v32 = vld [vmem:[%s4827_s2 + $0x60] ss:$8 sm:$0x3] }
 0x239   : > { %v2127_v18 = vmul.f32 %v2126_v41, %v2119_v4  ;;  %v2128_v44 = vmul.f32 %v2126_v41, %v2120_v35  ;;  %v2147_v58 = vpop.permute.xlu0 %2146 }
 0x23b   : > { %v2149_v25 = vpop.permute.xlu1 %2148  ;;  %v2129_v0 = vadd.f32 %v2127_v18, %v2124_v63  ;;  %v2130_v36 = vadd.f32 %v2128_v44, %v2125_v38  ;;  %v2240_v63 = vstv %s4786_s11 }
 0x23c   : > { %v2151_v37 = vsel %vm2150_vm2, %v2147_v58, %v2149_v25  ;;  %v2152_v40 = vsel %vm2150_vm2, %v2149_v25, %v2147_v58  ;;  %v2249_v25 = vrot.slane %v2533_v32, %v2771_v45 }
 0x23d   : > { %v2142_v21 = vmul.f32 %v2135_v6, %v2129_v0  ;;  %v2143_v24 = vmul.f32 %v2139_v22, %v2130_v36  ;;  %v2154_v50 = vpop.permute.xlu0 %2153  ;;  %v2162_v15 = vmul.f32 %v2161_v61, %v2151_v37  ;;  %v2163_v14 = vmul.f32 %v2161_v61, %v2152_v40 }
 0x23e   : > { %v2237_v6 = vstv %s4784_s26  ;;  %v2253_v0 = vrot.slane %v2533_v32, %v2773_v46 }
 0x23f   : > { %v2156_v26 = vpop.permute.xlu1 %2155  ;;  %v2144_v10 = vadd.f32 %v2142_v21, %v2068_v11  ;;  %v2145_v53 = vadd.f32 %v2143_v24, %v2069_v27 }
 0x240   : > { %v2157_v31 = vsel %vm2150_vm2, %v2154_v50, %v2156_v26  ;;  %v2158_v12 = vsel %vm2150_vm2, %v2156_v26, %v2154_v50  ;;  %v2262_v50 = vstv %s311_s7 }
 0x241   : > { %v2165_v17 = vmul.f32 %v2164_v1, %v2157_v31  ;;  %v2166_v29 = vmul.f32 %v2164_v1, %v2158_v12  ;;  %v2185_v20 = vpop.permute.xlu0 %2184 }
 0x243   : > { %v2187_v2 = vpop.permute.xlu1 %2186  ;;  %v2167_v30 = vadd.f32 %v2165_v17, %v2162_v15  ;;  %v2168_v62 = vadd.f32 %v2166_v29, %v2163_v14 }
 0x244   : > { %v2189_v3 = vsel %vm2188_vm3, %v2185_v20, %v2187_v2  ;;  %v2190_v19 = vsel %vm2188_vm3, %v2187_v2, %v2185_v20 }
 0x245   : > { %v2180_v11 = vmul.f32 %v2173_v33, %v2167_v30  ;;  %v2181_v27 = vmul.f32 %v2177_v8, %v2168_v62  ;;  %v2192_v59 = vpop.permute.xlu0 %2191  ;;  %v2200_v47 = vmul.f32 %v2199_v13, %v2189_v3  ;;  %v2201_v9 = vmul.f32 %v2199_v13, %v2190_v19 }
 0x247   : > { %v2194_v7 = vpop.permute.xlu1 %2193  ;;  %v2182_v43 = vadd.f32 %v2180_v11, %v2106_v60  ;;  %v2183_v39 = vadd.f32 %v2181_v27, %v2107_v23  ;;  %v5189_v11 = vld [vmem:[#allocation10_spill] sm:$0xff] }
 0x248   : > { %v2195_v54 = vsel %vm2188_vm3, %v2192_v59, %v2194_v7  ;;  %v2196_v16 = vsel %vm2188_vm3, %v2194_v7, %v2192_v59 }
 0x249   : > { %v2203_v49 = vmul.f32 %v2202_v52, %v2195_v54  ;;  %v2204_v55 = vmul.f32 %v2202_v52, %v2196_v16  ;;  %v2223_v41 = vpop.permute.xlu0 %2222  ;;  %v2297_v52 = vld [vmem:[%s5187_s12] sm:$0xff] }
 0x24b   : > { %v2225_v28 = vpop.permute.xlu1 %2224  ;;  %v2205_v48 = vadd.f32 %v2203_v49, %v2200_v47  ;;  %v2206_v56 = vadd.f32 %v2204_v55, %v2201_v9 }
 0x24c   : > { %v2227_v22 = vsel %vm2226_vm4, %v2223_v41, %v2225_v28  ;;  %v2228_v4 = vsel %vm2226_vm4, %v2225_v28, %v2223_v41 }
 0x24d   : > { %v2218_v60 = vmul.f32 %v2211_v51, %v2205_v48  ;;  %v2219_v23 = vmul.f32 %v2215_v34, %v2206_v56  ;;  %v2230_v44 = vpop.permute.xlu0 %2229  ;;  %v2238_v21 = vmul.f32 %v2237_v6, %v2227_v22  ;;  %v2239_v24 = vmul.f32 %v2237_v6, %v2228_v4 }
 0x24f   : > { %v2232_v35 = vpop.permute.xlu1 %2231  ;;  %v2220_v38 = vadd.f32 %v2218_v60, %v2144_v10  ;;  %v2221_v18 = vadd.f32 %v2219_v23, %v2145_v53 }
 0x250   : > { %v2233_v36 = vsel %vm2226_vm4, %v2230_v44, %v2232_v35  ;;  %v2234_v58 = vsel %vm2226_vm4, %v2232_v35, %v2230_v44 }
 0x251   : > { %v2241_v57 = vmul.f32 %v2240_v63, %v2233_v36  ;;  %v2242_v61 = vmul.f32 %v2240_v63, %v2234_v58 }
 0x253   : > { %v2243_v37 = vadd.f32 %v2241_v57, %v2238_v21  ;;  %v2244_v40 = vadd.f32 %v2242_v61, %v2239_v24 }
 0x255   : > { %v2256_v26 = vmul.f32 %v2249_v25, %v2243_v37  ;;  %v2257_v1 = vmul.f32 %v2253_v0, %v2244_v40 }
 0x257   : > { %v2258_v10 = vadd.f32 %v2256_v26, %v2182_v43  ;;  %v2259_v53 = vadd.f32 %v2257_v1, %v2183_v39 }
 0x259   : > { %v2260_v33 = vadd.f32 %v2258_v10, %v2220_v38  ;;  %v2261_v8 = vadd.f32 %v2259_v53, %v2221_v18 }
 0x25b   : > { %v2263_v31 = vadd.f32 %v2262_v50, %v2260_v33  ;;  %v2264_v12 = vadd.f32 %v2262_v50, %v2261_v8 }
 0x25d   : > { %v2534_v15 = vmul.f32 -1.442695, %v2263_v31  ;;  %v2535_v14 = vmul.f32 -1.442695, %v2264_v12 }
 0x25f   : > { %2609 = vpow2.f32 %v2534_v15 }
 0x260   : > { %2611 = vpow2.f32 %v2535_v14 }
 0x269   : > { %v2610_v42 = vpop.eup %2609 }
 0x26a   : > { %v2612_v17 = vpop.eup %2611  ;;  %v2271_v29 = vadd.f32 1.0, %v2610_v42 }
 0x26b   : > { %v2272_v2 = vadd.f32 1.0, %v2612_v17 }
 0x26c   : > { %2613 = vrcp.f32 %v2271_v29 }
 0x26d   : > { %2615 = vrcp.f32 %v2272_v2 }
 0x276   : > { %v2614_v30 = vpop.eup %2613 }
 0x277   : > { %v2616_v62 = vpop.eup %2615 }
 0x278   : > { %v2279_v20 = vcombine.low %v2614_v30, %v2616_v62 }
 0x27a   : > { %v2286_v27 = vrot.slane %v2279_v20, %v5189_v11 }
 0x27c   : > { %v2293_v5 = vrot.slane %v2286_v27, %v5189_v11 }
 0x27e   : > { %2295 = vst.msk [vmem:[#allocation2] sm:$0x3] %vm2760_vm1, %v2293_v5 }
 0x285   : > { %v2296_v3 = vld [vmem:[#allocation2] sm:$0x3] }
 0x286   : > { %v2302_v19 = vrot.slane %v2296_v3, %v2771_v45  ;;  %v2306_v7 = vrot.slane %v2296_v3, %v2773_v46 }
 0x288   : > { %v2307_v43 = vcombine.low %v2302_v19, %v2306_v7 }
 0x28a   : > { %v2309_v39 = vmul.f32 %v2307_v43, %v2297_v52 }
 0x28c   : > { %2310 = vst [vmem:[%s212_s8] sm:$0xff] %v2309_v39 }
 0x28d PF: > { %s5193_s6 = sld [smem:[#allocation7_spill]] }
 0x293   : > { %s16_s17 = sadd.s32 1, %s5193_s6  }
 0x294   : > { %p13_p1 = scmp.ge.s32.totalorder %s16_s17, 4  }
 0x296   :  { %15 = sbr.rel (!%p13_p1) target bundleno = 6 (0x6), region = 120 }
 0x29d   :  { %2332 = vsyncpa [#allocation5], 1 }
 0x29e   :  { %2334 = vsyncpa [#allocation5 + $0x1], 1 }

</bundles_post_ra>
